<compile_context>
chip_gen: v5e
topology: v5e:2x2
jax: 0.10.0
libtpu: 0.0.40
codegen_flags: <defaults>
</compile_context>

<pallas_src>
import functools
import math

import jax
import jax.numpy as jnp
from jax import lax
from jax.experimental import pallas as pl
from jax.experimental.pallas import tpu as pltpu

# ---- model dims (hidden_size=16, heads=2, layers=2, num_time_series=1) ----
F_IN = 1
H = 16
NH = 2
HD = H // NH          # 8
L = 2
FF = 4 * H            # 64
EPS = 1e-5

# packed sublane layout of w_big_T / bias column 0: [Wq^T; Wk^T; Wv^T; Wo^T; W1^T]
_QKV = 3 * H          # 48
_WO_END = 4 * H       # 64
_WIDTH = 4 * H + FF   # 128


def _layernorm_fm(x, gamma_col, beta_col):
    # feature-major layernorm: x is (H, rows), reduce over the feature (sublane) axis.
    mu = jnp.mean(x, axis=0, keepdims=True)
    xc = x - mu
    var = jnp.mean(xc * xc, axis=0, keepdims=True)
    return xc * lax.rsqrt(var + EPS) * gamma_col + beta_col


def model_kernel(x_ref, wbig_ref, w2_ref, cvec_ref, head_ref, out_ref, *, seq_len):
    S = seq_len
    rows = x_ref.shape[-1]
    TB = rows // S

    head = head_ref[...]                 # (H, 4): [w_in | b_in | w_out | b_out@row0]
    w_in = head[:, 0:1]                  # (H, 1)
    b_in = head[:, 1:2]
    w_out = head[:, 2:3]
    b_out = head[0:1, 3:4]               # (1, 1)

    # input projection 1->H on the VPU (broadcast, no K=1 matmul, no relayout)
    x = x_ref[...].reshape(1, rows).astype(jnp.float32)     # lanes are position-major
    h = w_in * x + b_in                                      # (H, rows)

    for l in range(L):                   # static unrolled loop over the 2 encoder layers
        Wl = wbig_ref[l]                 # (128, 16) = [WqT;WkT;WvT;WoT;W1T]
        W2l = w2_ref[l]                  # (16, 64)  = W2^T
        C = cvec_ref[l]                  # (128, 8) packed column constants

        b_qkv = C[0:_QKV, 0:1]           # (48, 1)
        b_o = C[_QKV:_WO_END, 0:1]       # (16, 1)
        b_1 = C[_WO_END:_WIDTH, 0:1]     # (64, 1)
        b_2 = C[0:H, 1:2]
        g1 = C[0:H, 2:3]
        be1 = C[0:H, 3:4]
        g2 = C[0:H, 4:5]
        be2 = C[0:H, 5:6]

        # fused QKV projection, feature-major: (48,16) @ (16,rows) -> lane-dense (48,rows)
        qkv = jnp.dot(Wl[0:_QKV], h, preferred_element_type=jnp.float32) + b_qkv
        q = qkv[0:H]                     # 1/sqrt(HD) already folded into Wq/bq
        k = qkv[H:2 * H]
        v = qkv[2 * H:3 * H]

        # ---- attention (VPU/XLU, no MXU): relative-shift formulation -------------
        # With position-major lanes (r = s*TB + b), a lane roll of the whole (H, rows)
        # block by t*TB is a circular shift of the key position inside every sequence.
        s0_list, s1_list = [], []
        for t in range(S):
            k_t = pltpu.roll(k, shift=t * TB, axis=1) if t else k
            prod = q * k_t                                           # (H, rows)
            s0_list.append(jnp.sum(prod[0:HD], axis=0, keepdims=True))   # (1, rows)
            s1_list.append(jnp.sum(prod[HD:H], axis=0, keepdims=True))
        m0 = functools.reduce(jnp.maximum, s0_list)
        m1 = functools.reduce(jnp.maximum, s1_list)
        e0 = [jnp.exp(s - m0) for s in s0_list]
        e1 = [jnp.exp(s - m1) for s in s1_list]
        d0 = functools.reduce(jnp.add, e0)
        d1 = functools.reduce(jnp.add, e1)

        acc0 = jnp.zeros((HD, rows), jnp.float32)
        acc1 = jnp.zeros((HD, rows), jnp.float32)
        for t in range(S):
            v_t = pltpu.roll(v, shift=t * TB, axis=1) if t else v
            acc0 = acc0 + e0[t] * v_t[0:HD]
            acc1 = acc1 + e1[t] * v_t[HD:H]
        # exact divide (review: approx reciprocal dropped for accuracy)
        attn = jnp.concatenate([acc0 / d0, acc1 / d1], axis=0)      # (H, rows)

        attn = jnp.dot(Wl[_QKV:_WO_END], attn,
                       preferred_element_type=jnp.float32) + b_o
        h = _layernorm_fm(h + attn, g1, be1)

        # feed-forward
        ff = jnp.dot(Wl[_WO_END:_WIDTH], h, preferred_element_type=jnp.float32) + b_1
        ff = jnp.maximum(ff, 0.0)
        ff = jnp.dot(W2l, ff, preferred_element_type=jnp.float32) + b_2
        h = _layernorm_fm(h + ff, g2, be2)

    # final Linear(H, 1): sublane reduce -> lane-dense (1, rows) output block
    y = jnp.sum(h * w_out, axis=0, keepdims=True) + b_out
    out_ref[...] = y.reshape(out_ref.shape).astype(out_ref.dtype)


def init_params(key):
    ks = jax.random.split(key, 24)

    def dense(k, shape, fan_in):
        return jax.random.normal(k, shape, jnp.float32) / math.sqrt(fan_in)

    return {
        "w_in": dense(ks[0], (F_IN, H), F_IN),
        "b_in": jnp.zeros((1, H), jnp.float32),
        "wq": dense(ks[1], (L, H, H), H),
        "bq": jnp.zeros((L, 1, H), jnp.float32),
        "wk": dense(ks[2], (L, H, H), H),
        "bk": jnp.zeros((L, 1, H), jnp.float32),
        "wv": dense(ks[3], (L, H, H), H),
        "bv": jnp.zeros((L, 1, H), jnp.float32),
        "wo": dense(ks[4], (L, H, H), H),
        "bo": jnp.zeros((L, 1, H), jnp.float32),
        "g1": jnp.ones((L, 1, H), jnp.float32),
        "be1": jnp.zeros((L, 1, H), jnp.float32),
        "w1": dense(ks[5], (L, H, FF), H),
        "b1": jnp.zeros((L, 1, FF), jnp.float32),
        "w2": dense(ks[6], (L, FF, H), FF),
        "b2": jnp.zeros((L, 1, H), jnp.float32),
        "g2": jnp.ones((L, 1, H), jnp.float32),
        "be2": jnp.zeros((L, 1, H), jnp.float32),
        "w_out": dense(ks[7], (H, 1), H),
        "b_out": jnp.zeros((1, 1), jnp.float32),
    }


def pack_params(p):
    """Pack the 20 logical params into 4 feature-major kernel arguments."""
    inv = 1.0 / math.sqrt(HD)
    wq = p["wq"] * inv                   # fold 1/sqrt(head_dim) into the query projection
    bq = p["bq"] * inv

    wbig_T = jnp.concatenate([
        jnp.swapaxes(wq, 1, 2),
        jnp.swapaxes(p["wk"], 1, 2),
        jnp.swapaxes(p["wv"], 1, 2),
        jnp.swapaxes(p["wo"], 1, 2),
        jnp.swapaxes(p["w1"], 1, 2),
    ], axis=1)                           # (L, 128, 16)
    w2_T = jnp.swapaxes(p["w2"], 1, 2)   # (L, 16, 64)

    def col(a):                          # (L, 1, C) -> (L, C, 1)
        return jnp.swapaxes(a, 1, 2)

    def padded(a):                       # (L, C, 1) -> (L, 128, 1)
        pad = jnp.zeros((L, _WIDTH - a.shape[1], 1), jnp.float32)
        return jnp.concatenate([a, pad], axis=1)

    zcol = jnp.zeros((L, _WIDTH, 1), jnp.float32)
    col0 = jnp.concatenate([col(bq), col(p["bk"]), col(p["bv"]),
                            col(p["bo"]), col(p["b1"])], axis=1)       # (L, 128, 1)
    cvecs = jnp.concatenate([
        col0,
        padded(col(p["b2"])),
        padded(col(p["g1"])),
        padded(col(p["be1"])),
        padded(col(p["g2"])),
        padded(col(p["be2"])),
        zcol, zcol,
    ], axis=2)                           # (L, 128, 8)

    b_out_col = jnp.concatenate([p["b_out"], jnp.zeros((H - 1, 1), jnp.float32)], axis=0)
    head_vec = jnp.concatenate([
        jnp.swapaxes(p["w_in"], 0, 1),   # (16, 1)
        jnp.swapaxes(p["b_in"], 0, 1),
        p["w_out"],
        b_out_col,
    ], axis=1)                           # (16, 4)
    return wbig_T, w2_T, cvecs, head_vec


def _tile_rows(batch, seq, target_rows=2048):
    """Pick TB so rows = TB*seq is a multiple of 128, ~target_rows, covering the batch."""
    tb0 = 128 // math.gcd(seq, 128)                  # minimal TB with rows % 128 == 0
    groups_needed = -(-batch // tb0)
    groups_cap = max(1, target_rows // (tb0 * seq))
    groups = max(1, min(groups_needed, groups_cap))
    tb = tb0 * groups
    nblk = -(-batch // tb)
    # note: on v7x keeping nblk >= 2 would let the two TensorCores split the grid; for tiny
    # batches (like the test) nblk == 1 is fine.
    return tb, nblk


def time_series_model(x, p):
    B, S, _ = x.shape
    TB, nblk = _tile_rows(B, S)
    rows = TB * S
    B_pad = nblk * TB

    wbig_T, w2_T, cvecs, head_vec = pack_params(p)

    x2 = x[..., 0]                                    # (B, S): drop the size-1 feature dim
    x2 = jnp.pad(x2, ((0, B_pad - B), (0, 0)))        # zero-pad batch (numerically safe)
    # position-major lanes inside each block: r = s*TB + b
    x_pm = x2.reshape(nblk, TB, S).transpose(0, 2, 1).reshape(nblk, 1, rows)

    def full_spec(a):
        return pl.BlockSpec(a.shape, lambda b: (0,) * a.ndim)

    kernel = functools.partial(model_kernel, seq_len=S)

    out_slab = pl.pallas_call(
        kernel,
        out_shape=jax.ShapeDtypeStruct((nblk, 1, rows), jnp.float32),
        grid_spec=pltpu.PrefetchScalarGridSpec(
            num_scalar_prefetch=0,
            grid=(nblk,),
            in_specs=[pl.BlockSpec((1, 1, rows), lambda b: (b, 0, 0)),
                      full_spec(wbig_T), full_spec(w2_T),
                      full_spec(cvecs), full_spec(head_vec)],
            out_specs=pl.BlockSpec((1, 1, rows), lambda b: (b, 0, 0)),
        ),
        compiler_params=pltpu.CompilerParams(dimension_semantics=("parallel",)),
    )(x_pm, wbig_T, w2_T, cvecs, head_vec)

    # undo position-major ordering and batch padding
    y = out_slab.reshape(nblk, S, TB).transpose(0, 2, 1).reshape(B_pad, S)[:B]
    return y[..., None]


# ---- pure-JAX reference for correctness check ----
def reference(x, p):
    def ln(v, g, b):
        mu = jnp.mean(v, -1, keepdims=True)
        var = jnp.mean((v - mu) ** 2, -1, keepdims=True)
        return (v - mu) / jnp.sqrt(var + EPS) * g + b

    def one(xi):
        h = xi @ p["w_in"] + p["b_in"]
        for l in range(L):
            q = h @ p["wq"][l] + p["bq"][l]
            k = h @ p["wk"][l] + p["bk"][l]
            v = h @ p["wv"][l] + p["bv"][l]
            outs = []
            for hh in range(NH):
                qh, kh, vh = (t[:, hh * HD:(hh + 1) * HD] for t in (q, k, v))
                s = qh @ kh.T / math.sqrt(HD)
                pr = jax.nn.softmax(s, axis=-1)
                outs.append(pr @ vh)
            attn = jnp.concatenate(outs, -1) @ p["wo"][l] + p["bo"][l]
            h = ln(h + attn, p["g1"][l], p["be1"][l])
            ff = jax.nn.relu(h @ p["w1"][l] + p["b1"][l]) @ p["w2"][l] + p["b2"][l]
            h = ln(h + ff, p["g2"][l], p["be2"][l])
        return h @ p["w_out"] + p["b_out"]

    return jax.vmap(one)(x)


if __name__ == "__main__":
    jax.config.update("jax_default_matmul_precision", "highest")

    key = jax.random.PRNGKey(0)
    k_x, k_p = jax.random.split(key)

    B, S = 2, 8
    x = jax.random.normal(k_x, (B, S, F_IN), jnp.float32)
    params = init_params(k_p)

    out = jax.block_until_ready(time_series_model(x, params))
    ref = reference(x, params)

    assert out.shape == (B, S, 1)
    assert jnp.allclose(out, ref, atol=1e-3, rtol=1e-3), "mismatch vs reference"

    print("KERNEL_OK")
</pallas_src>

<mosaic_0001>
module attributes {stable_mosaic.version = 11 : i64} {
  func.func @model_kernel(%arg0: i32, %arg1: memref<1x1x128xf32, #tpu.memory_space<vmem>>, %arg2: memref<2x128x16xf32, #tpu.memory_space<vmem>>, %arg3: memref<2x16x64xf32, #tpu.memory_space<vmem>>, %arg4: memref<2x128x8xf32, #tpu.memory_space<vmem>>, %arg5: memref<16x4xf32, #tpu.memory_space<vmem>>, %arg6: memref<1x1x128xf32, #tpu.memory_space<vmem>>) attributes {dimension_semantics = [#tpu.dimension_semantics<parallel>], iteration_bounds = array<i64: 1>, scalar_prefetch = 0 : i64, scratch_operands = 0 : i64, tpu.core_type = #tpu.core_type<tc>, window_params = [{transform_indices = @transform_0, window_bounds = array<i64: 1, 1, 128>}, {pipeline_mode = #tpu.pipeline_mode<synchronous>, transform_indices = @transform_1, window_bounds = array<i64: 2, 128, 16>}, {pipeline_mode = #tpu.pipeline_mode<synchronous>, transform_indices = @transform_2, window_bounds = array<i64: 2, 16, 64>}, {pipeline_mode = #tpu.pipeline_mode<synchronous>, transform_indices = @transform_3, window_bounds = array<i64: 2, 128, 8>}, {pipeline_mode = #tpu.pipeline_mode<synchronous>, transform_indices = @transform_4, window_bounds = array<i64: 16, 4>}, {transform_indices = @transform_5, window_bounds = array<i64: 1, 1, 128>}]} {
    %c0 = arith.constant 0 : index
    %c0_0 = arith.constant 0 : index
    %0 = vector.load %arg5[%c0, %c0_0] : memref<16x4xf32, #tpu.memory_space<vmem>>, vector<16x4xf32>
    %1 = vector.extract_strided_slice %0 {offsets = [0, 0], sizes = [16, 1], strides = [1, 1]} : vector<16x4xf32> to vector<16x1xf32>
    %2 = vector.extract_strided_slice %0 {offsets = [0, 1], sizes = [16, 1], strides = [1, 1]} : vector<16x4xf32> to vector<16x1xf32>
    %3 = vector.extract_strided_slice %0 {offsets = [0, 2], sizes = [16, 1], strides = [1, 1]} : vector<16x4xf32> to vector<16x1xf32>
    %4 = vector.extract_strided_slice %0 {offsets = [0, 3], sizes = [1, 1], strides = [1, 1]} : vector<16x4xf32> to vector<1x1xf32>
    %c0_1 = arith.constant 0 : index
    %c0_2 = arith.constant 0 : index
    %c0_3 = arith.constant 0 : index
    %5 = vector.load %arg1[%c0_1, %c0_2, %c0_3] : memref<1x1x128xf32, #tpu.memory_space<vmem>>, vector<1x1x128xf32>
    %6 = vector.shape_cast %5 : vector<1x1x128xf32> to vector<1x128xf32>
    %7 = vector.broadcast %1 : vector<16x1xf32> to vector<16x128xf32>
    %8 = vector.broadcast %6 : vector<1x128xf32> to vector<16x128xf32>
    %9 = arith.mulf %7, %8 : vector<16x128xf32>
    %10 = vector.broadcast %2 : vector<16x1xf32> to vector<16x128xf32>
    %11 = arith.addf %9, %10 : vector<16x128xf32>
    %c0_4 = arith.constant 0 : index
    %c0_5 = arith.constant 0 : index
    %c0_6 = arith.constant 0 : index
    %12 = vector.load %arg2[%c0_4, %c0_5, %c0_6] : memref<2x128x16xf32, #tpu.memory_space<vmem>>, vector<1x128x16xf32>
    %13 = vector.shape_cast %12 : vector<1x128x16xf32> to vector<128x16xf32>
    %c0_7 = arith.constant 0 : index
    %c0_8 = arith.constant 0 : index
    %c0_9 = arith.constant 0 : index
    %14 = vector.load %arg3[%c0_7, %c0_8, %c0_9] : memref<2x16x64xf32, #tpu.memory_space<vmem>>, vector<1x16x64xf32>
    %15 = vector.shape_cast %14 : vector<1x16x64xf32> to vector<16x64xf32>
    %c0_10 = arith.constant 0 : index
    %c0_11 = arith.constant 0 : index
    %c0_12 = arith.constant 0 : index
    %16 = vector.load %arg4[%c0_10, %c0_11, %c0_12] : memref<2x128x8xf32, #tpu.memory_space<vmem>>, vector<1x128x8xf32>
    %17 = vector.shape_cast %16 : vector<1x128x8xf32> to vector<128x8xf32>
    %18 = vector.extract_strided_slice %17 {offsets = [0, 0], sizes = [48, 1], strides = [1, 1]} : vector<128x8xf32> to vector<48x1xf32>
    %19 = vector.extract_strided_slice %17 {offsets = [48, 0], sizes = [16, 1], strides = [1, 1]} : vector<128x8xf32> to vector<16x1xf32>
    %20 = vector.extract_strided_slice %17 {offsets = [64, 0], sizes = [64, 1], strides = [1, 1]} : vector<128x8xf32> to vector<64x1xf32>
    %21 = vector.extract_strided_slice %17 {offsets = [0, 1], sizes = [16, 1], strides = [1, 1]} : vector<128x8xf32> to vector<16x1xf32>
    %22 = vector.extract_strided_slice %17 {offsets = [0, 2], sizes = [16, 1], strides = [1, 1]} : vector<128x8xf32> to vector<16x1xf32>
    %23 = vector.extract_strided_slice %17 {offsets = [0, 3], sizes = [16, 1], strides = [1, 1]} : vector<128x8xf32> to vector<16x1xf32>
    %24 = vector.extract_strided_slice %17 {offsets = [0, 4], sizes = [16, 1], strides = [1, 1]} : vector<128x8xf32> to vector<16x1xf32>
    %25 = vector.extract_strided_slice %17 {offsets = [0, 5], sizes = [16, 1], strides = [1, 1]} : vector<128x8xf32> to vector<16x1xf32>
    %26 = vector.extract_strided_slice %13 {offsets = [0, 0], sizes = [48, 16], strides = [1, 1]} : vector<128x16xf32> to vector<48x16xf32>
    %cst = arith.constant dense<0.000000e+00> : vector<48x128xf32>
    %27 = tpu.matmul %26, %11, %cst {dimension_numbers = #tpu.dot_dimension_numbers<[1], [0], [0], [1], [0, 0, 1, 1], [], []>, precision = #tpu.contract_precision<fp32>} : vector<48x16xf32>, vector<16x128xf32>, vector<48x128xf32> -> vector<48x128xf32>
    %28 = vector.broadcast %18 : vector<48x1xf32> to vector<48x128xf32>
    %29 = arith.addf %27, %28 : vector<48x128xf32>
    %30 = vector.extract_strided_slice %29 {offsets = [0, 0], sizes = [16, 128], strides = [1, 1]} : vector<48x128xf32> to vector<16x128xf32>
    %31 = vector.extract_strided_slice %29 {offsets = [16, 0], sizes = [16, 128], strides = [1, 1]} : vector<48x128xf32> to vector<16x128xf32>
    %32 = vector.extract_strided_slice %29 {offsets = [32, 0], sizes = [16, 128], strides = [1, 1]} : vector<48x128xf32> to vector<16x128xf32>
    %33 = arith.mulf %30, %31 : vector<16x128xf32>
    %34 = vector.extract_strided_slice %33 {offsets = [0, 0], sizes = [8, 128], strides = [1, 1]} : vector<16x128xf32> to vector<8x128xf32>
    %cst_13 = arith.constant dense<0.000000e+00> : vector<128xf32>
    %35 = vector.multi_reduction <add>, %34, %cst_13 [0] : vector<8x128xf32> to vector<128xf32>
    %36 = vector.shape_cast %35 : vector<128xf32> to vector<1x128xf32>
    %37 = vector.extract_strided_slice %33 {offsets = [8, 0], sizes = [8, 128], strides = [1, 1]} : vector<16x128xf32> to vector<8x128xf32>
    %cst_14 = arith.constant dense<0.000000e+00> : vector<128xf32>
    %38 = vector.multi_reduction <add>, %37, %cst_14 [0] : vector<8x128xf32> to vector<128xf32>
    %39 = vector.shape_cast %38 : vector<128xf32> to vector<1x128xf32>
    %c16_i32 = arith.constant 16 : i32
    %40 = tpu.dynamic_rotate %31 by %c16_i32 dim 1 : vector<16x128xf32>, i32 -> vector<16x128xf32>
    %41 = arith.mulf %30, %40 : vector<16x128xf32>
    %42 = vector.extract_strided_slice %41 {offsets = [0, 0], sizes = [8, 128], strides = [1, 1]} : vector<16x128xf32> to vector<8x128xf32>
    %cst_15 = arith.constant dense<0.000000e+00> : vector<128xf32>
    %43 = vector.multi_reduction <add>, %42, %cst_15 [0] : vector<8x128xf32> to vector<128xf32>
    %44 = vector.shape_cast %43 : vector<128xf32> to vector<1x128xf32>
    %45 = vector.extract_strided_slice %41 {offsets = [8, 0], sizes = [8, 128], strides = [1, 1]} : vector<16x128xf32> to vector<8x128xf32>
    %cst_16 = arith.constant dense<0.000000e+00> : vector<128xf32>
    %46 = vector.multi_reduction <add>, %45, %cst_16 [0] : vector<8x128xf32> to vector<128xf32>
    %47 = vector.shape_cast %46 : vector<128xf32> to vector<1x128xf32>
    %c32_i32 = arith.constant 32 : i32
    %48 = tpu.dynamic_rotate %31 by %c32_i32 dim 1 : vector<16x128xf32>, i32 -> vector<16x128xf32>
    %49 = arith.mulf %30, %48 : vector<16x128xf32>
    %50 = vector.extract_strided_slice %49 {offsets = [0, 0], sizes = [8, 128], strides = [1, 1]} : vector<16x128xf32> to vector<8x128xf32>
    %cst_17 = arith.constant dense<0.000000e+00> : vector<128xf32>
    %51 = vector.multi_reduction <add>, %50, %cst_17 [0] : vector<8x128xf32> to vector<128xf32>
    %52 = vector.shape_cast %51 : vector<128xf32> to vector<1x128xf32>
    %53 = vector.extract_strided_slice %49 {offsets = [8, 0], sizes = [8, 128], strides = [1, 1]} : vector<16x128xf32> to vector<8x128xf32>
    %cst_18 = arith.constant dense<0.000000e+00> : vector<128xf32>
    %54 = vector.multi_reduction <add>, %53, %cst_18 [0] : vector<8x128xf32> to vector<128xf32>
    %55 = vector.shape_cast %54 : vector<128xf32> to vector<1x128xf32>
    %c48_i32 = arith.constant 48 : i32
    %56 = tpu.dynamic_rotate %31 by %c48_i32 dim 1 : vector<16x128xf32>, i32 -> vector<16x128xf32>
    %57 = arith.mulf %30, %56 : vector<16x128xf32>
    %58 = vector.extract_strided_slice %57 {offsets = [0, 0], sizes = [8, 128], strides = [1, 1]} : vector<16x128xf32> to vector<8x128xf32>
    %cst_19 = arith.constant dense<0.000000e+00> : vector<128xf32>
    %59 = vector.multi_reduction <add>, %58, %cst_19 [0] : vector<8x128xf32> to vector<128xf32>
    %60 = vector.shape_cast %59 : vector<128xf32> to vector<1x128xf32>
    %61 = vector.extract_strided_slice %57 {offsets = [8, 0], sizes = [8, 128], strides = [1, 1]} : vector<16x128xf32> to vector<8x128xf32>
    %cst_20 = arith.constant dense<0.000000e+00> : vector<128xf32>
    %62 = vector.multi_reduction <add>, %61, %cst_20 [0] : vector<8x128xf32> to vector<128xf32>
    %63 = vector.shape_cast %62 : vector<128xf32> to vector<1x128xf32>
    %c64_i32 = arith.constant 64 : i32
    %64 = tpu.dynamic_rotate %31 by %c64_i32 dim 1 : vector<16x128xf32>, i32 -> vector<16x128xf32>
    %65 = arith.mulf %30, %64 : vector<16x128xf32>
    %66 = vector.extract_strided_slice %65 {offsets = [0, 0], sizes = [8, 128], strides = [1, 1]} : vector<16x128xf32> to vector<8x128xf32>
    %cst_21 = arith.constant dense<0.000000e+00> : vector<128xf32>
    %67 = vector.multi_reduction <add>, %66, %cst_21 [0] : vector<8x128xf32> to vector<128xf32>
    %68 = vector.shape_cast %67 : vector<128xf32> to vector<1x128xf32>
    %69 = vector.extract_strided_slice %65 {offsets = [8, 0], sizes = [8, 128], strides = [1, 1]} : vector<16x128xf32> to vector<8x128xf32>
    %cst_22 = arith.constant dense<0.000000e+00> : vector<128xf32>
    %70 = vector.multi_reduction <add>, %69, %cst_22 [0] : vector<8x128xf32> to vector<128xf32>
    %71 = vector.shape_cast %70 : vector<128xf32> to vector<1x128xf32>
    %c80_i32 = arith.constant 80 : i32
    %72 = tpu.dynamic_rotate %31 by %c80_i32 dim 1 : vector<16x128xf32>, i32 -> vector<16x128xf32>
    %73 = arith.mulf %30, %72 : vector<16x128xf32>
    %74 = vector.extract_strided_slice %73 {offsets = [0, 0], sizes = [8, 128], strides = [1, 1]} : vector<16x128xf32> to vector<8x128xf32>
    %cst_23 = arith.constant dense<0.000000e+00> : vector<128xf32>
    %75 = vector.multi_reduction <add>, %74, %cst_23 [0] : vector<8x128xf32> to vector<128xf32>
    %76 = vector.shape_cast %75 : vector<128xf32> to vector<1x128xf32>
    %77 = vector.extract_strided_slice %73 {offsets = [8, 0], sizes = [8, 128], strides = [1, 1]} : vector<16x128xf32> to vector<8x128xf32>
    %cst_24 = arith.constant dense<0.000000e+00> : vector<128xf32>
    %78 = vector.multi_reduction <add>, %77, %cst_24 [0] : vector<8x128xf32> to vector<128xf32>
    %79 = vector.shape_cast %78 : vector<128xf32> to vector<1x128xf32>
    %c96_i32 = arith.constant 96 : i32
    %80 = tpu.dynamic_rotate %31 by %c96_i32 dim 1 : vector<16x128xf32>, i32 -> vector<16x128xf32>
    %81 = arith.mulf %30, %80 : vector<16x128xf32>
    %82 = vector.extract_strided_slice %81 {offsets = [0, 0], sizes = [8, 128], strides = [1, 1]} : vector<16x128xf32> to vector<8x128xf32>
    %cst_25 = arith.constant dense<0.000000e+00> : vector<128xf32>
    %83 = vector.multi_reduction <add>, %82, %cst_25 [0] : vector<8x128xf32> to vector<128xf32>
    %84 = vector.shape_cast %83 : vector<128xf32> to vector<1x128xf32>
    %85 = vector.extract_strided_slice %81 {offsets = [8, 0], sizes = [8, 128], strides = [1, 1]} : vector<16x128xf32> to vector<8x128xf32>
    %cst_26 = arith.constant dense<0.000000e+00> : vector<128xf32>
    %86 = vector.multi_reduction <add>, %85, %cst_26 [0] : vector<8x128xf32> to vector<128xf32>
    %87 = vector.shape_cast %86 : vector<128xf32> to vector<1x128xf32>
    %c112_i32 = arith.constant 112 : i32
    %88 = tpu.dynamic_rotate %31 by %c112_i32 dim 1 : vector<16x128xf32>, i32 -> vector<16x128xf32>
    %89 = arith.mulf %30, %88 : vector<16x128xf32>
    %90 = vector.extract_strided_slice %89 {offsets = [0, 0], sizes = [8, 128], strides = [1, 1]} : vector<16x128xf32> to vector<8x128xf32>
    %cst_27 = arith.constant dense<0.000000e+00> : vector<128xf32>
    %91 = vector.multi_reduction <add>, %90, %cst_27 [0] : vector<8x128xf32> to vector<128xf32>
    %92 = vector.shape_cast %91 : vector<128xf32> to vector<1x128xf32>
    %93 = vector.extract_strided_slice %89 {offsets = [8, 0], sizes = [8, 128], strides = [1, 1]} : vector<16x128xf32> to vector<8x128xf32>
    %cst_28 = arith.constant dense<0.000000e+00> : vector<128xf32>
    %94 = vector.multi_reduction <add>, %93, %cst_28 [0] : vector<8x128xf32> to vector<128xf32>
    %95 = vector.shape_cast %94 : vector<128xf32> to vector<1x128xf32>
    %96 = arith.maximumf %36, %44 : vector<1x128xf32>
    %97 = arith.maximumf %96, %52 : vector<1x128xf32>
    %98 = arith.maximumf %97, %60 : vector<1x128xf32>
    %99 = arith.maximumf %98, %68 : vector<1x128xf32>
    %100 = arith.maximumf %99, %76 : vector<1x128xf32>
    %101 = arith.maximumf %100, %84 : vector<1x128xf32>
    %102 = arith.maximumf %101, %92 : vector<1x128xf32>
    %103 = arith.maximumf %39, %47 : vector<1x128xf32>
    %104 = arith.maximumf %103, %55 : vector<1x128xf32>
    %105 = arith.maximumf %104, %63 : vector<1x128xf32>
    %106 = arith.maximumf %105, %71 : vector<1x128xf32>
    %107 = arith.maximumf %106, %79 : vector<1x128xf32>
    %108 = arith.maximumf %107, %87 : vector<1x128xf32>
    %109 = arith.maximumf %108, %95 : vector<1x128xf32>
    %110 = arith.subf %36, %102 : vector<1x128xf32>
    %111 = math.exp %110 : vector<1x128xf32>
    %112 = arith.subf %44, %102 : vector<1x128xf32>
    %113 = math.exp %112 : vector<1x128xf32>
    %114 = arith.subf %52, %102 : vector<1x128xf32>
    %115 = math.exp %114 : vector<1x128xf32>
    %116 = arith.subf %60, %102 : vector<1x128xf32>
    %117 = math.exp %116 : vector<1x128xf32>
    %118 = arith.subf %68, %102 : vector<1x128xf32>
    %119 = math.exp %118 : vector<1x128xf32>
    %120 = arith.subf %76, %102 : vector<1x128xf32>
    %121 = math.exp %120 : vector<1x128xf32>
    %122 = arith.subf %84, %102 : vector<1x128xf32>
    %123 = math.exp %122 : vector<1x128xf32>
    %124 = arith.subf %92, %102 : vector<1x128xf32>
    %125 = math.exp %124 : vector<1x128xf32>
    %126 = arith.subf %39, %109 : vector<1x128xf32>
    %127 = math.exp %126 : vector<1x128xf32>
    %128 = arith.subf %47, %109 : vector<1x128xf32>
    %129 = math.exp %128 : vector<1x128xf32>
    %130 = arith.subf %55, %109 : vector<1x128xf32>
    %131 = math.exp %130 : vector<1x128xf32>
    %132 = arith.subf %63, %109 : vector<1x128xf32>
    %133 = math.exp %132 : vector<1x128xf32>
    %134 = arith.subf %71, %109 : vector<1x128xf32>
    %135 = math.exp %134 : vector<1x128xf32>
    %136 = arith.subf %79, %109 : vector<1x128xf32>
    %137 = math.exp %136 : vector<1x128xf32>
    %138 = arith.subf %87, %109 : vector<1x128xf32>
    %139 = math.exp %138 : vector<1x128xf32>
    %140 = arith.subf %95, %109 : vector<1x128xf32>
    %141 = math.exp %140 : vector<1x128xf32>
    %142 = arith.addf %111, %113 : vector<1x128xf32>
    %143 = arith.addf %142, %115 : vector<1x128xf32>
    %144 = arith.addf %143, %117 : vector<1x128xf32>
    %145 = arith.addf %144, %119 : vector<1x128xf32>
    %146 = arith.addf %145, %121 : vector<1x128xf32>
    %147 = arith.addf %146, %123 : vector<1x128xf32>
    %148 = arith.addf %147, %125 : vector<1x128xf32>
    %149 = arith.addf %127, %129 : vector<1x128xf32>
    %150 = arith.addf %149, %131 : vector<1x128xf32>
    %151 = arith.addf %150, %133 : vector<1x128xf32>
    %152 = arith.addf %151, %135 : vector<1x128xf32>
    %153 = arith.addf %152, %137 : vector<1x128xf32>
    %154 = arith.addf %153, %139 : vector<1x128xf32>
    %155 = arith.addf %154, %141 : vector<1x128xf32>
    %cst_29 = arith.constant 0.000000e+00 : f32
    %156 = vector.broadcast %cst_29 : f32 to vector<8x128xf32>
    %cst_30 = arith.constant 0.000000e+00 : f32
    %157 = vector.broadcast %cst_30 : f32 to vector<8x128xf32>
    %158 = vector.extract_strided_slice %32 {offsets = [0, 0], sizes = [8, 128], strides = [1, 1]} : vector<16x128xf32> to vector<8x128xf32>
    %159 = vector.broadcast %111 : vector<1x128xf32> to vector<8x128xf32>
    %160 = arith.mulf %159, %158 : vector<8x128xf32>
    %161 = arith.addf %156, %160 : vector<8x128xf32>
    %162 = vector.extract_strided_slice %32 {offsets = [8, 0], sizes = [8, 128], strides = [1, 1]} : vector<16x128xf32> to vector<8x128xf32>
    %163 = vector.broadcast %127 : vector<1x128xf32> to vector<8x128xf32>
    %164 = arith.mulf %163, %162 : vector<8x128xf32>
    %165 = arith.addf %157, %164 : vector<8x128xf32>
    %c16_i32_31 = arith.constant 16 : i32
    %166 = tpu.dynamic_rotate %32 by %c16_i32_31 dim 1 : vector<16x128xf32>, i32 -> vector<16x128xf32>
    %167 = vector.extract_strided_slice %166 {offsets = [0, 0], sizes = [8, 128], strides = [1, 1]} : vector<16x128xf32> to vector<8x128xf32>
    %168 = vector.broadcast %113 : vector<1x128xf32> to vector<8x128xf32>
    %169 = arith.mulf %168, %167 : vector<8x128xf32>
    %170 = arith.addf %161, %169 : vector<8x128xf32>
    %171 = vector.extract_strided_slice %166 {offsets = [8, 0], sizes = [8, 128], strides = [1, 1]} : vector<16x128xf32> to vector<8x128xf32>
    %172 = vector.broadcast %129 : vector<1x128xf32> to vector<8x128xf32>
    %173 = arith.mulf %172, %171 : vector<8x128xf32>
    %174 = arith.addf %165, %173 : vector<8x128xf32>
    %c32_i32_32 = arith.constant 32 : i32
    %175 = tpu.dynamic_rotate %32 by %c32_i32_32 dim 1 : vector<16x128xf32>, i32 -> vector<16x128xf32>
    %176 = vector.extract_strided_slice %175 {offsets = [0, 0], sizes = [8, 128], strides = [1, 1]} : vector<16x128xf32> to vector<8x128xf32>
    %177 = vector.broadcast %115 : vector<1x128xf32> to vector<8x128xf32>
    %178 = arith.mulf %177, %176 : vector<8x128xf32>
    %179 = arith.addf %170, %178 : vector<8x128xf32>
    %180 = vector.extract_strided_slice %175 {offsets = [8, 0], sizes = [8, 128], strides = [1, 1]} : vector<16x128xf32> to vector<8x128xf32>
    %181 = vector.broadcast %131 : vector<1x128xf32> to vector<8x128xf32>
    %182 = arith.mulf %181, %180 : vector<8x128xf32>
    %183 = arith.addf %174, %182 : vector<8x128xf32>
    %c48_i32_33 = arith.constant 48 : i32
    %184 = tpu.dynamic_rotate %32 by %c48_i32_33 dim 1 : vector<16x128xf32>, i32 -> vector<16x128xf32>
    %185 = vector.extract_strided_slice %184 {offsets = [0, 0], sizes = [8, 128], strides = [1, 1]} : vector<16x128xf32> to vector<8x128xf32>
    %186 = vector.broadcast %117 : vector<1x128xf32> to vector<8x128xf32>
    %187 = arith.mulf %186, %185 : vector<8x128xf32>
    %188 = arith.addf %179, %187 : vector<8x128xf32>
    %189 = vector.extract_strided_slice %184 {offsets = [8, 0], sizes = [8, 128], strides = [1, 1]} : vector<16x128xf32> to vector<8x128xf32>
    %190 = vector.broadcast %133 : vector<1x128xf32> to vector<8x128xf32>
    %191 = arith.mulf %190, %189 : vector<8x128xf32>
    %192 = arith.addf %183, %191 : vector<8x128xf32>
    %c64_i32_34 = arith.constant 64 : i32
    %193 = tpu.dynamic_rotate %32 by %c64_i32_34 dim 1 : vector<16x128xf32>, i32 -> vector<16x128xf32>
    %194 = vector.extract_strided_slice %193 {offsets = [0, 0], sizes = [8, 128], strides = [1, 1]} : vector<16x128xf32> to vector<8x128xf32>
    %195 = vector.broadcast %119 : vector<1x128xf32> to vector<8x128xf32>
    %196 = arith.mulf %195, %194 : vector<8x128xf32>
    %197 = arith.addf %188, %196 : vector<8x128xf32>
    %198 = vector.extract_strided_slice %193 {offsets = [8, 0], sizes = [8, 128], strides = [1, 1]} : vector<16x128xf32> to vector<8x128xf32>
    %199 = vector.broadcast %135 : vector<1x128xf32> to vector<8x128xf32>
    %200 = arith.mulf %199, %198 : vector<8x128xf32>
    %201 = arith.addf %192, %200 : vector<8x128xf32>
    %c80_i32_35 = arith.constant 80 : i32
    %202 = tpu.dynamic_rotate %32 by %c80_i32_35 dim 1 : vector<16x128xf32>, i32 -> vector<16x128xf32>
    %203 = vector.extract_strided_slice %202 {offsets = [0, 0], sizes = [8, 128], strides = [1, 1]} : vector<16x128xf32> to vector<8x128xf32>
    %204 = vector.broadcast %121 : vector<1x128xf32> to vector<8x128xf32>
    %205 = arith.mulf %204, %203 : vector<8x128xf32>
    %206 = arith.addf %197, %205 : vector<8x128xf32>
    %207 = vector.extract_strided_slice %202 {offsets = [8, 0], sizes = [8, 128], strides = [1, 1]} : vector<16x128xf32> to vector<8x128xf32>
    %208 = vector.broadcast %137 : vector<1x128xf32> to vector<8x128xf32>
    %209 = arith.mulf %208, %207 : vector<8x128xf32>
    %210 = arith.addf %201, %209 : vector<8x128xf32>
    %c96_i32_36 = arith.constant 96 : i32
    %211 = tpu.dynamic_rotate %32 by %c96_i32_36 dim 1 : vector<16x128xf32>, i32 -> vector<16x128xf32>
    %212 = vector.extract_strided_slice %211 {offsets = [0, 0], sizes = [8, 128], strides = [1, 1]} : vector<16x128xf32> to vector<8x128xf32>
    %213 = vector.broadcast %123 : vector<1x128xf32> to vector<8x128xf32>
    %214 = arith.mulf %213, %212 : vector<8x128xf32>
    %215 = arith.addf %206, %214 : vector<8x128xf32>
    %216 = vector.extract_strided_slice %211 {offsets = [8, 0], sizes = [8, 128], strides = [1, 1]} : vector<16x128xf32> to vector<8x128xf32>
    %217 = vector.broadcast %139 : vector<1x128xf32> to vector<8x128xf32>
    %218 = arith.mulf %217, %216 : vector<8x128xf32>
    %219 = arith.addf %210, %218 : vector<8x128xf32>
    %c112_i32_37 = arith.constant 112 : i32
    %220 = tpu.dynamic_rotate %32 by %c112_i32_37 dim 1 : vector<16x128xf32>, i32 -> vector<16x128xf32>
    %221 = vector.extract_strided_slice %220 {offsets = [0, 0], sizes = [8, 128], strides = [1, 1]} : vector<16x128xf32> to vector<8x128xf32>
    %222 = vector.broadcast %125 : vector<1x128xf32> to vector<8x128xf32>
    %223 = arith.mulf %222, %221 : vector<8x128xf32>
    %224 = arith.addf %215, %223 : vector<8x128xf32>
    %225 = vector.extract_strided_slice %220 {offsets = [8, 0], sizes = [8, 128], strides = [1, 1]} : vector<16x128xf32> to vector<8x128xf32>
    %226 = vector.broadcast %141 : vector<1x128xf32> to vector<8x128xf32>
    %227 = arith.mulf %226, %225 : vector<8x128xf32>
    %228 = arith.addf %219, %227 : vector<8x128xf32>
    %229 = vector.broadcast %148 : vector<1x128xf32> to vector<8x128xf32>
    %230 = arith.divf %224, %229 : vector<8x128xf32>
    %231 = vector.broadcast %155 : vector<1x128xf32> to vector<8x128xf32>
    %232 = arith.divf %228, %231 : vector<8x128xf32>
    %233 = tpu.concatenate %230, %232 in 0 : vector<8x128xf32>, vector<8x128xf32> -> vector<16x128xf32>
    %234 = vector.extract_strided_slice %13 {offsets = [48, 0], sizes = [16, 16], strides = [1, 1]} : vector<128x16xf32> to vector<16x16xf32>
    %cst_38 = arith.constant dense<0.000000e+00> : vector<16x128xf32>
    %235 = tpu.matmul %234, %233, %cst_38 {dimension_numbers = #tpu.dot_dimension_numbers<[1], [0], [0], [1], [0, 0, 1, 1], [], []>, precision = #tpu.contract_precision<fp32>} : vector<16x16xf32>, vector<16x128xf32>, vector<16x128xf32> -> vector<16x128xf32>
    %236 = vector.broadcast %19 : vector<16x1xf32> to vector<16x128xf32>
    %237 = arith.addf %235, %236 : vector<16x128xf32>
    %238 = arith.addf %11, %237 : vector<16x128xf32>
    %cst_39 = arith.constant dense<0.000000e+00> : vector<128xf32>
    %239 = vector.multi_reduction <add>, %238, %cst_39 [0] : vector<16x128xf32> to vector<128xf32>
    %240 = vector.shape_cast %239 : vector<128xf32> to vector<1x128xf32>
    %cst_40 = arith.constant 1.600000e+01 : f32
    %241 = vector.broadcast %cst_40 : f32 to vector<1x128xf32>
    %242 = arith.divf %240, %241 : vector<1x128xf32>
    %243 = vector.broadcast %242 : vector<1x128xf32> to vector<16x128xf32>
    %244 = arith.subf %238, %243 : vector<16x128xf32>
    %245 = arith.mulf %244, %244 : vector<16x128xf32>
    %cst_41 = arith.constant dense<0.000000e+00> : vector<128xf32>
    %246 = vector.multi_reduction <add>, %245, %cst_41 [0] : vector<16x128xf32> to vector<128xf32>
    %247 = vector.shape_cast %246 : vector<128xf32> to vector<1x128xf32>
    %cst_42 = arith.constant 1.600000e+01 : f32
    %248 = vector.broadcast %cst_42 : f32 to vector<1x128xf32>
    %249 = arith.divf %247, %248 : vector<1x128xf32>
    %cst_43 = arith.constant 9.99999974E-6 : f32
    %250 = vector.broadcast %cst_43 : f32 to vector<1x128xf32>
    %251 = arith.addf %249, %250 : vector<1x128xf32>
    %252 = math.rsqrt %251 : vector<1x128xf32>
    %253 = vector.broadcast %252 : vector<1x128xf32> to vector<16x128xf32>
    %254 = arith.mulf %244, %253 : vector<16x128xf32>
    %255 = vector.broadcast %22 : vector<16x1xf32> to vector<16x128xf32>
    %256 = arith.mulf %254, %255 : vector<16x128xf32>
    %257 = vector.broadcast %23 : vector<16x1xf32> to vector<16x128xf32>
    %258 = arith.addf %256, %257 : vector<16x128xf32>
    %259 = vector.extract_strided_slice %13 {offsets = [64, 0], sizes = [64, 16], strides = [1, 1]} : vector<128x16xf32> to vector<64x16xf32>
    %cst_44 = arith.constant dense<0.000000e+00> : vector<64x128xf32>
    %260 = tpu.matmul %259, %258, %cst_44 {dimension_numbers = #tpu.dot_dimension_numbers<[1], [0], [0], [1], [0, 0, 1, 1], [], []>, precision = #tpu.contract_precision<fp32>} : vector<64x16xf32>, vector<16x128xf32>, vector<64x128xf32> -> vector<64x128xf32>
    %261 = vector.broadcast %20 : vector<64x1xf32> to vector<64x128xf32>
    %262 = arith.addf %260, %261 : vector<64x128xf32>
    %cst_45 = arith.constant 0.000000e+00 : f32
    %263 = vector.broadcast %cst_45 : f32 to vector<64x128xf32>
    %264 = arith.maximumf %262, %263 : vector<64x128xf32>
    %cst_46 = arith.constant dense<0.000000e+00> : vector<16x128xf32>
    %265 = tpu.matmul %15, %264, %cst_46 {dimension_numbers = #tpu.dot_dimension_numbers<[1], [0], [0], [1], [0, 0, 1, 1], [], []>, precision = #tpu.contract_precision<fp32>} : vector<16x64xf32>, vector<64x128xf32>, vector<16x128xf32> -> vector<16x128xf32>
    %266 = vector.broadcast %21 : vector<16x1xf32> to vector<16x128xf32>
    %267 = arith.addf %265, %266 : vector<16x128xf32>
    %268 = arith.addf %258, %267 : vector<16x128xf32>
    %cst_47 = arith.constant dense<0.000000e+00> : vector<128xf32>
    %269 = vector.multi_reduction <add>, %268, %cst_47 [0] : vector<16x128xf32> to vector<128xf32>
    %270 = vector.shape_cast %269 : vector<128xf32> to vector<1x128xf32>
    %cst_48 = arith.constant 1.600000e+01 : f32
    %271 = vector.broadcast %cst_48 : f32 to vector<1x128xf32>
    %272 = arith.divf %270, %271 : vector<1x128xf32>
    %273 = vector.broadcast %272 : vector<1x128xf32> to vector<16x128xf32>
    %274 = arith.subf %268, %273 : vector<16x128xf32>
    %275 = arith.mulf %274, %274 : vector<16x128xf32>
    %cst_49 = arith.constant dense<0.000000e+00> : vector<128xf32>
    %276 = vector.multi_reduction <add>, %275, %cst_49 [0] : vector<16x128xf32> to vector<128xf32>
    %277 = vector.shape_cast %276 : vector<128xf32> to vector<1x128xf32>
    %cst_50 = arith.constant 1.600000e+01 : f32
    %278 = vector.broadcast %cst_50 : f32 to vector<1x128xf32>
    %279 = arith.divf %277, %278 : vector<1x128xf32>
    %cst_51 = arith.constant 9.99999974E-6 : f32
    %280 = vector.broadcast %cst_51 : f32 to vector<1x128xf32>
    %281 = arith.addf %279, %280 : vector<1x128xf32>
    %282 = math.rsqrt %281 : vector<1x128xf32>
    %283 = vector.broadcast %282 : vector<1x128xf32> to vector<16x128xf32>
    %284 = arith.mulf %274, %283 : vector<16x128xf32>
    %285 = vector.broadcast %24 : vector<16x1xf32> to vector<16x128xf32>
    %286 = arith.mulf %284, %285 : vector<16x128xf32>
    %287 = vector.broadcast %25 : vector<16x1xf32> to vector<16x128xf32>
    %288 = arith.addf %286, %287 : vector<16x128xf32>
    %c1 = arith.constant 1 : index
    %c0_52 = arith.constant 0 : index
    %c0_53 = arith.constant 0 : index
    %289 = vector.load %arg2[%c1, %c0_52, %c0_53] : memref<2x128x16xf32, #tpu.memory_space<vmem>>, vector<1x128x16xf32>
    %290 = vector.shape_cast %289 : vector<1x128x16xf32> to vector<128x16xf32>
    %c1_54 = arith.constant 1 : index
    %c0_55 = arith.constant 0 : index
    %c0_56 = arith.constant 0 : index
    %291 = vector.load %arg3[%c1_54, %c0_55, %c0_56] : memref<2x16x64xf32, #tpu.memory_space<vmem>>, vector<1x16x64xf32>
    %292 = vector.shape_cast %291 : vector<1x16x64xf32> to vector<16x64xf32>
    %c1_57 = arith.constant 1 : index
    %c0_58 = arith.constant 0 : index
    %c0_59 = arith.constant 0 : index
    %293 = vector.load %arg4[%c1_57, %c0_58, %c0_59] : memref<2x128x8xf32, #tpu.memory_space<vmem>>, vector<1x128x8xf32>
    %294 = vector.shape_cast %293 : vector<1x128x8xf32> to vector<128x8xf32>
    %295 = vector.extract_strided_slice %294 {offsets = [0, 0], sizes = [48, 1], strides = [1, 1]} : vector<128x8xf32> to vector<48x1xf32>
    %296 = vector.extract_strided_slice %294 {offsets = [48, 0], sizes = [16, 1], strides = [1, 1]} : vector<128x8xf32> to vector<16x1xf32>
    %297 = vector.extract_strided_slice %294 {offsets = [64, 0], sizes = [64, 1], strides = [1, 1]} : vector<128x8xf32> to vector<64x1xf32>
    %298 = vector.extract_strided_slice %294 {offsets = [0, 1], sizes = [16, 1], strides = [1, 1]} : vector<128x8xf32> to vector<16x1xf32>
    %299 = vector.extract_strided_slice %294 {offsets = [0, 2], sizes = [16, 1], strides = [1, 1]} : vector<128x8xf32> to vector<16x1xf32>
    %300 = vector.extract_strided_slice %294 {offsets = [0, 3], sizes = [16, 1], strides = [1, 1]} : vector<128x8xf32> to vector<16x1xf32>
    %301 = vector.extract_strided_slice %294 {offsets = [0, 4], sizes = [16, 1], strides = [1, 1]} : vector<128x8xf32> to vector<16x1xf32>
    %302 = vector.extract_strided_slice %294 {offsets = [0, 5], sizes = [16, 1], strides = [1, 1]} : vector<128x8xf32> to vector<16x1xf32>
    %303 = vector.extract_strided_slice %290 {offsets = [0, 0], sizes = [48, 16], strides = [1, 1]} : vector<128x16xf32> to vector<48x16xf32>
    %cst_60 = arith.constant dense<0.000000e+00> : vector<48x128xf32>
    %304 = tpu.matmul %303, %288, %cst_60 {dimension_numbers = #tpu.dot_dimension_numbers<[1], [0], [0], [1], [0, 0, 1, 1], [], []>, precision = #tpu.contract_precision<fp32>} : vector<48x16xf32>, vector<16x128xf32>, vector<48x128xf32> -> vector<48x128xf32>
    %305 = vector.broadcast %295 : vector<48x1xf32> to vector<48x128xf32>
    %306 = arith.addf %304, %305 : vector<48x128xf32>
    %307 = vector.extract_strided_slice %306 {offsets = [0, 0], sizes = [16, 128], strides = [1, 1]} : vector<48x128xf32> to vector<16x128xf32>
    %308 = vector.extract_strided_slice %306 {offsets = [16, 0], sizes = [16, 128], strides = [1, 1]} : vector<48x128xf32> to vector<16x128xf32>
    %309 = vector.extract_strided_slice %306 {offsets = [32, 0], sizes = [16, 128], strides = [1, 1]} : vector<48x128xf32> to vector<16x128xf32>
    %310 = arith.mulf %307, %308 : vector<16x128xf32>
    %311 = vector.extract_strided_slice %310 {offsets = [0, 0], sizes = [8, 128], strides = [1, 1]} : vector<16x128xf32> to vector<8x128xf32>
    %cst_61 = arith.constant dense<0.000000e+00> : vector<128xf32>
    %312 = vector.multi_reduction <add>, %311, %cst_61 [0] : vector<8x128xf32> to vector<128xf32>
    %313 = vector.shape_cast %312 : vector<128xf32> to vector<1x128xf32>
    %314 = vector.extract_strided_slice %310 {offsets = [8, 0], sizes = [8, 128], strides = [1, 1]} : vector<16x128xf32> to vector<8x128xf32>
    %cst_62 = arith.constant dense<0.000000e+00> : vector<128xf32>
    %315 = vector.multi_reduction <add>, %314, %cst_62 [0] : vector<8x128xf32> to vector<128xf32>
    %316 = vector.shape_cast %315 : vector<128xf32> to vector<1x128xf32>
    %c16_i32_63 = arith.constant 16 : i32
    %317 = tpu.dynamic_rotate %308 by %c16_i32_63 dim 1 : vector<16x128xf32>, i32 -> vector<16x128xf32>
    %318 = arith.mulf %307, %317 : vector<16x128xf32>
    %319 = vector.extract_strided_slice %318 {offsets = [0, 0], sizes = [8, 128], strides = [1, 1]} : vector<16x128xf32> to vector<8x128xf32>
    %cst_64 = arith.constant dense<0.000000e+00> : vector<128xf32>
    %320 = vector.multi_reduction <add>, %319, %cst_64 [0] : vector<8x128xf32> to vector<128xf32>
    %321 = vector.shape_cast %320 : vector<128xf32> to vector<1x128xf32>
    %322 = vector.extract_strided_slice %318 {offsets = [8, 0], sizes = [8, 128], strides = [1, 1]} : vector<16x128xf32> to vector<8x128xf32>
    %cst_65 = arith.constant dense<0.000000e+00> : vector<128xf32>
    %323 = vector.multi_reduction <add>, %322, %cst_65 [0] : vector<8x128xf32> to vector<128xf32>
    %324 = vector.shape_cast %323 : vector<128xf32> to vector<1x128xf32>
    %c32_i32_66 = arith.constant 32 : i32
    %325 = tpu.dynamic_rotate %308 by %c32_i32_66 dim 1 : vector<16x128xf32>, i32 -> vector<16x128xf32>
    %326 = arith.mulf %307, %325 : vector<16x128xf32>
    %327 = vector.extract_strided_slice %326 {offsets = [0, 0], sizes = [8, 128], strides = [1, 1]} : vector<16x128xf32> to vector<8x128xf32>
    %cst_67 = arith.constant dense<0.000000e+00> : vector<128xf32>
    %328 = vector.multi_reduction <add>, %327, %cst_67 [0] : vector<8x128xf32> to vector<128xf32>
    %329 = vector.shape_cast %328 : vector<128xf32> to vector<1x128xf32>
    %330 = vector.extract_strided_slice %326 {offsets = [8, 0], sizes = [8, 128], strides = [1, 1]} : vector<16x128xf32> to vector<8x128xf32>
    %cst_68 = arith.constant dense<0.000000e+00> : vector<128xf32>
    %331 = vector.multi_reduction <add>, %330, %cst_68 [0] : vector<8x128xf32> to vector<128xf32>
    %332 = vector.shape_cast %331 : vector<128xf32> to vector<1x128xf32>
    %c48_i32_69 = arith.constant 48 : i32
    %333 = tpu.dynamic_rotate %308 by %c48_i32_69 dim 1 : vector<16x128xf32>, i32 -> vector<16x128xf32>
    %334 = arith.mulf %307, %333 : vector<16x128xf32>
    %335 = vector.extract_strided_slice %334 {offsets = [0, 0], sizes = [8, 128], strides = [1, 1]} : vector<16x128xf32> to vector<8x128xf32>
    %cst_70 = arith.constant dense<0.000000e+00> : vector<128xf32>
    %336 = vector.multi_reduction <add>, %335, %cst_70 [0] : vector<8x128xf32> to vector<128xf32>
    %337 = vector.shape_cast %336 : vector<128xf32> to vector<1x128xf32>
    %338 = vector.extract_strided_slice %334 {offsets = [8, 0], sizes = [8, 128], strides = [1, 1]} : vector<16x128xf32> to vector<8x128xf32>
    %cst_71 = arith.constant dense<0.000000e+00> : vector<128xf32>
    %339 = vector.multi_reduction <add>, %338, %cst_71 [0] : vector<8x128xf32> to vector<128xf32>
    %340 = vector.shape_cast %339 : vector<128xf32> to vector<1x128xf32>
    %c64_i32_72 = arith.constant 64 : i32
    %341 = tpu.dynamic_rotate %308 by %c64_i32_72 dim 1 : vector<16x128xf32>, i32 -> vector<16x128xf32>
    %342 = arith.mulf %307, %341 : vector<16x128xf32>
    %343 = vector.extract_strided_slice %342 {offsets = [0, 0], sizes = [8, 128], strides = [1, 1]} : vector<16x128xf32> to vector<8x128xf32>
    %cst_73 = arith.constant dense<0.000000e+00> : vector<128xf32>
    %344 = vector.multi_reduction <add>, %343, %cst_73 [0] : vector<8x128xf32> to vector<128xf32>
    %345 = vector.shape_cast %344 : vector<128xf32> to vector<1x128xf32>
    %346 = vector.extract_strided_slice %342 {offsets = [8, 0], sizes = [8, 128], strides = [1, 1]} : vector<16x128xf32> to vector<8x128xf32>
    %cst_74 = arith.constant dense<0.000000e+00> : vector<128xf32>
    %347 = vector.multi_reduction <add>, %346, %cst_74 [0] : vector<8x128xf32> to vector<128xf32>
    %348 = vector.shape_cast %347 : vector<128xf32> to vector<1x128xf32>
    %c80_i32_75 = arith.constant 80 : i32
    %349 = tpu.dynamic_rotate %308 by %c80_i32_75 dim 1 : vector<16x128xf32>, i32 -> vector<16x128xf32>
    %350 = arith.mulf %307, %349 : vector<16x128xf32>
    %351 = vector.extract_strided_slice %350 {offsets = [0, 0], sizes = [8, 128], strides = [1, 1]} : vector<16x128xf32> to vector<8x128xf32>
    %cst_76 = arith.constant dense<0.000000e+00> : vector<128xf32>
    %352 = vector.multi_reduction <add>, %351, %cst_76 [0] : vector<8x128xf32> to vector<128xf32>
    %353 = vector.shape_cast %352 : vector<128xf32> to vector<1x128xf32>
    %354 = vector.extract_strided_slice %350 {offsets = [8, 0], sizes = [8, 128], strides = [1, 1]} : vector<16x128xf32> to vector<8x128xf32>
    %cst_77 = arith.constant dense<0.000000e+00> : vector<128xf32>
    %355 = vector.multi_reduction <add>, %354, %cst_77 [0] : vector<8x128xf32> to vector<128xf32>
    %356 = vector.shape_cast %355 : vector<128xf32> to vector<1x128xf32>
    %c96_i32_78 = arith.constant 96 : i32
    %357 = tpu.dynamic_rotate %308 by %c96_i32_78 dim 1 : vector<16x128xf32>, i32 -> vector<16x128xf32>
    %358 = arith.mulf %307, %357 : vector<16x128xf32>
    %359 = vector.extract_strided_slice %358 {offsets = [0, 0], sizes = [8, 128], strides = [1, 1]} : vector<16x128xf32> to vector<8x128xf32>
    %cst_79 = arith.constant dense<0.000000e+00> : vector<128xf32>
    %360 = vector.multi_reduction <add>, %359, %cst_79 [0] : vector<8x128xf32> to vector<128xf32>
    %361 = vector.shape_cast %360 : vector<128xf32> to vector<1x128xf32>
    %362 = vector.extract_strided_slice %358 {offsets = [8, 0], sizes = [8, 128], strides = [1, 1]} : vector<16x128xf32> to vector<8x128xf32>
    %cst_80 = arith.constant dense<0.000000e+00> : vector<128xf32>
    %363 = vector.multi_reduction <add>, %362, %cst_80 [0] : vector<8x128xf32> to vector<128xf32>
    %364 = vector.shape_cast %363 : vector<128xf32> to vector<1x128xf32>
    %c112_i32_81 = arith.constant 112 : i32
    %365 = tpu.dynamic_rotate %308 by %c112_i32_81 dim 1 : vector<16x128xf32>, i32 -> vector<16x128xf32>
    %366 = arith.mulf %307, %365 : vector<16x128xf32>
    %367 = vector.extract_strided_slice %366 {offsets = [0, 0], sizes = [8, 128], strides = [1, 1]} : vector<16x128xf32> to vector<8x128xf32>
    %cst_82 = arith.constant dense<0.000000e+00> : vector<128xf32>
    %368 = vector.multi_reduction <add>, %367, %cst_82 [0] : vector<8x128xf32> to vector<128xf32>
    %369 = vector.shape_cast %368 : vector<128xf32> to vector<1x128xf32>
    %370 = vector.extract_strided_slice %366 {offsets = [8, 0], sizes = [8, 128], strides = [1, 1]} : vector<16x128xf32> to vector<8x128xf32>
    %cst_83 = arith.constant dense<0.000000e+00> : vector<128xf32>
    %371 = vector.multi_reduction <add>, %370, %cst_83 [0] : vector<8x128xf32> to vector<128xf32>
    %372 = vector.shape_cast %371 : vector<128xf32> to vector<1x128xf32>
    %373 = arith.maximumf %313, %321 : vector<1x128xf32>
    %374 = arith.maximumf %373, %329 : vector<1x128xf32>
    %375 = arith.maximumf %374, %337 : vector<1x128xf32>
    %376 = arith.maximumf %375, %345 : vector<1x128xf32>
    %377 = arith.maximumf %376, %353 : vector<1x128xf32>
    %378 = arith.maximumf %377, %361 : vector<1x128xf32>
    %379 = arith.maximumf %378, %369 : vector<1x128xf32>
    %380 = arith.maximumf %316, %324 : vector<1x128xf32>
    %381 = arith.maximumf %380, %332 : vector<1x128xf32>
    %382 = arith.maximumf %381, %340 : vector<1x128xf32>
    %383 = arith.maximumf %382, %348 : vector<1x128xf32>
    %384 = arith.maximumf %383, %356 : vector<1x128xf32>
    %385 = arith.maximumf %384, %364 : vector<1x128xf32>
    %386 = arith.maximumf %385, %372 : vector<1x128xf32>
    %387 = arith.subf %313, %379 : vector<1x128xf32>
    %388 = math.exp %387 : vector<1x128xf32>
    %389 = arith.subf %321, %379 : vector<1x128xf32>
    %390 = math.exp %389 : vector<1x128xf32>
    %391 = arith.subf %329, %379 : vector<1x128xf32>
    %392 = math.exp %391 : vector<1x128xf32>
    %393 = arith.subf %337, %379 : vector<1x128xf32>
    %394 = math.exp %393 : vector<1x128xf32>
    %395 = arith.subf %345, %379 : vector<1x128xf32>
    %396 = math.exp %395 : vector<1x128xf32>
    %397 = arith.subf %353, %379 : vector<1x128xf32>
    %398 = math.exp %397 : vector<1x128xf32>
    %399 = arith.subf %361, %379 : vector<1x128xf32>
    %400 = math.exp %399 : vector<1x128xf32>
    %401 = arith.subf %369, %379 : vector<1x128xf32>
    %402 = math.exp %401 : vector<1x128xf32>
    %403 = arith.subf %316, %386 : vector<1x128xf32>
    %404 = math.exp %403 : vector<1x128xf32>
    %405 = arith.subf %324, %386 : vector<1x128xf32>
    %406 = math.exp %405 : vector<1x128xf32>
    %407 = arith.subf %332, %386 : vector<1x128xf32>
    %408 = math.exp %407 : vector<1x128xf32>
    %409 = arith.subf %340, %386 : vector<1x128xf32>
    %410 = math.exp %409 : vector<1x128xf32>
    %411 = arith.subf %348, %386 : vector<1x128xf32>
    %412 = math.exp %411 : vector<1x128xf32>
    %413 = arith.subf %356, %386 : vector<1x128xf32>
    %414 = math.exp %413 : vector<1x128xf32>
    %415 = arith.subf %364, %386 : vector<1x128xf32>
    %416 = math.exp %415 : vector<1x128xf32>
    %417 = arith.subf %372, %386 : vector<1x128xf32>
    %418 = math.exp %417 : vector<1x128xf32>
    %419 = arith.addf %388, %390 : vector<1x128xf32>
    %420 = arith.addf %419, %392 : vector<1x128xf32>
    %421 = arith.addf %420, %394 : vector<1x128xf32>
    %422 = arith.addf %421, %396 : vector<1x128xf32>
    %423 = arith.addf %422, %398 : vector<1x128xf32>
    %424 = arith.addf %423, %400 : vector<1x128xf32>
    %425 = arith.addf %424, %402 : vector<1x128xf32>
    %426 = arith.addf %404, %406 : vector<1x128xf32>
    %427 = arith.addf %426, %408 : vector<1x128xf32>
    %428 = arith.addf %427, %410 : vector<1x128xf32>
    %429 = arith.addf %428, %412 : vector<1x128xf32>
    %430 = arith.addf %429, %414 : vector<1x128xf32>
    %431 = arith.addf %430, %416 : vector<1x128xf32>
    %432 = arith.addf %431, %418 : vector<1x128xf32>
    %cst_84 = arith.constant 0.000000e+00 : f32
    %433 = vector.broadcast %cst_84 : f32 to vector<8x128xf32>
    %cst_85 = arith.constant 0.000000e+00 : f32
    %434 = vector.broadcast %cst_85 : f32 to vector<8x128xf32>
    %435 = vector.extract_strided_slice %309 {offsets = [0, 0], sizes = [8, 128], strides = [1, 1]} : vector<16x128xf32> to vector<8x128xf32>
    %436 = vector.broadcast %388 : vector<1x128xf32> to vector<8x128xf32>
    %437 = arith.mulf %436, %435 : vector<8x128xf32>
    %438 = arith.addf %433, %437 : vector<8x128xf32>
    %439 = vector.extract_strided_slice %309 {offsets = [8, 0], sizes = [8, 128], strides = [1, 1]} : vector<16x128xf32> to vector<8x128xf32>
    %440 = vector.broadcast %404 : vector<1x128xf32> to vector<8x128xf32>
    %441 = arith.mulf %440, %439 : vector<8x128xf32>
    %442 = arith.addf %434, %441 : vector<8x128xf32>
    %c16_i32_86 = arith.constant 16 : i32
    %443 = tpu.dynamic_rotate %309 by %c16_i32_86 dim 1 : vector<16x128xf32>, i32 -> vector<16x128xf32>
    %444 = vector.extract_strided_slice %443 {offsets = [0, 0], sizes = [8, 128], strides = [1, 1]} : vector<16x128xf32> to vector<8x128xf32>
    %445 = vector.broadcast %390 : vector<1x128xf32> to vector<8x128xf32>
    %446 = arith.mulf %445, %444 : vector<8x128xf32>
    %447 = arith.addf %438, %446 : vector<8x128xf32>
    %448 = vector.extract_strided_slice %443 {offsets = [8, 0], sizes = [8, 128], strides = [1, 1]} : vector<16x128xf32> to vector<8x128xf32>
    %449 = vector.broadcast %406 : vector<1x128xf32> to vector<8x128xf32>
    %450 = arith.mulf %449, %448 : vector<8x128xf32>
    %451 = arith.addf %442, %450 : vector<8x128xf32>
    %c32_i32_87 = arith.constant 32 : i32
    %452 = tpu.dynamic_rotate %309 by %c32_i32_87 dim 1 : vector<16x128xf32>, i32 -> vector<16x128xf32>
    %453 = vector.extract_strided_slice %452 {offsets = [0, 0], sizes = [8, 128], strides = [1, 1]} : vector<16x128xf32> to vector<8x128xf32>
    %454 = vector.broadcast %392 : vector<1x128xf32> to vector<8x128xf32>
    %455 = arith.mulf %454, %453 : vector<8x128xf32>
    %456 = arith.addf %447, %455 : vector<8x128xf32>
    %457 = vector.extract_strided_slice %452 {offsets = [8, 0], sizes = [8, 128], strides = [1, 1]} : vector<16x128xf32> to vector<8x128xf32>
    %458 = vector.broadcast %408 : vector<1x128xf32> to vector<8x128xf32>
    %459 = arith.mulf %458, %457 : vector<8x128xf32>
    %460 = arith.addf %451, %459 : vector<8x128xf32>
    %c48_i32_88 = arith.constant 48 : i32
    %461 = tpu.dynamic_rotate %309 by %c48_i32_88 dim 1 : vector<16x128xf32>, i32 -> vector<16x128xf32>
    %462 = vector.extract_strided_slice %461 {offsets = [0, 0], sizes = [8, 128], strides = [1, 1]} : vector<16x128xf32> to vector<8x128xf32>
    %463 = vector.broadcast %394 : vector<1x128xf32> to vector<8x128xf32>
    %464 = arith.mulf %463, %462 : vector<8x128xf32>
    %465 = arith.addf %456, %464 : vector<8x128xf32>
    %466 = vector.extract_strided_slice %461 {offsets = [8, 0], sizes = [8, 128], strides = [1, 1]} : vector<16x128xf32> to vector<8x128xf32>
    %467 = vector.broadcast %410 : vector<1x128xf32> to vector<8x128xf32>
    %468 = arith.mulf %467, %466 : vector<8x128xf32>
    %469 = arith.addf %460, %468 : vector<8x128xf32>
    %c64_i32_89 = arith.constant 64 : i32
    %470 = tpu.dynamic_rotate %309 by %c64_i32_89 dim 1 : vector<16x128xf32>, i32 -> vector<16x128xf32>
    %471 = vector.extract_strided_slice %470 {offsets = [0, 0], sizes = [8, 128], strides = [1, 1]} : vector<16x128xf32> to vector<8x128xf32>
    %472 = vector.broadcast %396 : vector<1x128xf32> to vector<8x128xf32>
    %473 = arith.mulf %472, %471 : vector<8x128xf32>
    %474 = arith.addf %465, %473 : vector<8x128xf32>
    %475 = vector.extract_strided_slice %470 {offsets = [8, 0], sizes = [8, 128], strides = [1, 1]} : vector<16x128xf32> to vector<8x128xf32>
    %476 = vector.broadcast %412 : vector<1x128xf32> to vector<8x128xf32>
    %477 = arith.mulf %476, %475 : vector<8x128xf32>
    %478 = arith.addf %469, %477 : vector<8x128xf32>
    %c80_i32_90 = arith.constant 80 : i32
    %479 = tpu.dynamic_rotate %309 by %c80_i32_90 dim 1 : vector<16x128xf32>, i32 -> vector<16x128xf32>
    %480 = vector.extract_strided_slice %479 {offsets = [0, 0], sizes = [8, 128], strides = [1, 1]} : vector<16x128xf32> to vector<8x128xf32>
    %481 = vector.broadcast %398 : vector<1x128xf32> to vector<8x128xf32>
    %482 = arith.mulf %481, %480 : vector<8x128xf32>
    %483 = arith.addf %474, %482 : vector<8x128xf32>
    %484 = vector.extract_strided_slice %479 {offsets = [8, 0], sizes = [8, 128], strides = [1, 1]} : vector<16x128xf32> to vector<8x128xf32>
    %485 = vector.broadcast %414 : vector<1x128xf32> to vector<8x128xf32>
    %486 = arith.mulf %485, %484 : vector<8x128xf32>
    %487 = arith.addf %478, %486 : vector<8x128xf32>
    %c96_i32_91 = arith.constant 96 : i32
    %488 = tpu.dynamic_rotate %309 by %c96_i32_91 dim 1 : vector<16x128xf32>, i32 -> vector<16x128xf32>
    %489 = vector.extract_strided_slice %488 {offsets = [0, 0], sizes = [8, 128], strides = [1, 1]} : vector<16x128xf32> to vector<8x128xf32>
    %490 = vector.broadcast %400 : vector<1x128xf32> to vector<8x128xf32>
    %491 = arith.mulf %490, %489 : vector<8x128xf32>
    %492 = arith.addf %483, %491 : vector<8x128xf32>
    %493 = vector.extract_strided_slice %488 {offsets = [8, 0], sizes = [8, 128], strides = [1, 1]} : vector<16x128xf32> to vector<8x128xf32>
    %494 = vector.broadcast %416 : vector<1x128xf32> to vector<8x128xf32>
    %495 = arith.mulf %494, %493 : vector<8x128xf32>
    %496 = arith.addf %487, %495 : vector<8x128xf32>
    %c112_i32_92 = arith.constant 112 : i32
    %497 = tpu.dynamic_rotate %309 by %c112_i32_92 dim 1 : vector<16x128xf32>, i32 -> vector<16x128xf32>
    %498 = vector.extract_strided_slice %497 {offsets = [0, 0], sizes = [8, 128], strides = [1, 1]} : vector<16x128xf32> to vector<8x128xf32>
    %499 = vector.broadcast %402 : vector<1x128xf32> to vector<8x128xf32>
    %500 = arith.mulf %499, %498 : vector<8x128xf32>
    %501 = arith.addf %492, %500 : vector<8x128xf32>
    %502 = vector.extract_strided_slice %497 {offsets = [8, 0], sizes = [8, 128], strides = [1, 1]} : vector<16x128xf32> to vector<8x128xf32>
    %503 = vector.broadcast %418 : vector<1x128xf32> to vector<8x128xf32>
    %504 = arith.mulf %503, %502 : vector<8x128xf32>
    %505 = arith.addf %496, %504 : vector<8x128xf32>
    %506 = vector.broadcast %425 : vector<1x128xf32> to vector<8x128xf32>
    %507 = arith.divf %501, %506 : vector<8x128xf32>
    %508 = vector.broadcast %432 : vector<1x128xf32> to vector<8x128xf32>
    %509 = arith.divf %505, %508 : vector<8x128xf32>
    %510 = tpu.concatenate %507, %509 in 0 : vector<8x128xf32>, vector<8x128xf32> -> vector<16x128xf32>
    %511 = vector.extract_strided_slice %290 {offsets = [48, 0], sizes = [16, 16], strides = [1, 1]} : vector<128x16xf32> to vector<16x16xf32>
    %cst_93 = arith.constant dense<0.000000e+00> : vector<16x128xf32>
    %512 = tpu.matmul %511, %510, %cst_93 {dimension_numbers = #tpu.dot_dimension_numbers<[1], [0], [0], [1], [0, 0, 1, 1], [], []>, precision = #tpu.contract_precision<fp32>} : vector<16x16xf32>, vector<16x128xf32>, vector<16x128xf32> -> vector<16x128xf32>
    %513 = vector.broadcast %296 : vector<16x1xf32> to vector<16x128xf32>
    %514 = arith.addf %512, %513 : vector<16x128xf32>
    %515 = arith.addf %288, %514 : vector<16x128xf32>
    %cst_94 = arith.constant dense<0.000000e+00> : vector<128xf32>
    %516 = vector.multi_reduction <add>, %515, %cst_94 [0] : vector<16x128xf32> to vector<128xf32>
    %517 = vector.shape_cast %516 : vector<128xf32> to vector<1x128xf32>
    %cst_95 = arith.constant 1.600000e+01 : f32
    %518 = vector.broadcast %cst_95 : f32 to vector<1x128xf32>
    %519 = arith.divf %517, %518 : vector<1x128xf32>
    %520 = vector.broadcast %519 : vector<1x128xf32> to vector<16x128xf32>
    %521 = arith.subf %515, %520 : vector<16x128xf32>
    %522 = arith.mulf %521, %521 : vector<16x128xf32>
    %cst_96 = arith.constant dense<0.000000e+00> : vector<128xf32>
    %523 = vector.multi_reduction <add>, %522, %cst_96 [0] : vector<16x128xf32> to vector<128xf32>
    %524 = vector.shape_cast %523 : vector<128xf32> to vector<1x128xf32>
    %cst_97 = arith.constant 1.600000e+01 : f32
    %525 = vector.broadcast %cst_97 : f32 to vector<1x128xf32>
    %526 = arith.divf %524, %525 : vector<1x128xf32>
    %cst_98 = arith.constant 9.99999974E-6 : f32
    %527 = vector.broadcast %cst_98 : f32 to vector<1x128xf32>
    %528 = arith.addf %526, %527 : vector<1x128xf32>
    %529 = math.rsqrt %528 : vector<1x128xf32>
    %530 = vector.broadcast %529 : vector<1x128xf32> to vector<16x128xf32>
    %531 = arith.mulf %521, %530 : vector<16x128xf32>
    %532 = vector.broadcast %299 : vector<16x1xf32> to vector<16x128xf32>
    %533 = arith.mulf %531, %532 : vector<16x128xf32>
    %534 = vector.broadcast %300 : vector<16x1xf32> to vector<16x128xf32>
    %535 = arith.addf %533, %534 : vector<16x128xf32>
    %536 = vector.extract_strided_slice %290 {offsets = [64, 0], sizes = [64, 16], strides = [1, 1]} : vector<128x16xf32> to vector<64x16xf32>
    %cst_99 = arith.constant dense<0.000000e+00> : vector<64x128xf32>
    %537 = tpu.matmul %536, %535, %cst_99 {dimension_numbers = #tpu.dot_dimension_numbers<[1], [0], [0], [1], [0, 0, 1, 1], [], []>, precision = #tpu.contract_precision<fp32>} : vector<64x16xf32>, vector<16x128xf32>, vector<64x128xf32> -> vector<64x128xf32>
    %538 = vector.broadcast %297 : vector<64x1xf32> to vector<64x128xf32>
    %539 = arith.addf %537, %538 : vector<64x128xf32>
    %cst_100 = arith.constant 0.000000e+00 : f32
    %540 = vector.broadcast %cst_100 : f32 to vector<64x128xf32>
    %541 = arith.maximumf %539, %540 : vector<64x128xf32>
    %cst_101 = arith.constant dense<0.000000e+00> : vector<16x128xf32>
    %542 = tpu.matmul %292, %541, %cst_101 {dimension_numbers = #tpu.dot_dimension_numbers<[1], [0], [0], [1], [0, 0, 1, 1], [], []>, precision = #tpu.contract_precision<fp32>} : vector<16x64xf32>, vector<64x128xf32>, vector<16x128xf32> -> vector<16x128xf32>
    %543 = vector.broadcast %298 : vector<16x1xf32> to vector<16x128xf32>
    %544 = arith.addf %542, %543 : vector<16x128xf32>
    %545 = arith.addf %535, %544 : vector<16x128xf32>
    %cst_102 = arith.constant dense<0.000000e+00> : vector<128xf32>
    %546 = vector.multi_reduction <add>, %545, %cst_102 [0] : vector<16x128xf32> to vector<128xf32>
    %547 = vector.shape_cast %546 : vector<128xf32> to vector<1x128xf32>
    %cst_103 = arith.constant 1.600000e+01 : f32
    %548 = vector.broadcast %cst_103 : f32 to vector<1x128xf32>
    %549 = arith.divf %547, %548 : vector<1x128xf32>
    %550 = vector.broadcast %549 : vector<1x128xf32> to vector<16x128xf32>
    %551 = arith.subf %545, %550 : vector<16x128xf32>
    %552 = arith.mulf %551, %551 : vector<16x128xf32>
    %cst_104 = arith.constant dense<0.000000e+00> : vector<128xf32>
    %553 = vector.multi_reduction <add>, %552, %cst_104 [0] : vector<16x128xf32> to vector<128xf32>
    %554 = vector.shape_cast %553 : vector<128xf32> to vector<1x128xf32>
    %cst_105 = arith.constant 1.600000e+01 : f32
    %555 = vector.broadcast %cst_105 : f32 to vector<1x128xf32>
    %556 = arith.divf %554, %555 : vector<1x128xf32>
    %cst_106 = arith.constant 9.99999974E-6 : f32
    %557 = vector.broadcast %cst_106 : f32 to vector<1x128xf32>
    %558 = arith.addf %556, %557 : vector<1x128xf32>
    %559 = math.rsqrt %558 : vector<1x128xf32>
    %560 = vector.broadcast %559 : vector<1x128xf32> to vector<16x128xf32>
    %561 = arith.mulf %551, %560 : vector<16x128xf32>
    %562 = vector.broadcast %301 : vector<16x1xf32> to vector<16x128xf32>
    %563 = arith.mulf %561, %562 : vector<16x128xf32>
    %564 = vector.broadcast %302 : vector<16x1xf32> to vector<16x128xf32>
    %565 = arith.addf %563, %564 : vector<16x128xf32>
    %566 = vector.broadcast %3 : vector<16x1xf32> to vector<16x128xf32>
    %567 = arith.mulf %565, %566 : vector<16x128xf32>
    %cst_107 = arith.constant dense<0.000000e+00> : vector<128xf32>
    %568 = vector.multi_reduction <add>, %567, %cst_107 [0] : vector<16x128xf32> to vector<128xf32>
    %569 = vector.shape_cast %568 : vector<128xf32> to vector<1x128xf32>
    %570 = vector.broadcast %4 : vector<1x1xf32> to vector<1x128xf32>
    %571 = arith.addf %569, %570 : vector<1x128xf32>
    %572 = vector.shape_cast %571 : vector<1x128xf32> to vector<1x1x128xf32>
    %c0_108 = arith.constant 0 : index
    %c0_109 = arith.constant 0 : index
    %c0_110 = arith.constant 0 : index
    %573 = vector.load %arg6[%c0_108, %c0_109, %c0_110] : memref<1x1x128xf32, #tpu.memory_space<vmem>>, vector<1x1x128xf32>
    tpu.vector_store %arg6[%c0_108, %c0_109, %c0_110], %572 {strides = array<i32>} : memref<1x1x128xf32, #tpu.memory_space<vmem>>, vector<1x1x128xf32>,
    return
  }
  func.func @transform_0(%arg0: i32) -> (i32, i32, i32) {
    %c0_i32 = arith.constant 0 : i32
    %c0_i32_0 = arith.constant 0 : i32
    %c0_i32_1 = arith.constant 0 : i32
    return %arg0, %c0_i32, %c0_i32_0 : i32, i32, i32
  }
  func.func @transform_1(%arg0: i32) -> (i32, i32, i32) {
    %c0_i32 = arith.constant 0 : i32
    %c0_i32_0 = arith.constant 0 : i32
    %c0_i32_1 = arith.constant 0 : i32
    %c0_i32_2 = arith.constant 0 : i32
    return %c0_i32, %c0_i32_0, %c0_i32_1 : i32, i32, i32
  }
  func.func @transform_2(%arg0: i32) -> (i32, i32, i32) {
    %c0_i32 = arith.constant 0 : i32
    %c0_i32_0 = arith.constant 0 : i32
    %c0_i32_1 = arith.constant 0 : i32
    %c0_i32_2 = arith.constant 0 : i32
    return %c0_i32, %c0_i32_0, %c0_i32_1 : i32, i32, i32
  }
  func.func @transform_3(%arg0: i32) -> (i32, i32, i32) {
    %c0_i32 = arith.constant 0 : i32
    %c0_i32_0 = arith.constant 0 : i32
    %c0_i32_1 = arith.constant 0 : i32
    %c0_i32_2 = arith.constant 0 : i32
    return %c0_i32, %c0_i32_0, %c0_i32_1 : i32, i32, i32
  }
  func.func @transform_4(%arg0: i32) -> (i32, i32) {
    %c0_i32 = arith.constant 0 : i32
    %c0_i32_0 = arith.constant 0 : i32
    %c0_i32_1 = arith.constant 0 : i32
    return %c0_i32, %c0_i32_0 : i32, i32
  }
  func.func @transform_5(%arg0: i32) -> (i32, i32, i32) {
    %c0_i32 = arith.constant 0 : i32
    %c0_i32_0 = arith.constant 0 : i32
    %c0_i32_1 = arith.constant 0 : i32
    return %arg0, %c0_i32, %c0_i32_0 : i32, i32, i32
  }
}

</mosaic_0001>

<bundles_post_ra>
// kernel: tpu_custom_call.1
= control target key start
LH: loop header
LB: loop body
LE: loop exit
PB: predicated region body
PF: predicated region fallthrough
CT: control target
= control target key end

     0   :  { %v5048_v1 = vmov 1   ;;  %v5054_v2 = vmov 0   ;;  %s5042_s0 = inlined_call_operand.vmem [shape: f32[1,1,128], index: 0, kind: input, shape index: {}]   ;;  %s5043_s1 = inlined_call_operand.vmem [shape: f32[2,128,16], index: 1, kind: input, shape index: {}]   ;;  %s5044_s2 = inlined_call_operand.vmem [shape: f32[2,16,64], index: 2, kind: input, shape index: {}]   ;;  %s5045_s3 = inlined_call_operand.vmem [shape: f32[2,128,8], index: 3, kind: input, shape index: {}]   ;;  %s5046_s4 = inlined_call_operand.vmem [shape: f32[16,4], index: 4, kind: input, shape index: {}]   ;;  %s5047_s5 = inlined_call_operand.hbm [shape: f32[1,1,128], index: 5, kind: output, shape index: {}]  }
   0x1   :  { %v22_v0 = vld [vmem:[%s5046_s4 + $0x8] sm:$0xff]  ;;  %3646 = vset.pattern.permute.xlu1 %v5048_v1  ;;  %3645 = vset.pattern.permute.xlu0 %v5054_v2 }
   0x2   :  { %10 = vsyncpa [#allocation3], 0  ;;  %44 = vperm.xlu1 %3646, %v22_v0   ;;  %31 = vperm.xlu0 %3645, %v22_v0   ;;  %v21_v3 = vld [vmem:[%s5046_s4] sm:$0xff]  ;;  %v68_v4 = vld [vmem:[%s5045_s3 + $0x8] sm:$0xff]  ;;  %vm113_vm0 = vcmask 130048   ;;  %s3799_s22 = smov 80  }
   0x3   :  { %3647 = vset.pattern.permute.xlu2 %v5054_v2  ;;  %v49_v5 = vld [vmem:[%s5043_s1] sm:$0xff]  ;;  %v50_v9 = vld [vmem:[%s5043_s1 + $0x8] sm:$0xff]  ;;  %v51_v20 = vld [vmem:[%s5043_s1 + $0x10] sm:$0xff]  ;;  %s3800_s23 = smov 64   ;;  %s3801_s24 = smov 16   ;;  %vm1476_vm13 = vcmask 523264  }
   0x4   :  { %v115_v6 = vsel %vm113_vm0, %v49_v5, 0  ;;  %v3682_v8 = vld [vmem:[%s5042_s0] ss:$0 sm:$0xff]  ;;  %v118_v15 = vsel %vm113_vm0, %v50_v9, 0  ;;  %v121_v27 = vsel %vm113_vm0, %v51_v20, 0  ;;  %v52_v36 = vld [vmem:[%s5043_s1 + $0x18] sm:$0xff] }
   0x5   :  { %v3859_v7 = vand.u32 4294901760, %v115_v6  ;;  %v67_v13 = vld [vmem:[%s5045_s3] sm:$0xff]  ;;  %v3874_v18 = vand.u32 4294901760, %v118_v15  ;;  %v3885_v33 = vand.u32 4294901760, %v121_v27  ;;  %v124_v41 = vsel %vm113_vm0, %v52_v36, 0  ;;  %v54_v54 = vld [vmem:[%s5043_s1 + $0x28] sm:$0xff] }
   0x6   :  { %v174_v45 = vand.u32 4294901760, %v124_v41  ;;  %v53_v47 = vld [vmem:[%s5043_s1 + $0x20] sm:$0xff]  ;;  %v70_v57 = vld [vmem:[%s5045_s3 + $0x18] sm:$0xff]  ;;  %v130_v58 = vsel %vm113_vm0, %v54_v54, 0  ;;  %v69_v0 = vld [vmem:[%s5045_s3 + $0x10] sm:$0xff]  ;;  %s3802_s25 = smov 32  }
   0x7   :  { %v151_v12 = vsub.f32 %v115_v6, %v3859_v7  ;;  %v159_v24 = vsub.f32 %v118_v15, %v3874_v18  ;;  %v167_v39 = vsub.f32 %v121_v27, %v3885_v33  ;;  %v127_v50 = vsel %vm113_vm0, %v53_v47, 0  ;;  %100 = vperm.xlu2 %3647, %v70_v57   ;;  %v72_v6 = vld [vmem:[%s5045_s3 + $0x28] sm:$0xff]  ;;  %v71_v9 = vld [vmem:[%s5045_s3 + $0x20] sm:$0xff]  ;;  %s3803_s26 = smov 48   ;;  %s3804_s27 = smov 96  }
   0x8   :  { %v175_v49 = vsub.f32 %v124_v41, %v174_v45  ;;  %v182_v53 = vand.u32 4294901760, %v127_v50  ;;  %v190_v61 = vand.u32 4294901760, %v130_v58  ;;  %s3805_s28 = smov 112  }
   0x9   :  { %v152_v17 = vand.u32 4294901760, %v151_v12  ;;  %v160_v32 = vand.u32 4294901760, %v159_v24  ;;  %v168_v44 = vand.u32 4294901760, %v167_v39 }
   0xa   :  { %40 = vperm.xlu1 %3646, %v21_v3   ;;  %26 = vperm.xlu0 %3645, %v21_v3   ;;  %v176_v52 = vand.u32 4294901760, %v175_v49  ;;  %v183_v56 = vsub.f32 %v127_v50, %v182_v53  ;;  %v191_v63 = vsub.f32 %v130_v58, %v190_v61 }
   0xb   :  { %v153_v23 = vsub.f32 %v151_v12, %v152_v17  ;;  %v161_v38 = vsub.f32 %v159_v24, %v160_v32  ;;  %v169_v48 = vsub.f32 %v167_v39, %v168_v44 }
   0xc   :  { %v177_v55 = vsub.f32 %v175_v49, %v176_v52  ;;  %v184_v60 = vand.u32 4294901760, %v183_v56 }
   0xd   :  { %v154_v31 = vand.u32 4294901760, %v153_v23  ;;  %v162_v43 = vand.u32 4294901760, %v161_v38  ;;  %v170_v51 = vand.u32 4294901760, %v169_v48 }
   0xe   :  { %v178_v59 = vand.u32 4294901760, %v177_v55  ;;  %v185_v62 = vsub.f32 %v183_v56, %v184_v60 }
   0xf   :  { %95 = vperm.xlu2 %3647, %v69_v0  }
  0x10   :  { %v186_v3 = vand.u32 4294901760, %v185_v62 }
  0x12   :  { %90 = vperm.xlu0 %3645, %v68_v4   ;;  %3648 = vset.pattern.permute.xlu1 %v5054_v2  ;;  %v192_v4 = vand.u32 4294901760, %v191_v63 }
  0x13   :  { %85 = vperm.xlu1 %3648, %v67_v13  }
  0x14   :  { %v193_v5 = vsub.f32 %v191_v63, %v192_v4 }
  0x17   :  { %110 = vperm.xlu2 %3647, %v72_v6  }
  0x1f   :  { %105 = vperm.xlu2 %3647, %v71_v9  }
  0x61   :  { %v101_v23 = vpop.permute.xlu2 %100 }
  0x74   :  { %v45_v10 = vpop.permute.xlu1 %44  ;;  %v32_v11 = vpop.permute.xlu0 %31 }
  0x75   :  { %v38_v14 = vmul.f32 %v3682_v8, %v32_v11 }
  0x77   :  { %v3872_v16 = vadd.f32 %v45_v10, %v38_v14 }
  0x79   :  { %v146_v19 = vand.u32 4294901760, %v3872_v16 }
  0x7b   :  { %147 = vmatpush.msra.mxu0 %v146_v19  ;;  %316 = vmatpush.msra.mxu3 %v146_v19  ;;  %v214_v21 = vsub.f32 %v3872_v16, %v146_v19 }
  0x7c   :  { %v27_v22 = vpop.permute.xlu0 %26  ;;  %v41_v28 = vpop.permute.xlu1 %40 }
  0x7d   :  { %v37_v25 = vmul.f32 %v3682_v8, %v27_v22  ;;  %266 = vmatpush.msra.mxu2 %v214_v21  ;;  %v215_v26 = vand.u32 4294901760, %v214_v21  ;;  %v194_v8 = vand.u32 4294901760, %v193_v5 }
  0x7f   :  { %v3883_v29 = vadd.f32 %v41_v28, %v37_v25  ;;  %v216_v30 = vsub.f32 %v214_v21, %v215_v26  ;;  %v96_v28 = vpop.permute.xlu2 %95 }
  0x81   :  { %v148_v34 = vand.u32 4294901760, %v3883_v29  ;;  %v217_v35 = vand.u32 4294901760, %v216_v30 }
  0x83   :  { %149 = vmatpush.msra.mxu0 %v148_v34  ;;  %218 = vmatpush.msra.mxu1 %v217_v35  ;;  %v220_v37 = vsub.f32 %v3883_v29, %v148_v34 }
  0x84   :  { %318 = vmatpush.msra.mxu3 %v148_v34  ;;  %155 = vmatmul.f32.vlgmr.msra.gmra.mxu0 %v154_v31 }
  0x85   :  { %373 = vmatpush.msrb.mxu0 %v215_v26  ;;  %269 = vmatpush.msra.mxu2 %v220_v37  ;;  %v221_v40 = vand.u32 4294901760, %v220_v37 }
  0x86   :  { %272 = vmatmul.f32.vlgmr.msra.gmra.mxu2 %v151_v12  ;;  %322 = vmatmul.f32.vlgmr.msra.gmra.mxu3 %v152_v17 }
  0x87   :  { %377 = vmatpush.msrb.mxu0 %v221_v40  ;;  %v222_v42 = vsub.f32 %v220_v37, %v221_v40  ;;  %v111_v48 = vpop.permute.xlu2 %110 }
  0x89   :  { %v223_v46 = vand.u32 4294901760, %v222_v42 }
  0x8b   :  { %224 = vmatpush.msra.mxu1 %v223_v46 }
  0x8c   :  { %163 = vmatmul.f32.gmra.mxu0 %v162_v43  ;;  %226 = vmatmul.f32.vlgmr.msra.gmra.mxu1 %v3859_v7 }
  0x8d   :  { %418 = vmatpush.msrb.mxu1 %v146_v19 }
  0x8e   :  { %277 = vmatmul.f32.gmra.mxu2 %v159_v24  ;;  %328 = vmatmul.f32.gmra.mxu3 %v160_v32 }
  0x8f   :  { %420 = vmatpush.msrb.mxu1 %v148_v34  ;;  %v106_v54 = vpop.permute.xlu2 %105 }
  0x94   :  { %171 = vmatmul.f32.gmra.mxu0 %v170_v51  ;;  %230 = vmatmul.f32.gmra.mxu1 %v3874_v18 }
  0x96   :  { %282 = vmatmul.f32.gmra.mxu2 %v167_v39  ;;  %334 = vmatmul.f32.gmra.mxu3 %v168_v44 }
  0x9c   :  { %179 = vmatmul.f32.gmra.mxu0 %v178_v59  ;;  %234 = vmatmul.f32.gmra.mxu1 %v3885_v33 }
  0x9e   :  { %287 = vmatmul.f32.gmra.mxu2 %v175_v49  ;;  %340 = vmatmul.f32.gmra.mxu3 %v176_v52 }
  0xa4   :  { %187 = vmatmul.f32.gmra.mxu0 %v186_v3  ;;  %238 = vmatmul.f32.gmra.mxu1 %v174_v45 }
  0xa6   :  { %292 = vmatmul.f32.gmra.mxu2 %v183_v56  ;;  %346 = vmatmul.f32.gmra.mxu3 %v184_v60 }
  0xac   :  { %195 = vmatmul.f32.gmra.mxu0 %v194_v8  ;;  %242 = vmatmul.f32.gmra.mxu1 %v182_v53 }
  0xae   :  { %297 = vmatmul.f32.gmra.mxu2 %v191_v63  ;;  %352 = vmatmul.f32.gmra.mxu3 %v192_v4 }
  0xb4   :  { %246 = vmatmul.f32.gmra.mxu1 %v190_v61  ;;  %379 = vmatmul.f32.vlgmr.msrb.gmra.mxu0 %v3859_v7 }
  0xbc   :  { %383 = vmatmul.f32.gmra.mxu0 %v3874_v18  ;;  %422 = vmatmul.f32.vlgmr.msrb.gmra.mxu1 %v3859_v7 }
  0xc4   :  { %387 = vmatmul.f32.gmra.mxu0 %v3885_v33  ;;  %426 = vmatmul.f32.gmra.mxu1 %v3874_v18 }
  0xcc   :  { %391 = vmatmul.f32.gmra.mxu0 %v174_v45  ;;  %430 = vmatmul.f32.gmra.mxu1 %v3885_v33 }
  0xd4   :  { %395 = vmatmul.f32.gmra.mxu0 %v182_v53  ;;  %434 = vmatmul.f32.gmra.mxu1 %v174_v45 }
  0xdc   :  { %399 = vmatmul.f32.gmra.mxu0 %v190_v61  ;;  %438 = vmatmul.f32.gmra.mxu1 %v182_v53 }
  0xe4   :  { %442 = vmatmul.f32.gmra.mxu1 %v190_v61 }
 0x101   :  { %v3923_v10 = vpop.f32.mrf.mxu0 }
 0x109   :  { %v3925_v11 = vpop.f32.mrf.mxu0  ;;  %v3927_v12 = vpop.f32.mrf.mxu1 }
 0x10a   :  { %v3931_v19 = vpop.f32.mrf.mxu2  ;;  %v3933_v22 = vpop.f32.mrf.mxu3 }
 0x111   :  { %v172_v13 = vpop.f32.mrf.mxu0  ;;  %v3929_v7 = vpop.f32.mrf.mxu1 }
 0x112   :  { %v3937_v26 = vpop.f32.mrf.mxu2  ;;  %v3939_v27 = vpop.f32.mrf.mxu3  ;;  %v173_v32 = vadd.f32 %v172_v13, %v96_v28 }
 0x119   :  { %v180_v14 = vpop.f32.mrf.mxu0  ;;  %v235_v15 = vpop.f32.mrf.mxu1 }
 0x11a   :  { %v283_v33 = vpop.f32.mrf.mxu2  ;;  %v236_v34 = vadd.f32 %v235_v15, %v173_v32  ;;  %v335_v35 = vpop.f32.mrf.mxu3  ;;  %v181_v37 = vadd.f32 %v180_v14, %v101_v23 }
 0x11b   :  { %v91_v23 = vpop.permute.xlu0 %90 }
 0x11c   :  { %v284_v38 = vadd.f32 %v283_v33, %v236_v34  ;;  %v165_v28 = vadd.f32 %v3925_v11, %v91_v23 }
 0x11e   :  { %v336_v40 = vadd.f32 %v335_v35, %v284_v38  ;;  %v232_v32 = vadd.f32 %v3929_v7, %v165_v28 }
 0x120   :  { %v279_v35 = vadd.f32 %v3937_v26, %v232_v32 }
 0x121   :  { %v188_v17 = vpop.f32.mrf.mxu0  ;;  %v239_v18 = vpop.f32.mrf.mxu1 }
 0x122   :  { %v240_v41 = vadd.f32 %v239_v18, %v181_v37  ;;  %v288_v42 = vpop.f32.mrf.mxu2  ;;  %v341_v47 = vpop.f32.mrf.mxu3  ;;  %v189_v55 = vadd.f32 %v188_v17, %v106_v54  ;;  %v73_v18 = vld [vmem:[%s5045_s3 + $0x30] sm:$0xff]  ;;  %v330_v38 = vadd.f32 %v3939_v27, %v279_v35 }
 0x124   :  { %v289_v45 = vadd.f32 %v288_v42, %v240_v41 }
 0x126   :  { %v342_v50 = vadd.f32 %v341_v47, %v289_v45 }
 0x129   :  { %v196_v20 = vpop.f32.mrf.mxu0  ;;  %v243_v21 = vpop.f32.mrf.mxu1 }
 0x12a   :  { %v293_v56 = vpop.f32.mrf.mxu2  ;;  %v244_v57 = vadd.f32 %v243_v21, %v189_v55  ;;  %v347_v58 = vpop.f32.mrf.mxu3  ;;  %v197_v59 = vadd.f32 %v196_v20, %v111_v48  ;;  %v74_v20 = vld [vmem:[%s5045_s3 + $0x38] sm:$0xff] }
 0x12b   :  { %v86_v21 = vpop.permute.xlu1 %85 }
 0x12c   :  { %v294_v60 = vadd.f32 %v293_v56, %v244_v57 }
 0x12e   :  { %v348_v63 = vadd.f32 %v347_v58, %v294_v60 }
 0x131   :  { %v247_v24 = vpop.f32.mrf.mxu1  ;;  %v3935_v25 = vpop.f32.mrf.mxu0 }
 0x132   :  { %v248_v0 = vadd.f32 %v247_v24, %v197_v59  ;;  %v298_v3 = vpop.f32.mrf.mxu2  ;;  %v353_v8 = vpop.f32.mrf.mxu3  ;;  %v157_v24 = vadd.f32 %v3923_v10, %v86_v21 }
 0x134   :  { %v299_v5 = vadd.f32 %v298_v3, %v248_v0  ;;  %v228_v34 = vadd.f32 %v3927_v12, %v157_v24 }
 0x136   :  { %v354_v13 = vadd.f32 %v353_v8, %v299_v5  ;;  %v274_v37 = vadd.f32 %v3931_v19, %v228_v34 }
 0x139   :  { %v3941_v30 = vpop.f32.mrf.mxu0  ;;  %v3943_v31 = vpop.f32.mrf.mxu1 }
 0x141   :  { %v3945_v36 = vpop.f32.mrf.mxu1  ;;  %v388_v39 = vpop.f32.mrf.mxu0 }
 0x142   :  { %v389_v43 = vadd.f32 %v388_v39, %v336_v40  ;;  %v324_v39 = vadd.f32 %v3933_v22, %v274_v37  ;;  %v385_v40 = vadd.f32 %v3941_v30, %v330_v38 }
 0x144   :  { %v381_v10 = vadd.f32 %v3935_v25, %v324_v39  ;;  %v4028_v7 = vadd.f32 %v3945_v36, %v385_v40 }
 0x146   :  { %v4031_v12 = vadd.f32 %v3943_v31, %v381_v10 }
 0x149   :  { %v431_v44 = vpop.f32.mrf.mxu1  ;;  %v392_v49 = vpop.f32.mrf.mxu0 }
 0x14a   :  { %v3947_v46 = vadd.f32 %v431_v44, %v389_v43  ;;  %v393_v51 = vadd.f32 %v392_v49, %v342_v50 }
 0x14c   :  { %532 = vrot.lane.b32.xlu1 %v3947_v46, %s3799_s22  ;;  %514 = vrot.lane.b32.xlu2 %v3947_v46, %s3800_s23  ;;  %v446_v19 = vmul.f32 %v3947_v46, %v4031_v12 }
 0x14d   :  { %460 = vrot.lane.b32.xlu0 %v3947_v46, %s3801_s24 }
 0x14e   :  { %v448_v25 = vrot.slane %v446_v19, 4 }
 0x151   :  { %v435_v52 = vpop.f32.mrf.mxu1  ;;  %v396_v61 = vpop.f32.mrf.mxu0 }
 0x152   :  { %v3955_v53 = vadd.f32 %v435_v52, %v393_v51  ;;  %v397_v4 = vadd.f32 %v396_v61, %v348_v63  ;;  %v449_v52 = vadd.f32 %v448_v25, %v446_v19 }
 0x154   :  { %480 = vrot.lane.b32.xlu1 %v3955_v53, %s3802_s25  ;;  %462 = vrot.lane.b32.xlu2 %v3955_v53, %s3801_s24  ;;  %v447_v22 = vmul.f32 %v3955_v53, %v4028_v7  ;;  %v450_v61 = vrot.slane %v449_v52, 2 }
 0x155   :  { %478 = vrot.lane.b32.xlu0 %v3947_v46, %s3802_s25 }
 0x156   :  { %v454_v45 = vrot.slane %v447_v22, 4  ;;  %v451_v23 = vadd.f32 %v450_v61, %v449_v52 }
 0x159   :  { %v439_v62 = vpop.f32.mrf.mxu1  ;;  %v400_v9 = vpop.f32.mrf.mxu0 }
 0x15a   :  { %v3975_v6 = vadd.f32 %v439_v62, %v397_v4  ;;  %v401_v15 = vadd.f32 %v400_v9, %v354_v13 }
 0x15c   :  { %498 = vrot.lane.b32.xlu1 %v3955_v53, %s3803_s26  ;;  %552 = vrot.lane.b32.xlu2 %v3955_v53, %s3804_s27 }
 0x15d   :  { %496 = vrot.lane.b32.xlu0 %v3947_v46, %s3803_s26 }
 0x161   :  { %v443_v14 = vpop.f32.mrf.mxu1 }
 0x162   :  { %v3983_v17 = vadd.f32 %v443_v14, %v401_v15 }
 0x164   :  { %516 = vrot.lane.b32.xlu1 %v3955_v53, %s3800_s23  ;;  %568 = vrot.lane.b32.xlu2 %v3947_v46, %s3805_s28 }
 0x165   :  { %534 = vrot.lane.b32.xlu0 %v3955_v53, %s3799_s22 }
 0x16c   :  { %570 = vrot.lane.b32.xlu1 %v3955_v53, %s3805_s28  ;;  %682 = vrot.lane.b32.xlu2 %v3975_v6, %s3803_s26  ;;  %v455_v53 = vadd.f32 %v454_v45, %v447_v22 }
 0x16d   :  { %550 = vrot.lane.b32.xlu0 %v3947_v46, %s3804_s27 }
 0x16e   :  { %v456_v0 = vrot.slane %v455_v53, 2 }
 0x170   :  { %v457_v28 = vadd.f32 %v456_v0, %v455_v53 }
 0x174   :  { %666 = vrot.lane.b32.xlu1 %v3975_v6, %s3801_s24  ;;  %676 = vrot.lane.b32.xlu2 %v3983_v17, %s3802_s25 }
 0x175   :  { %674 = vrot.lane.b32.xlu0 %v3975_v6, %s3802_s25 }
 0x17c   :  { %690 = vrot.lane.b32.xlu1 %v3975_v6, %s3800_s23  ;;  %700 = vrot.lane.b32.xlu2 %v3983_v17, %s3799_s22 }
 0x17d   :  { %698 = vrot.lane.b32.xlu0 %v3975_v6, %s3799_s22 }
 0x184   :  { %684 = vrot.lane.b32.xlu1 %v3983_v17, %s3803_s26  ;;  %706 = vrot.lane.b32.xlu2 %v3975_v6, %s3804_s27 }
 0x185   :  { %668 = vrot.lane.b32.xlu0 %v3983_v17, %s3801_s24 }
 0x18c   :  { %708 = vrot.lane.b32.xlu1 %v3983_v17, %s3804_s27  ;;  %754 = vperm.xlu2 %3647, %v73_v18  }
 0x18d   :  { %692 = vrot.lane.b32.xlu0 %v3983_v17, %s3800_s23 }
 0x194   :  { %714 = vrot.lane.b32.xlu1 %v3975_v6, %s3805_s28 }
 0x195   :  { %716 = vrot.lane.b32.xlu0 %v3983_v17, %s3805_s28 }
 0x19d   :  { %759 = vperm.xlu0 %3645, %v74_v20  }
 0x1a6   :  { %v515_v33 = vpop.permute.xlu2 %514 }
 0x1a7   :  { %v518_v49 = vmul.f32 %v515_v33, %v4031_v12 }
 0x1a9   :  { %v520_v55 = vrot.slane %v518_v49, 4 }
 0x1ab   :  { %v521_v5 = vadd.f32 %v520_v55, %v518_v49 }
 0x1ad   :  { %v522_v34 = vrot.slane %v521_v5, 2 }
 0x1ae   :  { %v463_v41 = vpop.permute.xlu2 %462 }
 0x1af   :  { %v465_v26 = vmul.f32 %v463_v41, %v4028_v7 }
 0x1b1   :  { %v472_v30 = vrot.slane %v465_v26, 4 }
 0x1b3   :  { %v473_v46 = vadd.f32 %v472_v30, %v465_v26  ;;  %v452_v26 = vrot.slane %v451_v23, 1  ;;  %v458_v30 = vrot.slane %v457_v28, 1 }
 0x1b5   :  { %v474_v57 = vrot.slane %v473_v46, 2  ;;  %v4051_v52 = vadd.f32 %v452_v26, %v451_v23  ;;  %v4053_v55 = vadd.f32 %v458_v30, %v457_v28 }
 0x1b6   :  { %v553_v47 = vpop.permute.xlu2 %552 }
 0x1b7   :  { %v555_v60 = vmul.f32 %v553_v47, %v4028_v7  ;;  %v475_v13 = vadd.f32 %v474_v57, %v473_v46 }
 0x1b9   :  { %v562_v21 = vrot.slane %v555_v60, 4  ;;  %v476_v39 = vrot.slane %v475_v13, 1 }
 0x1be   :  { %v533_v42 = vpop.permute.xlu1 %532  ;;  %v569_v15 = vpop.permute.xlu2 %568 }
 0x1bf   :  { %v461_v11 = vpop.permute.xlu0 %460  ;;  %v536_v14 = vmul.f32 %v533_v42, %v4031_v12  ;;  %v572_v35 = vmul.f32 %v569_v15, %v4031_v12  ;;  %v563_v42 = vadd.f32 %v562_v21, %v555_v60 }
 0x1c0   :  { %v464_v27 = vmul.f32 %v461_v11, %v4031_v12 }
 0x1c1   :  { %v538_v40 = vrot.slane %v536_v14, 4  ;;  %v574_v45 = vrot.slane %v572_v35, 4 }
 0x1c2   :  { %v466_v31 = vrot.slane %v464_v27, 4 }
 0x1c3   :  { %v539_v49 = vadd.f32 %v538_v40, %v536_v14  ;;  %v575_v60 = vadd.f32 %v574_v45, %v572_v35 }
 0x1c4   :  { %v467_v54 = vadd.f32 %v466_v31, %v464_v27 }
 0x1c5   :  { %v540_v0 = vrot.slane %v539_v49, 2 }
 0x1c6   :  { %v481_v43 = vpop.permute.xlu1 %480  ;;  %v468_v3 = vrot.slane %v467_v54, 2 }
 0x1c7   :  { %v483_v44 = vmul.f32 %v481_v43, %v4028_v7  ;;  %v479_v36 = vpop.permute.xlu0 %478 }
 0x1c8   :  { %v482_v48 = vmul.f32 %v479_v36, %v4031_v12  ;;  %v469_v32 = vadd.f32 %v468_v3, %v467_v54  ;;  %v523_v36 = vadd.f32 %v522_v34, %v521_v5  ;;  %v541_v34 = vadd.f32 %v540_v0, %v539_v49 }
 0x1c9   :  { %v490_v50 = vrot.slane %v483_v44, 4 }
 0x1ca   :  { %v484_v51 = vrot.slane %v482_v48, 4  ;;  %v470_v43 = vrot.slane %v469_v32, 1 }
 0x1cb   :  { %v491_v56 = vadd.f32 %v490_v50, %v483_v44 }
 0x1cc   :  { %v485_v58 = vadd.f32 %v484_v51, %v482_v48  ;;  %v4049_v48 = vadd.f32 %v476_v39, %v475_v13  ;;  %v564_v51 = vrot.slane %v563_v42, 2 }
 0x1cd   :  { %v492_v8 = vrot.slane %v491_v56, 2 }
 0x1ce   :  { %v499_v59 = vpop.permute.xlu1 %498  ;;  %v486_v18 = vrot.slane %v485_v58, 2 }
 0x1cf   :  { %v501_v62 = vmul.f32 %v499_v59, %v4028_v7  ;;  %v497_v63 = vpop.permute.xlu0 %496  ;;  %v493_v37 = vadd.f32 %v492_v8, %v491_v56  ;;  %v4055_v56 = vadd.f32 %v470_v43, %v469_v32  ;;  %v524_v59 = vrot.slane %v523_v36, 1 }
 0x1d0   :  { %v500_v4 = vmul.f32 %v497_v63, %v4031_v12  ;;  %v487_v41 = vadd.f32 %v486_v18, %v485_v58  ;;  %v593_v63 = vmax.f32 %v4053_v55, %v4049_v48  ;;  %v565_v8 = vadd.f32 %v564_v51, %v563_v42 }
 0x1d1   :  { %v508_v9 = vrot.slane %v501_v62, 4  ;;  %v494_v47 = vrot.slane %v493_v37, 1  ;;  %v586_v18 = vmax.f32 %v4051_v52, %v4055_v56 }
 0x1d2   :  { %v502_v20 = vrot.slane %v500_v4, 4  ;;  %v488_v50 = vrot.slane %v487_v41, 1 }
 0x1d3   :  { %v509_v24 = vadd.f32 %v508_v9, %v501_v62  ;;  %v4057_v61 = vadd.f32 %v494_v47, %v493_v37 }
 0x1d4   :  { %v503_v33 = vadd.f32 %v502_v20, %v500_v4  ;;  %v4061_v3 = vadd.f32 %v488_v50, %v487_v41 }
 0x1d5   :  { %v510_v38 = vrot.slane %v509_v24, 2  ;;  %v594_v28 = vmax.f32 %v593_v63, %v4057_v61 }
 0x1d6   :  { %v504_v10 = vrot.slane %v503_v33, 2  ;;  %v517_v11 = vpop.permute.xlu1 %516  ;;  %v587_v35 = vmax.f32 %v586_v18, %v4061_v3 }
 0x1d7   :  { %v511_v19 = vadd.f32 %v510_v38, %v509_v24  ;;  %v519_v22 = vmul.f32 %v517_v11, %v4028_v7  ;;  %v535_v27 = vpop.permute.xlu0 %534  ;;  %v576_v24 = vrot.slane %v575_v60, 2  ;;  %v566_v11 = vrot.slane %v565_v8, 1 }
 0x1d8   :  { %v505_v25 = vadd.f32 %v504_v10, %v503_v33  ;;  %v537_v44 = vmul.f32 %v535_v27, %v4028_v7 }
 0x1d9   :  { %v526_v31 = vrot.slane %v519_v22, 4  ;;  %v512_v53 = vrot.slane %v511_v19, 1  ;;  %v577_v27 = vadd.f32 %v576_v24, %v575_v60  ;;  %v4081_v47 = vadd.f32 %v566_v11, %v565_v8 }
 0x1da   :  { %v544_v46 = vrot.slane %v537_v44, 4  ;;  %v506_v57 = vrot.slane %v505_v25, 1 }
 0x1db   :  { %v527_v54 = vadd.f32 %v526_v31, %v519_v22  ;;  %v4063_v9 = vadd.f32 %v512_v53, %v511_v19  ;;  %v525_v19 = vadd.f32 %v524_v59, %v523_v36  ;;  %v542_v22 = vrot.slane %v541_v34, 1 }
 0x1dc   :  { %v545_v58 = vadd.f32 %v544_v46, %v537_v44  ;;  %v4068_v20 = vadd.f32 %v506_v57, %v505_v25  ;;  %v578_v50 = vrot.slane %v577_v27, 1 }
 0x1dd   :  { %v528_v62 = vrot.slane %v527_v54, 2  ;;  %v543_v49 = vadd.f32 %v542_v22, %v541_v34 }
 0x1de   :  { %v546_v4 = vrot.slane %v545_v58, 2  ;;  %v571_v5 = vpop.permute.xlu1 %570  ;;  %v588_v41 = vmax.f32 %v587_v35, %v4068_v20  ;;  %v579_v60 = vadd.f32 %v578_v50, %v577_v27 }
 0x1df   :  { %v529_v13 = vadd.f32 %v528_v62, %v527_v54  ;;  %v573_v14 = vmul.f32 %v571_v5, %v4028_v7  ;;  %v551_v15 = vpop.permute.xlu0 %550  ;;  %v595_v7 = vmax.f32 %v594_v28, %v4063_v9 }
 0x1e0   :  { %v547_v21 = vadd.f32 %v546_v4, %v545_v58  ;;  %v554_v23 = vmul.f32 %v551_v15, %v4031_v12  ;;  %v589_v44 = vmax.f32 %v588_v41, %v525_v19 }
 0x1e1   :  { %v530_v32 = vrot.slane %v529_v13, 1  ;;  %v580_v33 = vrot.slane %v573_v14, 4 }
 0x1e2   :  { %v548_v37 = vrot.slane %v547_v21, 1  ;;  %v556_v38 = vrot.slane %v554_v23, 4  ;;  %v590_v54 = vmax.f32 %v589_v44, %v543_v49 }
 0x1e3   :  { %v4074_v39 = vadd.f32 %v530_v32, %v529_v13  ;;  %v581_v40 = vadd.f32 %v580_v33, %v573_v14  ;;  %v4103_v32 = vpop.permute.xlu2 %682 }
 0x1e4   :  { %v557_v10 = vadd.f32 %v556_v38, %v554_v23  ;;  %v4078_v42 = vadd.f32 %v548_v37, %v547_v21 }
 0x1e5   :  { %v596_v12 = vmax.f32 %v595_v7, %v4074_v39  ;;  %v582_v26 = vrot.slane %v581_v40, 2 }
 0x1e6   :  { %v558_v30 = vrot.slane %v557_v10, 2  ;;  %v667_v57 = vpop.permute.xlu1 %666 }
 0x1e7   :  { %v597_v43 = vmax.f32 %v596_v12, %v4078_v42  ;;  %v583_v25 = vadd.f32 %v582_v26, %v581_v40  ;;  %v4089_v59 = vpop.permute.xlu0 %674 }
 0x1e8   :  { %v559_v45 = vadd.f32 %v558_v30, %v557_v10 }
 0x1e9   :  { %v584_v31 = vrot.slane %v583_v25, 1  ;;  %v598_v53 = vmax.f32 %v597_v43, %v4081_v47 }
 0x1ea   :  { %v560_v46 = vrot.slane %v559_v45, 1 }
 0x1eb   :  { %v4083_v51 = vadd.f32 %v584_v31, %v583_v25  ;;  %v677_v31 = vpop.permute.xlu2 %676 }
 0x1ec   :  { %v561_v36 = vadd.f32 %v560_v46, %v559_v45 }
 0x1ed   :  { %v4087_v58 = vmax.f32 %v598_v53, %v4083_v51 }
 0x1ee   :  { %v591_v62 = vmax.f32 %v590_v54, %v561_v36  ;;  %v4101_v28 = vpop.permute.xlu1 %690 }
 0x1ef   :  { %v624_v63 = vsub.f32 %v4053_v55, %v4087_v58  ;;  %v627_v0 = vsub.f32 %v4049_v48, %v4087_v58  ;;  %v630_v55 = vsub.f32 %v4057_v61, %v4087_v58  ;;  %v636_v61 = vsub.f32 %v4074_v39, %v4087_v58 }
 0x1f0   :  { %v592_v4 = vmax.f32 %v591_v62, %v579_v60  ;;  %v639_v7 = vsub.f32 %v4078_v42, %v4087_v58  ;;  %v642_v11 = vsub.f32 %v4081_v47, %v4087_v58 }
 0x1f1   :  { %v625_v5 = vmul.f32 1.442695, %v624_v63  ;;  %v628_v15 = vmul.f32 1.442695, %v627_v0  ;;  %v631_v33 = vmul.f32 1.442695, %v630_v55 }
 0x1f2   :  { %v600_v8 = vsub.f32 %v4051_v52, %v592_v4  ;;  %v603_v13 = vsub.f32 %v4055_v56, %v592_v4  ;;  %v606_v14 = vsub.f32 %v4061_v3, %v592_v4  ;;  %v609_v23 = vsub.f32 %v4068_v20, %v592_v4  ;;  %v4105_v52 = vpop.permute.xlu0 %698 }
 0x1f3   :  { %3683 = vpow2.f32 %v625_v5  ;;  %v612_v48 = vsub.f32 %v525_v19, %v592_v4  ;;  %v633_v56 = vsub.f32 %v4063_v9, %v4087_v58  ;;  %v615_v20 = vsub.f32 %v543_v49, %v592_v4 }
 0x1f4   :  { %v601_v18 = vmul.f32 1.442695, %v600_v8  ;;  %v604_v21 = vmul.f32 1.442695, %v603_v13  ;;  %v607_v24 = vmul.f32 1.442695, %v606_v14  ;;  %3685 = vpow2.f32 %v628_v15 }
 0x1f5   :  { %v610_v3 = vmul.f32 1.442695, %v609_v23  ;;  %v618_v34 = vsub.f32 %v561_v36, %v592_v4  ;;  %v613_v35 = vmul.f32 1.442695, %v612_v48  ;;  %v634_v38 = vmul.f32 1.442695, %v633_v56 }
 0x1f6   :  { %3687 = vpow2.f32 %v601_v18  ;;  %v621_v40 = vsub.f32 %v579_v60, %v592_v4  ;;  %v616_v10 = vmul.f32 1.442695, %v615_v20  ;;  %v637_v12 = vmul.f32 1.442695, %v636_v61  ;;  %v685_v44 = vpop.permute.xlu1 %684  ;;  %v701_v61 = vpop.permute.xlu2 %700 }
 0x1f7   :  { %3689 = vpow2.f32 %v604_v21  ;;  %v619_v39 = vmul.f32 1.442695, %v618_v34  ;;  %v645_v19 = vsub.f32 %v4083_v51, %v4087_v58  ;;  %v640_v27 = vmul.f32 1.442695, %v639_v7 }
 0x1f8   :  { %3691 = vpow2.f32 %v607_v24  ;;  %v622_v42 = vmul.f32 1.442695, %v621_v40  ;;  %v643_v50 = vmul.f32 1.442695, %v642_v11 }
 0x1f9   :  { %v3684_v37 = vpop.eup %3683  ;;  %3693 = vpow2.f32 %v610_v3  ;;  %v646_v58 = vmul.f32 1.442695, %v645_v19 }
 0x1fa   :  { %v3686_v41 = vpop.eup %3685  ;;  %3695 = vpow2.f32 %v631_v33  ;;  %v669_v49 = vpop.permute.xlu0 %668  ;;  %v664_v51 = vmul.f32 %v3684_v37, %v3983_v17 }
 0x1fb   :  { %3697 = vpow2.f32 %v613_v35  ;;  %v655_v45 = vadd.f32 %v3686_v41, %v3684_v37  ;;  %v672_v53 = vmul.f32 %v3686_v41, %v669_v49  ;;  %v55_v35 = vld [vmem:[%s5043_s1 + $0x30] sm:$0xff] }
 0x1fc   :  { %v3688_v9 = vpop.eup %3687  ;;  %3699 = vpow2.f32 %v634_v38  ;;  %v763_v11 = vsel %vm113_vm0, %v55_v35, 0 }
 0x1fd   :  { %v3690_v26 = vpop.eup %3689  ;;  %v662_v43 = vmul.f32 %v3688_v9, %v3975_v6  ;;  %3701 = vpow2.f32 %v616_v10  ;;  %v673_v5 = vadd.f32 %v672_v53, %v664_v51 }
 0x1fe   :  { %v648_v22 = vadd.f32 %v3690_v26, %v3688_v9  ;;  %v3692_v30 = vpop.eup %3691  ;;  %v670_v25 = vmul.f32 %v3690_v26, %v667_v57  ;;  %3703 = vpow2.f32 %v637_v12  ;;  %v709_v3 = vpop.permute.xlu1 %708  ;;  %v4126_v26 = vand.u32 4294901760, %v763_v11 }
 0x1ff   :  { %v3694_v46 = vpop.eup %3693  ;;  %3705 = vpow2.f32 %v619_v39  ;;  %v678_v4 = vmul.f32 %v3692_v30, %v4089_v59 }
 0x200   :  { %v649_v47 = vadd.f32 %v3692_v30, %v648_v22  ;;  %v3696_v54 = vpop.eup %3695  ;;  %3707 = vpow2.f32 %v640_v27  ;;  %v671_v6 = vadd.f32 %v670_v25, %v662_v43  ;;  %v686_v48 = vmul.f32 %v3694_v46, %v4103_v32  ;;  %v707_v25 = vpop.permute.xlu2 %706 }
 0x201   :  { %v3698_v60 = vpop.eup %3697  ;;  %v656_v57 = vadd.f32 %v3696_v54, %v655_v45  ;;  %3709 = vpow2.f32 %v622_v42  ;;  %v680_v18 = vmul.f32 %v3696_v54, %v677_v31 }
 0x202   :  { %v650_v36 = vadd.f32 %v3694_v46, %v649_v47  ;;  %v3700_v62 = vpop.eup %3699  ;;  %3711 = vpow2.f32 %v643_v50  ;;  %v679_v15 = vadd.f32 %v678_v4, %v671_v6  ;;  %v693_v59 = vpop.permute.xlu0 %692  ;;  %v694_v41 = vmul.f32 %v3698_v60, %v4101_v28  ;;  %v56_v50 = vld [vmem:[%s5043_s1 + $0x38] sm:$0xff] }
 0x203   :  { %v3702_v0 = vpop.eup %3701  ;;  %v657_v8 = vadd.f32 %v3700_v62, %v656_v57  ;;  %3713 = vpow2.f32 %v646_v58  ;;  %v681_v56 = vadd.f32 %v680_v18, %v673_v5  ;;  %v688_v38 = vmul.f32 %v3700_v62, %v685_v44 }
 0x204   :  { %v651_v63 = vadd.f32 %v3698_v60, %v650_v36  ;;  %v3704_v13 = vpop.eup %3703  ;;  %v687_v37 = vadd.f32 %v686_v48, %v679_v15  ;;  %v702_v39 = vmul.f32 %v3702_v0, %v4105_v52  ;;  %v4130_v28 = vsub.f32 %v763_v11, %v4126_v26 }
 0x205   :  { %v3706_v17 = vpop.eup %3705  ;;  %v658_v21 = vadd.f32 %v3704_v13, %v657_v8  ;;  %v689_v10 = vadd.f32 %v688_v38, %v681_v56  ;;  %v696_v32 = vmul.f32 %v3704_v13, %v693_v59  ;;  %v766_v62 = vsel %vm113_vm0, %v56_v50, 0 }
 0x206   :  { %v652_v14 = vadd.f32 %v3702_v0, %v651_v63  ;;  %v3708_v23 = vpop.eup %3707  ;;  %v695_v12 = vadd.f32 %v694_v41, %v687_v37  ;;  %v715_v30 = vpop.permute.xlu1 %714  ;;  %v710_v31 = vmul.f32 %v3706_v17, %v707_v25  ;;  %v788_v57 = vand.u32 4294901760, %v4130_v28 }
 0x207   :  { %v3710_v24 = vpop.eup %3709  ;;  %v659_v20 = vadd.f32 %v3708_v23, %v658_v21  ;;  %v697_v19 = vadd.f32 %v696_v32, %v689_v10  ;;  %v704_v42 = vmul.f32 %v3708_v23, %v701_v61  ;;  %v4137_v15 = vand.u32 4294901760, %v766_v62 }
 0x208   :  { %v653_v55 = vadd.f32 %v3706_v17, %v652_v14  ;;  %v3712_v33 = vpop.eup %3711  ;;  %v703_v27 = vadd.f32 %v702_v39, %v695_v12  ;;  %v718_v46 = vmul.f32 %v3710_v24, %v715_v30  ;;  %v5052_v39 = vmov 2  }
 0x209   :  { %v660_v7 = vadd.f32 %v3712_v33, %v659_v20  ;;  %v3714_v40 = vpop.eup %3713  ;;  %v705_v45 = vadd.f32 %v704_v42, %v697_v19  ;;  %v712_v52 = vmul.f32 %v3712_v33, %v709_v3  ;;  %v789_v20 = vsub.f32 %v4130_v28, %v788_v57  ;;  %3649 = vset.pattern.permute.xlu1 %v5052_v39 }
 0x20a   :  { %v654_v34 = vadd.f32 %v3710_v24, %v653_v55  ;;  %v717_v49 = vpop.permute.xlu0 %716  ;;  %v711_v54 = vadd.f32 %v710_v31, %v703_v27  ;;  %v795_v33 = vsub.f32 %v766_v62, %v4137_v15  ;;  %v5050_v19 = vmov 3   ;;  %3650 = vset.pattern.permute.xlu2 %v5052_v39  ;;  %v4159_v27 = vld [vmem:[%s5045_s3] sm:$0xff] }
 0x20b   :  { %v661_v9 = vadd.f32 %v3714_v40, %v660_v7  ;;  %v720_v6 = vmul.f32 %v3714_v40, %v717_v49  ;;  %v713_v0 = vadd.f32 %v712_v52, %v705_v45  ;;  %v790_v35 = vand.u32 4294901760, %v789_v20  ;;  %3651 = vset.pattern.permute.xlu0 %v5050_v19  ;;  %5065 = vst [vmem:[#allocation6_spill] sm:$0xff] %v4159_v27  ;;  %v755_v49 = vpop.permute.xlu2 %754 }
 0x20c   :  { %3715 = vrcp.f32 %v654_v34  ;;  %v733_v51 = vand.u32 2147483648, %v654_v34  ;;  %v731_v58 = vand.u32 2147483647, %v654_v34  ;;  %vm727_vm2 = vweird.f32 %v654_v34  ;;  %1001 = vperm.xlu2 %3650, %v4159_v27  }
 0x20d   :  { %3717 = vrcp.f32 %v661_v9  ;;  %v748_v4 = vand.u32 2147483648, %v661_v9  ;;  %v746_v13 = vand.u32 2147483647, %v661_v9  ;;  %v719_v14 = vadd.f32 %v718_v46, %v711_v54 }
 0x20e   :  { %v734_v5 = vor.u32 1.1754944e-38, %v733_v51  ;;  %vm732_vm5 = vcmp.eq.f32.partialorder %v731_v58, 8.507059e+37  ;;  %vm742_vm6 = vweird.f32 %v661_v9  ;;  %v721_v48 = vadd.f32 %v720_v6, %v713_v0 }
 0x20f   :  { %v749_v55 = vor.u32 1.1754944e-38, %v748_v4  ;;  %vm747_vm8 = vcmp.eq.f32.partialorder %v746_v13, 8.507059e+37  ;;  %v796_v38 = vand.u32 4294901760, %v795_v33 }
 0x211   :  { %v797_v10 = vsub.f32 %v795_v33, %v796_v38 }
 0x212   :  { %v3716_v22 = vpop.eup %3715  ;;  %v760_v52 = vpop.permute.xlu0 %759 }
 0x213   :  { %v723_v43 = vmul.f32 %v3716_v22, %v654_v34  ;;  %v3718_v44 = vpop.eup %3717  ;;  %vm728_vm1 = vweird.f32 %v3716_v22  ;;  %v798_v12 = vand.u32 4294901760, %v797_v10 }
 0x214   :  { %v738_v53 = vmul.f32 %v3718_v44, %v661_v9  ;;  %vm729_vm3 = vmor %vm727_vm2, %vm728_vm1  ;;  %vm743_vm4 = vweird.f32 %v3718_v44  ;;  %3653 = vset.pattern.permute.xlu2 %v5054_v2 }
 0x215   :  { %v724_v47 = vsub.f32 1.0, %v723_v43  ;;  %vm744_vm7 = vmor %vm742_vm6, %vm743_vm4 }
 0x216   :  { %v739_v60 = vsub.f32 1.0, %v738_v53  ;;  %v3808_v53 = vmov 16.0  }
 0x217   :  { %v725_v36 = vmul.f32 %v3716_v22, %v724_v47  ;;  %3719 = vrcp.f32 %v3808_v53 }
 0x218   :  { %v740_v8 = vmul.f32 %v3718_v44, %v739_v60 }
 0x219   :  { %v726_v63 = vadd.f32 %v3716_v22, %v725_v36 }
 0x21a   :  { %v741_v21 = vadd.f32 %v3718_v44, %v740_v8 }
 0x21b   :  { %v730_v17 = vsel %vm729_vm3, %v3716_v22, %v726_v63  ;;  %v4151_v22 = vld [vmem:[%s5045_s3 + $0x8] sm:$0xff] }
 0x21c   :  { %v735_v18 = vsel %vm732_vm5, %v734_v5, %v730_v17  ;;  %v745_v24 = vsel %vm744_vm7, %v3718_v44, %v741_v21  ;;  %5064 = vst [vmem:[#allocation5_spill] sm:$0xff] %v4151_v22  ;;  %1005 = vperm.xlu1 %3649, %v4151_v22   ;;  %1015 = vperm.xlu0 %3651, %v4151_v22  }
 0x21d   :  { %v736_v23 = vmul.f32 %v735_v18, %v719_v14  ;;  %v750_v3 = vsel %vm747_vm8, %v749_v55, %v745_v24 }
 0x21e   :  { %v751_v61 = vmul.f32 %v750_v3, %v721_v48 }
 0x21f   :  { %v784_v56 = vand.u32 4294901760, %v736_v23 }
 0x220   :  { %v782_v34 = vand.u32 4294901760, %v751_v61 }
 0x221   :  { %v824_v59 = vsub.f32 %v736_v23, %v784_v56 }
 0x222   :  { %v818_v7 = vsub.f32 %v751_v61, %v782_v34  ;;  %783 = vmatpush.msrb.mxu2 %v782_v34 }
 0x223   :  { %v825_v37 = vand.u32 4294901760, %v824_v59 }
 0x224   :  { %785 = vmatpush.msrb.mxu2 %v784_v56  ;;  %v819_v40 = vand.u32 4294901760, %v818_v7  ;;  %3652 = vset.pattern.permute.xlu1 %v5050_v19 }
 0x225   :  { %v826_v41 = vsub.f32 %v824_v59, %v825_v37  ;;  %791 = vmatmul.f32.vlgmr.msrb.gmra.mxu2 %v790_v35  ;;  %3655 = vset.pattern.permute.xlu0 %v5054_v2 }
 0x226   :  { %854 = vmatpush.msra.mxu2 %v818_v7  ;;  %v820_v32 = vsub.f32 %v818_v7, %v819_v40  ;;  %1011 = vperm.xlu1 %3652, %v4159_v27  }
 0x227   :  { %v827_v11 = vand.u32 4294901760, %v826_v41 }
 0x228   :  { %857 = vmatpush.msra.mxu2 %v824_v59  ;;  %v821_v9 = vand.u32 4294901760, %v820_v32 }
 0x22a   :  { %917 = vmatpush.msrb.mxu2 %v819_v40  ;;  %822 = vmatpush.msrb.mxu3 %v821_v9 }
 0x22c   :  { %921 = vmatpush.msrb.mxu2 %v825_v37  ;;  %828 = vmatpush.msrb.mxu3 %v827_v11  ;;  %v57_v11 = vld [vmem:[%s5043_s1 + $0x40] sm:$0xff] }
 0x22d   :  { %799 = vmatmul.f32.gmra.mxu2 %v798_v12  ;;  %830 = vmatmul.f32.vlgmr.msrb.gmra.mxu3 %v4126_v26 }
 0x22e   :  { %884 = vmatpush.msra.mxu3 %v782_v34  ;;  %3654 = vset.pattern.permute.xlu1 %v5054_v2 }
 0x230   :  { %886 = vmatpush.msra.mxu3 %v784_v56 }
 0x232   :  { %946 = vmatpush.msrb.mxu3 %v782_v34 }
 0x234   :  { %948 = vmatpush.msrb.mxu3 %v784_v56 }
 0x235   :  { %834 = vmatmul.f32.gmra.mxu3 %v4137_v15  ;;  %860 = vmatmul.f32.vlgmr.msra.gmra.mxu2 %v4130_v28 }
 0x23d   :  { %865 = vmatmul.f32.gmra.mxu2 %v795_v33  ;;  %890 = vmatmul.f32.vlgmr.msra.gmra.mxu3 %v788_v57  ;;  %v3720_v57 = vpop.eup %3719 }
 0x23e   :  { %v968_v8 = vmul.f32 16.0, %v3720_v57  ;;  %vm972_vm9 = vweird.f32 %v3720_v57 }
 0x245   :  { %896 = vmatmul.f32.gmra.mxu3 %v796_v38  ;;  %923 = vmatmul.f32.vlgmr.msrb.gmra.mxu2 %v4126_v26 }
 0x24d   :  { %927 = vmatmul.f32.gmra.mxu2 %v4137_v15  ;;  %950 = vmatmul.f32.vlgmr.msrb.gmra.mxu3 %v4126_v26 }
 0x255   :  { %954 = vmatmul.f32.gmra.mxu3 %v4137_v15  ;;  %v969_v15 = vsub.f32 1.0, %v968_v8  ;;  %v76_v8 = vld [vmem:[%s5045_s3 + $0x48] sm:$0xff] }
 0x257   :  { %v970_v23 = vmul.f32 %v3720_v57, %v969_v15 }
 0x259   :  { %v971_v48 = vadd.f32 %v3720_v57, %v970_v23 }
 0x25b   :  { %v4175_v20 = vsel %vm972_vm9, %v3720_v57, %v971_v48 }
 0x25c   :  { %5066 = vst [vmem:[#allocation7_spill] sm:$0xff] %v4175_v20 }
 0x28e   :  { %v1016_v57 = vpop.permute.xlu0 %1015 }
 0x2a8   :  { %v792_v42 = vpop.f32.mrf.mxu2 }
 0x2a9   :  { %v793_v50 = vadd.f32 %v792_v42, %v755_v49  ;;  %v1061_v42 = vsel %vm113_vm0, %v57_v11, 0 }
 0x2b0   :  { %v800_v30 = vpop.f32.mrf.mxu2  ;;  %v831_v43 = vpop.f32.mrf.mxu3 }
 0x2b1   :  { %v801_v46 = vadd.f32 %v800_v30, %v760_v52  ;;  %v832_v51 = vadd.f32 %v831_v43, %v793_v50  ;;  %v81_v30 = vld [vmem:[%s5045_s3 + $0x70] sm:$0xff]  ;;  %v78_v50 = vld [vmem:[%s5045_s3 + $0x58] sm:$0xff] }
 0x2b2   :  { %1052 = vperm.xlu1 %3654, %v81_v30   ;;  %v82_v52 = vld [vmem:[%s5045_s3 + $0x78] sm:$0xff] }
 0x2b3   :  { %1057 = vperm.xlu2 %3653, %v82_v52  }
 0x2b8   :  { %v835_v25 = vpop.f32.mrf.mxu3  ;;  %v861_v28 = vpop.f32.mrf.mxu2 }
 0x2b9   :  { %v836_v26 = vadd.f32 %v835_v25, %v801_v46  ;;  %v862_v36 = vadd.f32 %v861_v28, %v832_v51  ;;  %v1006_v25 = vpop.permute.xlu1 %1005 }
 0x2ba   :  { %1037 = vperm.xlu1 %3654, %v78_v50  }
 0x2c0   :  { %v866_v44 = vpop.f32.mrf.mxu2  ;;  %v891_v45 = vpop.f32.mrf.mxu3 }
 0x2c1   :  { %v867_v58 = vadd.f32 %v866_v44, %v836_v26  ;;  %v892_v60 = vadd.f32 %v891_v45, %v862_v36  ;;  %v4186_v44 = vand.u32 4294901760, %v1061_v42 }
 0x2c2   :  { %1027 = vperm.xlu1 %3654, %v76_v8  }
 0x2c3   :  { %v1103_v49 = vsub.f32 %v1061_v42, %v4186_v44 }
 0x2c5   :  { %v1104_v26 = vand.u32 4294901760, %v1103_v49 }
 0x2c8   :  { %v897_v31 = vpop.f32.mrf.mxu3  ;;  %v924_v47 = vpop.f32.mrf.mxu2 }
 0x2c9   :  { %v898_v62 = vadd.f32 %v897_v31, %v867_v58  ;;  %v925_v63 = vadd.f32 %v924_v47, %v892_v60  ;;  %v58_v31 = vld [vmem:[%s5043_s1 + $0x48] sm:$0xff] }
 0x2ca   :  { %v1064_v46 = vsel %vm113_vm0, %v58_v31, 0  ;;  %3657 = vset.pattern.permute.xlu1 %v5048_v1 }
 0x2cb   :  { %v4199_v36 = vand.u32 4294901760, %v1064_v46  ;;  %1473 = vperm.xlu1 %3657, %v4151_v22  }
 0x2d0   :  { %v951_v54 = vpop.f32.mrf.mxu3  ;;  %v928_v6 = vpop.f32.mrf.mxu2 }
 0x2d1   :  { %v929_v0 = vadd.f32 %v928_v6, %v898_v62  ;;  %v952_v4 = vadd.f32 %v951_v54, %v925_v63  ;;  %v1002_v54 = vpop.permute.xlu2 %1001  ;;  %v1012_v6 = vpop.permute.xlu1 %1011  ;;  %v59_v62 = vld [vmem:[%s5043_s1 + $0x50] sm:$0xff] }
 0x2d2   :  { %v1067_v15 = vsel %vm113_vm0, %v59_v62, 0 }
 0x2d3   :  { %v958_v14 = vadd.f32 %v952_v4, %v3883_v29  ;;  %v1105_v4 = vsub.f32 %v1103_v49, %v1104_v26 }
 0x2d5   :  { %v1106_v23 = vand.u32 4294901760, %v1105_v4 }
 0x2d8   :  { %v955_v5 = vpop.f32.mrf.mxu3 }
 0x2d9   :  { %v956_v13 = vadd.f32 %v955_v5, %v929_v0  ;;  %v1111_v5 = vsub.f32 %v1064_v46, %v4199_v36 }
 0x2db   :  { %v959_v17 = vadd.f32 %v956_v13, %v3872_v16  ;;  %v80_v13 = vld [vmem:[%s5045_s3 + $0x68] sm:$0xff] }
 0x2dc   :  { %1047 = vperm.xlu2 %3653, %v80_v13  }
 0x2dd   :  { %v960_v18 = vadd.f32 %v959_v17, %v958_v14 }
 0x2df   :  { %v961_v21 = vrot.slane %v960_v18, 4 }
 0x2e1   :  { %v962_v55 = vadd.f32 %v961_v21, %v960_v18 }
 0x2e3   :  { %v963_v24 = vrot.slane %v962_v55, 2 }
 0x2e5   :  { %v964_v56 = vadd.f32 %v963_v24, %v962_v55  ;;  %v1112_v55 = vand.u32 4294901760, %v1111_v5  ;;  %v4218_v24 = vand.u32 4294901760, %v1067_v15 }
 0x2e7   :  { %v965_v3 = vrot.slane %v964_v56, 1 }
 0x2e9   :  { %v966_v33 = vadd.f32 %v965_v3, %v964_v56  ;;  %v60_v3 = vld [vmem:[%s5043_s1 + $0x58] sm:$0xff] }
 0x2eb   :  { %v974_v61 = vmul.f32 %v4175_v20, %v966_v33 }
 0x2ed   :  { %v975_v59 = vsub.f32 %v958_v14, %v974_v61  ;;  %v976_v34 = vsub.f32 %v959_v17, %v974_v61 }
 0x2ef   :  { %v977_v29 = vmul.f32 %v975_v59, %v975_v59  ;;  %v978_v35 = vmul.f32 %v976_v34, %v976_v34 }
 0x2f1   :  { %v979_v16 = vadd.f32 %v978_v35, %v977_v29  ;;  %v77_v29 = vld [vmem:[%s5045_s3 + $0x50] sm:$0xff] }
 0x2f2   :  { %1032 = vperm.xlu2 %3653, %v77_v29  }
 0x2f3   :  { %v980_v37 = vrot.slane %v979_v16, 4 }
 0x2f5   :  { %v981_v38 = vadd.f32 %v980_v37, %v979_v16  ;;  %v1070_v37 = vsel %vm113_vm0, %v60_v3, 0 }
 0x2f7   :  { %v982_v7 = vrot.slane %v981_v38, 2 }
 0x2f9   :  { %v983_v40 = vadd.f32 %v982_v7, %v981_v38 }
 0x2fb   :  { %v984_v41 = vrot.slane %v983_v40, 1 }
 0x2fd   :  { %v985_v10 = vadd.f32 %v984_v41, %v983_v40  ;;  %v4230_v41 = vand.u32 4294901760, %v1070_v37 }
 0x2ff   :  { %v986_v32 = vmul.f32 %v985_v10, %v4175_v20  ;;  %v1127_v11 = vsub.f32 %v1070_v37, %v4230_v41 }
 0x301   :  { %v987_v9 = vadd.f32 1e-05, %v986_v32  ;;  %v61_v32 = vld [vmem:[%s5043_s1 + $0x60] sm:$0xff] }
 0x302   :  { %v1073_v42 = vsel %vm113_vm0, %v61_v32, 0 }
 0x303   :  { %3721 = vrsqrt.f32 %v987_v9  ;;  %vm994_vm11 = vweird.f32 %v987_v9 }
 0x309   :  { %v3722_v12 = vpop.eup %3721 }
 0x30a   :  { %v989_v43 = vmul.f32 %v3722_v12, %v987_v9  ;;  %vm995_vm10 = vweird.f32 %v3722_v12 }
 0x30b   :  { %vm996_vm12 = vmor %vm994_vm11, %vm995_vm10 }
 0x30c   :  { %v990_v28 = vmul.f32 %v3722_v12, %v989_v43  ;;  %v1128_v43 = vand.u32 4294901760, %v1127_v11 }
 0x30e   :  { %v991_v45 = vmul.f32 0.5, %v990_v28  ;;  %v62_v28 = vld [vmem:[%s5043_s1 + $0x68] sm:$0xff] }
 0x310   :  { %v992_v47 = vsub.f32 1.5, %v991_v45  ;;  %v1129_v45 = vsub.f32 %v1127_v11, %v1128_v43 }
 0x312   :  { %v993_v51 = vmul.f32 %v3722_v12, %v992_v47  ;;  %v79_v47 = vld [vmem:[%s5045_s3 + $0x60] sm:$0xff]  ;;  %v1130_v50 = vand.u32 4294901760, %v1129_v45  ;;  %v1058_v45 = vpop.permute.xlu2 %1057 }
 0x313   :  { %1042 = vperm.xlu0 %3655, %v79_v47  }
 0x314   :  { %v997_v53 = vsel %vm996_vm12, %v3722_v12, %v993_v51  ;;  %v75_v12 = vld [vmem:[%s5045_s3 + $0x40] sm:$0xff]  ;;  %v63_v51 = vld [vmem:[%s5043_s1 + $0x70] sm:$0xff] }
 0x315   :  { %v999_v58 = vmul.f32 %v997_v53, %v976_v34  ;;  %v998_v60 = vmul.f32 %v997_v53, %v975_v59  ;;  %v1113_v59 = vsub.f32 %v1111_v5, %v1112_v55  ;;  %v1119_v34 = vsub.f32 %v1067_v15, %v4218_v24  ;;  %1022 = vperm.xlu2 %3653, %v75_v12  }
 0x317   :  { %v1009_v63 = vmul.f32 %v1006_v25, %v999_v58  ;;  %v1008_v0 = vmul.f32 %v1002_v54, %v998_v60  ;;  %v1114_v7 = vand.u32 4294901760, %v1113_v59  ;;  %v1120_v40 = vand.u32 4294901760, %v1119_v34 }
 0x318   :  { %v4243_v25 = vand.u32 4294901760, %v1073_v42 }
 0x319   :  { %v4211_v14 = vadd.f32 %v1012_v6, %v1008_v0  ;;  %v4213_v17 = vadd.f32 %v1016_v57, %v1009_v63  ;;  %v1121_v9 = vsub.f32 %v1119_v34, %v1120_v40  ;;  %v64_v57 = vld [vmem:[%s5043_s1 + $0x78] sm:$0xff] }
 0x31a   :  { %v1135_v31 = vsub.f32 %v1073_v42, %v4243_v25  ;;  %v1082_v0 = vsel %vm113_vm0, %v64_v57, 0 }
 0x31b   :  { %5067 = vst [vmem:[#allocation8_spill] sm:$0xff] %v4211_v14  ;;  %v1100_v18 = vand.u32 4294901760, %v4211_v14  ;;  %v1098_v21 = vand.u32 4294901760, %v4213_v17  ;;  %v1122_v30 = vand.u32 4294901760, %v1121_v9  ;;  %3656 = vset.pattern.permute.xlu0 %v5048_v1  ;;  %v1158_v8 = vand.u32 4294901760, %v1082_v0 }
 0x31c   :  { %5068 = vst [vmem:[#allocation9_spill] sm:$0xff] %v4213_v17  ;;  %v1136_v52 = vand.u32 4294901760, %v1135_v31  ;;  %1469 = vperm.xlu0 %3656, %v4159_v27  }
 0x31d   :  { %v1182_v48 = vsub.f32 %v4213_v17, %v1098_v21  ;;  %1099 = vmatpush.msra.mxu0 %v1098_v21  ;;  %1302 = vmatpush.msra.mxu3 %v1098_v21  ;;  %v1188_v56 = vsub.f32 %v4211_v14, %v1100_v18  ;;  %v1159_v15 = vsub.f32 %v1082_v0, %v1158_v8 }
 0x31e   :  { %v1137_v53 = vsub.f32 %v1135_v31, %v1136_v52 }
 0x31f   :  { %1101 = vmatpush.msra.mxu0 %v1100_v18  ;;  %1242 = vmatpush.msra.mxu2 %v1182_v48  ;;  %v1183_v33 = vand.u32 4294901760, %v1182_v48  ;;  %v1189_v61 = vand.u32 4294901760, %v1188_v56 }
 0x320   :  { %1304 = vmatpush.msra.mxu3 %v1100_v18  ;;  %1107 = vmatmul.f32.vlgmr.msra.gmra.mxu0 %v1106_v23  ;;  %v1138_v58 = vand.u32 4294901760, %v1137_v53 }
 0x321   :  { %1245 = vmatpush.msra.mxu2 %v1188_v56  ;;  %1371 = vmatpush.msrb.mxu0 %v1183_v33  ;;  %v1184_v35 = vsub.f32 %v1182_v48, %v1183_v33  ;;  %v1190_v16 = vsub.f32 %v1188_v56, %v1189_v61 }
 0x322   :  { %1248 = vmatmul.f32.vlgmr.msra.gmra.mxu2 %v1103_v49  ;;  %1308 = vmatmul.f32.vlgmr.msra.gmra.mxu3 %v1104_v26  ;;  %v1076_v49 = vsel %vm113_vm0, %v62_v28, 0  ;;  %v1079_v26 = vsel %vm113_vm0, %v63_v51, 0 }
 0x323   :  { %1375 = vmatpush.msrb.mxu0 %v1189_v61  ;;  %v1185_v38 = vand.u32 4294901760, %v1184_v35  ;;  %v1191_v10 = vand.u32 4294901760, %v1190_v16  ;;  %v1142_v46 = vand.u32 4294901760, %v1076_v49  ;;  %v1150_v6 = vand.u32 4294901760, %v1079_v26 }
 0x325   :  { %1186 = vmatpush.msra.mxu1 %v1185_v38  ;;  %v1143_v54 = vsub.f32 %v1076_v49, %v1142_v46  ;;  %v1151_v63 = vsub.f32 %v1079_v26, %v1150_v6 }
 0x327   :  { %1192 = vmatpush.msra.mxu1 %v1191_v10  ;;  %v1144_v60 = vand.u32 4294901760, %v1143_v54 }
 0x328   :  { %1115 = vmatmul.f32.gmra.mxu0 %v1114_v7  ;;  %1194 = vmatmul.f32.vlgmr.msra.gmra.mxu1 %v4186_v44 }
 0x329   :  { %1424 = vmatpush.msrb.mxu1 %v1098_v21  ;;  %v1145_v62 = vsub.f32 %v1143_v54, %v1144_v60  ;;  %v1160_v21 = vand.u32 4294901760, %v1159_v15 }
 0x32a   :  { %1253 = vmatmul.f32.gmra.mxu2 %v1111_v5  ;;  %1314 = vmatmul.f32.gmra.mxu3 %v1112_v55  ;;  %v1152_v5 = vand.u32 4294901760, %v1151_v63 }
 0x32b   :  { %1426 = vmatpush.msrb.mxu1 %v1100_v18  ;;  %v1146_v4 = vand.u32 4294901760, %v1145_v62  ;;  %v1161_v23 = vsub.f32 %v1159_v15, %v1160_v21 }
 0x32c   :  { %v1153_v13 = vsub.f32 %v1151_v63, %v1152_v5 }
 0x32d   :  { %v1162_v55 = vand.u32 4294901760, %v1161_v23 }
 0x32e   :  { %v1154_v18 = vand.u32 4294901760, %v1153_v13 }
 0x330   :  { %1123 = vmatmul.f32.gmra.mxu0 %v1122_v30  ;;  %1198 = vmatmul.f32.gmra.mxu1 %v4199_v36 }
 0x332   :  { %1258 = vmatmul.f32.gmra.mxu2 %v1119_v34  ;;  %1320 = vmatmul.f32.gmra.mxu3 %v1120_v40 }
 0x338   :  { %1131 = vmatmul.f32.gmra.mxu0 %v1130_v50  ;;  %1202 = vmatmul.f32.gmra.mxu1 %v4218_v24 }
 0x33a   :  { %1263 = vmatmul.f32.gmra.mxu2 %v1127_v11  ;;  %1326 = vmatmul.f32.gmra.mxu3 %v1128_v43 }
 0x340   :  { %1139 = vmatmul.f32.gmra.mxu0 %v1138_v58  ;;  %1206 = vmatmul.f32.gmra.mxu1 %v4230_v41 }
 0x342   :  { %1268 = vmatmul.f32.gmra.mxu2 %v1135_v31  ;;  %1332 = vmatmul.f32.gmra.mxu3 %v1136_v52  ;;  %v1053_v52 = vpop.permute.xlu1 %1052 }
 0x348   :  { %1147 = vmatmul.f32.gmra.mxu0 %v1146_v4  ;;  %1210 = vmatmul.f32.gmra.mxu1 %v4243_v25 }
 0x34a   :  { %1273 = vmatmul.f32.gmra.mxu2 %v1143_v54  ;;  %1338 = vmatmul.f32.gmra.mxu3 %v1144_v60  ;;  %v1038_v58 = vpop.permute.xlu1 %1037 }
 0x350   :  { %1155 = vmatmul.f32.gmra.mxu0 %v1154_v18  ;;  %1214 = vmatmul.f32.gmra.mxu1 %v1142_v46 }
 0x352   :  { %1278 = vmatmul.f32.gmra.mxu2 %v1151_v63  ;;  %1344 = vmatmul.f32.gmra.mxu3 %v1152_v5 }
 0x358   :  { %1163 = vmatmul.f32.gmra.mxu0 %v1162_v55  ;;  %1218 = vmatmul.f32.gmra.mxu1 %v1150_v6 }
 0x35a   :  { %1283 = vmatmul.f32.gmra.mxu2 %v1159_v15  ;;  %1350 = vmatmul.f32.gmra.mxu3 %v1160_v21  ;;  %v1028_v15 = vpop.permute.xlu1 %1027 }
 0x360   :  { %1222 = vmatmul.f32.gmra.mxu1 %v1158_v8  ;;  %1377 = vmatmul.f32.vlgmr.msrb.gmra.mxu0 %v4186_v44 }
 0x368   :  { %1381 = vmatmul.f32.gmra.mxu0 %v4199_v36  ;;  %1428 = vmatmul.f32.vlgmr.msrb.gmra.mxu1 %v4186_v44 }
 0x370   :  { %1385 = vmatmul.f32.gmra.mxu0 %v4218_v24  ;;  %1432 = vmatmul.f32.gmra.mxu1 %v4199_v36 }
 0x378   :  { %1389 = vmatmul.f32.gmra.mxu0 %v4230_v41  ;;  %1436 = vmatmul.f32.gmra.mxu1 %v4218_v24 }
 0x380   :  { %1393 = vmatmul.f32.gmra.mxu0 %v4243_v25  ;;  %1440 = vmatmul.f32.gmra.mxu1 %v4230_v41 }
 0x385   :  { %v1043_v57 = vpop.permute.xlu0 %1042 }
 0x388   :  { %1397 = vmatmul.f32.gmra.mxu0 %v1142_v46  ;;  %1444 = vmatmul.f32.gmra.mxu1 %v4243_v25 }
 0x390   :  { %1401 = vmatmul.f32.gmra.mxu0 %v1150_v6  ;;  %1448 = vmatmul.f32.gmra.mxu1 %v1142_v46  ;;  %v1048_v46 = vpop.permute.xlu2 %1047 }
 0x398   :  { %1405 = vmatmul.f32.gmra.mxu0 %v1158_v8  ;;  %1452 = vmatmul.f32.gmra.mxu1 %v1150_v6  ;;  %v1033_v60 = vpop.permute.xlu2 %1032 }
 0x39d   :  { %v4277_v44 = vpop.f32.mrf.mxu0 }
 0x3a0   :  { %1456 = vmatmul.f32.gmra.mxu1 %v1158_v8  ;;  %v1023_v55 = vpop.permute.xlu2 %1022 }
 0x3a1   :  { %v1109_v27 = vadd.f32 %v4277_v44, %v1023_v55 }
 0x3a5   :  { %v1116_v48 = vpop.f32.mrf.mxu0  ;;  %v4279_v36 = vpop.f32.mrf.mxu1 }
 0x3a6   :  { %v4283_v35 = vpop.f32.mrf.mxu2  ;;  %v4285_v38 = vpop.f32.mrf.mxu3  ;;  %v1117_v19 = vadd.f32 %v1116_v48, %v1028_v15 }
 0x3ad   :  { %v1124_v56 = vpop.f32.mrf.mxu0  ;;  %v4281_v3 = vpop.f32.mrf.mxu1 }
 0x3ae   :  { %v1254_v41 = vpop.f32.mrf.mxu2  ;;  %v4287_v10 = vpop.f32.mrf.mxu3  ;;  %v1125_v23 = vadd.f32 %v1124_v56, %v1033_v60 }
 0x3b5   :  { %v1132_v24 = vpop.f32.mrf.mxu0  ;;  %v1203_v33 = vpop.f32.mrf.mxu1 }
 0x3b6   :  { %v1259_v11 = vpop.f32.mrf.mxu2  ;;  %v4291_v12 = vpop.f32.mrf.mxu3  ;;  %v1133_v8 = vadd.f32 %v1132_v24, %v1038_v58  ;;  %v1200_v24 = vadd.f32 %v4281_v3, %v1117_v19 }
 0x3bd   :  { %v1140_v61 = vpop.f32.mrf.mxu0  ;;  %v1207_v59 = vpop.f32.mrf.mxu1 }
 0x3be   :  { %v1264_v43 = vpop.f32.mrf.mxu2  ;;  %v1327_v31 = vpop.f32.mrf.mxu3  ;;  %v1141_v5 = vadd.f32 %v1140_v61, %v1043_v57  ;;  %v1208_v39 = vadd.f32 %v1207_v59, %v1133_v8 }
 0x3c5   :  { %v1148_v34 = vpop.f32.mrf.mxu0  ;;  %v1211_v29 = vpop.f32.mrf.mxu1 }
 0x3c6   :  { %v1269_v47 = vpop.f32.mrf.mxu2  ;;  %v1333_v51 = vpop.f32.mrf.mxu3  ;;  %v1149_v0 = vadd.f32 %v1148_v34, %v1048_v46  ;;  %v1212_v1 = vadd.f32 %v1211_v29, %v1141_v5  ;;  %v1204_v34 = vadd.f32 %v1203_v33, %v1125_v23  ;;  %v1196_v29 = vadd.f32 %v4279_v36, %v1109_v27 }
 0x3c8   :  { %v1270_v61 = vadd.f32 %v1269_v47, %v1212_v1  ;;  %v1260_v48 = vadd.f32 %v1259_v11, %v1204_v34  ;;  %v1250_v19 = vadd.f32 %v4283_v35, %v1196_v29 }
 0x3ca   :  { %v1334_v46 = vadd.f32 %v1333_v51, %v1270_v61  ;;  %v1310_v35 = vadd.f32 %v4285_v38, %v1250_v19 }
 0x3cd   :  { %v1156_v16 = vpop.f32.mrf.mxu0  ;;  %v1215_v37 = vpop.f32.mrf.mxu1 }
 0x3ce   :  { %v1274_v26 = vpop.f32.mrf.mxu2  ;;  %v1339_v6 = vpop.f32.mrf.mxu3  ;;  %v1157_v4 = vadd.f32 %v1156_v16, %v1053_v52  ;;  %v1216_v18 = vadd.f32 %v1215_v37, %v1149_v0  ;;  %v1265_v52 = vadd.f32 %v1264_v43, %v1208_v39  ;;  %v1322_v39 = vadd.f32 %v4291_v12, %v1260_v48 }
 0x3d0   :  { %v1275_v17 = vadd.f32 %v1274_v26, %v1216_v18 }
 0x3d2   :  { %v1340_v37 = vadd.f32 %v1339_v6, %v1275_v17 }
 0x3d5   :  { %v1164_v7 = vpop.f32.mrf.mxu0  ;;  %v1219_v40 = vpop.f32.mrf.mxu1 }
 0x3d6   :  { %v1279_v13 = vpop.f32.mrf.mxu2  ;;  %v1220_v21 = vadd.f32 %v1219_v40, %v1157_v4  ;;  %v1345_v2 = vpop.f32.mrf.mxu3  ;;  %v1165_v14 = vadd.f32 %v1164_v7, %v1058_v45  ;;  %v1255_v7 = vadd.f32 %v1254_v41, %v1200_v24  ;;  %v1328_v45 = vadd.f32 %v1327_v31, %v1265_v52  ;;  %v65_v41 = vld [vmem:[%s5044_s2] sm:$0xff] }
 0x3d8   :  { %v1280_v22 = vadd.f32 %v1279_v13, %v1220_v21  ;;  %v1316_v17 = vadd.f32 %v4287_v10, %v1255_v7 }
 0x3da   :  { %v1346_v40 = vadd.f32 %v1345_v2, %v1280_v22 }
 0x3dd   :  { %v1223_v32 = vpop.f32.mrf.mxu1  ;;  %v4289_v9 = vpop.f32.mrf.mxu0 }
 0x3de   :  { %v1224_v56 = vadd.f32 %v1223_v32, %v1165_v14  ;;  %v1284_v59 = vpop.f32.mrf.mxu2  ;;  %v1351_v2 = vpop.f32.mrf.mxu3 }
 0x3e0   :  { %v1285_v44 = vadd.f32 %v1284_v59, %v1224_v56 }
 0x3e5   :  { %v4293_v42 = vpop.f32.mrf.mxu0  ;;  %v4295_v30 = vpop.f32.mrf.mxu1 }
 0x3e6   :  { %v1383_v12 = vadd.f32 %v4293_v42, %v1316_v17 }
 0x3ed   :  { %v4297_v25 = vpop.f32.mrf.mxu0  ;;  %v4299_v28 = vpop.f32.mrf.mxu1 }
 0x3ee   :  { %v1387_v36 = vadd.f32 %v4297_v25, %v1322_v39  ;;  %v1478_v25 = vsel %vm1476_vm13, %v65_v41, 0 }
 0x3f5   :  { %v1390_v49 = vpop.f32.mrf.mxu0  ;;  %v4301_v50 = vpop.f32.mrf.mxu1 }
 0x3f6   :  { %v1391_v22 = vadd.f32 %v1390_v49, %v1328_v45  ;;  %v1438_v43 = vadd.f32 %v4301_v50, %v1387_v36  ;;  %v1379_v49 = vadd.f32 %v4289_v9, %v1310_v35  ;;  %v66_v9 = vld [vmem:[%s5044_s2 + $0x8] sm:$0xff] }
 0x3f7   :  { %v1481_v34 = vsel %vm1476_vm13, %v66_v9, 0  ;;  %v1474_v9 = vpop.permute.xlu1 %1473 }
 0x3f8   :  { %v1430_v38 = vadd.f32 %v4295_v30, %v1379_v49  ;;  %v1462_v42 = vmax.f32 %v1438_v43, 0.0  ;;  %v4366_v56 = vand.u32 4294901760, %v1481_v34  ;;  %v3810_v49 = vmov 5  }
 0x3f9   :  { %3661 = vset.pattern.permute.xlu0 %v3810_v49 }
 0x3fa   :  { %v1460_v13 = vmax.f32 %v1430_v38, 0.0  ;;  %v4341_v15 = vand.u32 4294901760, %v1462_v42 }
 0x3fc   :  { %v4369_v29 = vsub.f32 %v1462_v42, %v4341_v15 }
 0x3fd   :  { %v1394_v53 = vpop.f32.mrf.mxu0  ;;  %v1441_v54 = vpop.f32.mrf.mxu1 }
 0x3fe   :  { %v1395_v33 = vadd.f32 %v1394_v53, %v1334_v46  ;;  %v1442_v32 = vadd.f32 %v1441_v54, %v1391_v22  ;;  %v1434_v53 = vadd.f32 %v4299_v28, %v1383_v12  ;;  %v1564_v19 = vand.u32 4294901760, %v4369_v29 }
 0x400   :  { %v1463_v6 = vmax.f32 %v1442_v32, 0.0  ;;  %v1461_v28 = vmax.f32 %v1434_v53, 0.0  ;;  %v1565_v36 = vsub.f32 %v4369_v29, %v1564_v19  ;;  %v5071_v53 = vmov 0  }
 0x402   :  { %v4334_v5 = vand.u32 4294901760, %v1463_v6 }
 0x404   :  { %v4358_v61 = vsub.f32 %v1463_v6, %v4334_v5 }
 0x405   :  { %v1398_v62 = vpop.f32.mrf.mxu0  ;;  %v1445_v63 = vpop.f32.mrf.mxu1 }
 0x406   :  { %v1399_v58 = vadd.f32 %v1398_v62, %v1340_v37  ;;  %v1446_v14 = vadd.f32 %v1445_v63, %v1395_v33  ;;  %v4324_v63 = vand.u32 4294901760, %v1478_v25  ;;  %v4363_v37 = vand.u32 4294901760, %v1460_v13 }
 0x407   :  { %v1558_v45 = vand.u32 4294901760, %v4358_v61 }
 0x408   :  { %v1464_v31 = vmax.f32 %v1446_v14, 0.0  ;;  %v4344_v18 = vsub.f32 %v1478_v25, %v4324_v63  ;;  %v4394_v33 = vsub.f32 %v1460_v13, %v4363_v37  ;;  %v5069_v25 = vld [vmem:[#allocation6_spill] sm:$0xff] }
 0x409   :  { %1797 = vperm.xlu0 %3661, %v5069_v25  }
 0x40a   :  { %v4326_v50 = vand.u32 4294901760, %v1464_v31 }
 0x40c   :  { %v4347_v21 = vsub.f32 %v1464_v31, %v4326_v50 }
 0x40d   :  { %v1449_v20 = vpop.f32.mrf.mxu1  ;;  %v1402_v16 = vpop.f32.mrf.mxu0 }
 0x40e   :  { %v1403_v26 = vadd.f32 %v1402_v16, %v1346_v40  ;;  %v1450_v57 = vadd.f32 %v1449_v20, %v1399_v58  ;;  %v1352_v20 = vadd.f32 %v1351_v2, %v1285_v44  ;;  %v4355_v16 = vand.u32 4294901760, %v1461_v28 }
 0x40f   :  { %v1509_v40 = vand.u32 4294901760, %v4344_v18  ;;  %v1552_v46 = vand.u32 4294901760, %v4347_v21  ;;  %v4391_v44 = vsub.f32 %v1481_v34, %v4366_v56  ;;  %v1559_v2 = vsub.f32 %v4358_v61, %v1558_v45 }
 0x410   :  { %v1465_v11 = vmax.f32 %v1450_v57, 0.0  ;;  %v4380_v58 = vsub.f32 %v1461_v28, %v4355_v16 }
 0x411   :  { %v1560_v41 = vand.u32 4294901760, %v1559_v2  ;;  %3664 = vset.pattern.permute.xlu0 %v5071_v53 }
 0x412   :  { %v4321_v54 = vand.u32 4294901760, %v1465_v11  ;;  %v1570_v22 = vand.u32 4294901760, %v4380_v58 }
 0x414   :  { %v4337_v8 = vsub.f32 %v1465_v11, %v4321_v54  ;;  %v1566_v11 = vand.u32 4294901760, %v1565_v36 }
 0x415   :  { %v1453_v60 = vpop.f32.mrf.mxu1  ;;  %v1406_v3 = vpop.f32.mrf.mxu0 }
 0x416   :  { %v1454_v1 = vadd.f32 %v1453_v60, %v1403_v26  ;;  %v1407_v47 = vadd.f32 %v1406_v3, %v1352_v20  ;;  %v1546_v52 = vand.u32 4294901760, %v4337_v8  ;;  %v1510_v60 = vsub.f32 %v4344_v18, %v1509_v40 }
 0x417   :  { %v1576_v3 = vand.u32 4294901760, %v4394_v33  ;;  %v1571_v20 = vsub.f32 %v4380_v58, %v1570_v22 }
 0x418   :  { %v1466_v27 = vmax.f32 %v1454_v1, 0.0  ;;  %v1547_v7 = vsub.f32 %v4337_v8, %v1546_v52  ;;  %v1553_v1 = vsub.f32 %v4347_v21, %v1552_v46  ;;  %v1511_v14 = vand.u32 4294901760, %v1510_v60  ;;  %v5074_v60 = vld [vmem:[#allocation7_spill] sm:$0xff] }
 0x419   :  { %v1577_v35 = vsub.f32 %v4394_v33, %v1576_v3  ;;  %v1572_v12 = vand.u32 4294901760, %v1571_v20  ;;  %v3596_v20 = vld [vmem:[%s5043_s1 + $0x80] sm:$0xff] }
 0x41a   :  { %v4316_v10 = vand.u32 4294901760, %v1466_v27  ;;  %v1548_v39 = vand.u32 4294901760, %v1547_v7  ;;  %v1554_v17 = vand.u32 4294901760, %v1553_v1 }
 0x41b   :  { %v1578_v31 = vand.u32 4294901760, %v1577_v35 }
 0x41c   :  { %v4329_v0 = vsub.f32 %v1466_v27, %v4316_v10  ;;  %v1517_v27 = vand.u32 4294901760, %v4391_v44 }
 0x41d   :  { %v1457_v51 = vpop.f32.mrf.mxu1 }
 0x41e   :  { %v1458_v62 = vadd.f32 %v1457_v51, %v1407_v47  ;;  %v1540_v55 = vand.u32 4294901760, %v4329_v0  ;;  %v1518_v32 = vsub.f32 %v4391_v44, %v1517_v27  ;;  %v3809_v47 = vmov 4   ;;  %v5070_v51 = vld [vmem:[#allocation5_spill] sm:$0xff] }
 0x41f   :  { %3659 = vset.pattern.permute.xlu1 %v3809_v47  ;;  %3658 = vset.pattern.permute.xlu2 %v3809_v47 }
 0x420   :  { %v1467_v4 = vmax.f32 %v1458_v62, 0.0  ;;  %v1541_v59 = vsub.f32 %v4329_v0, %v1540_v55  ;;  %v1519_v43 = vand.u32 4294901760, %v1518_v32  ;;  %1787 = vperm.xlu1 %3659, %v5069_v25   ;;  %1791 = vperm.xlu2 %3658, %v5070_v51  }
 0x422   :  { %v4339_v30 = vand.u32 4294901760, %v1467_v4  ;;  %v1542_v57 = vand.u32 4294901760, %v1541_v59 }
 0x424   :  { %v4350_v23 = vsub.f32 %v1467_v4, %v4339_v30  ;;  %1492 = vmatpush.msrb.mxu2 %v4339_v30 }
 0x426   :  { %v1534_v24 = vand.u32 4294901760, %v4350_v23  ;;  %1494 = vmatpush.msrb.mxu2 %v4316_v10 }
 0x428   :  { %1496 = vmatpush.msrb.mxu2 %v4321_v54  ;;  %v1535_v48 = vsub.f32 %v4350_v23, %v1534_v24  ;;  %3662 = vset.pattern.permute.xlu1 %v5071_v53 }
 0x429   :  { %3660 = vset.pattern.permute.xlu2 %v3810_v49 }
 0x42a   :  { %1498 = vmatpush.msrb.mxu2 %v4326_v50  ;;  %v1536_v26 = vand.u32 4294901760, %v1535_v48  ;;  %1801 = vperm.xlu2 %3660, %v5070_v51   ;;  %v3597_v51 = vld [vmem:[%s5043_s1 + $0x88] sm:$0xff] }
 0x42c   :  { %1500 = vmatpush.msrb.mxu2 %v4334_v5  ;;  %1537 = vmatpush.msrb.mxu3 %v1536_v26 }
 0x42e   :  { %1502 = vmatpush.msrb.mxu2 %v4341_v15  ;;  %1543 = vmatpush.msrb.mxu3 %v1542_v57 }
 0x430   :  { %1504 = vmatpush.msrb.mxu2 %v4355_v16  ;;  %1549 = vmatpush.msrb.mxu3 %v1548_v39 }
 0x432   :  { %1506 = vmatpush.msrb.mxu2 %v4363_v37  ;;  %1555 = vmatpush.msrb.mxu3 %v1554_v17 }
 0x433   :  { %1512 = vmatmul.f32.vlgmr.msrb.gmra.mxu2 %v1511_v14  ;;  %3663 = vset.pattern.permute.xlu2 %v5071_v53 }
 0x434   :  { %1599 = vmatpush.msra.mxu2 %v4350_v23  ;;  %1561 = vmatpush.msrb.mxu3 %v1560_v41 }
 0x436   :  { %1602 = vmatpush.msra.mxu2 %v4329_v0  ;;  %1567 = vmatpush.msrb.mxu3 %v1566_v11  ;;  %v1470_v0 = vpop.permute.xlu0 %1469  ;;  %v1874_v11 = vsel %vm113_vm0, %v3596_v20, 0  ;;  %v3601_v20 = vld [vmem:[%s5043_s1 + $0xa8] sm:$0xff] }
 0x438   :  { %1605 = vmatpush.msra.mxu2 %v4337_v8  ;;  %1573 = vmatpush.msrb.mxu3 %v1572_v12 }
 0x43a   :  { %1608 = vmatpush.msra.mxu2 %v4347_v21  ;;  %1579 = vmatpush.msrb.mxu3 %v1578_v31  ;;  %v4485_v31 = vand.u32 4294901760, %v1874_v11 }
 0x43b   :  { %1520 = vmatmul.f32.gmra.mxu2 %v1519_v43  ;;  %1581 = vmatmul.f32.vlgmr.msrb.gmra.mxu3 %v4324_v63 }
 0x43c   :  { %1611 = vmatpush.msra.mxu2 %v4358_v61  ;;  %1641 = vmatpush.msra.mxu3 %v4339_v30 }
 0x43e   :  { %1614 = vmatpush.msra.mxu2 %v4369_v29  ;;  %1643 = vmatpush.msra.mxu3 %v4316_v10 }
 0x440   :  { %1617 = vmatpush.msra.mxu2 %v4380_v58  ;;  %1645 = vmatpush.msra.mxu3 %v4321_v54 }
 0x442   :  { %1620 = vmatpush.msra.mxu2 %v4394_v33  ;;  %1647 = vmatpush.msra.mxu3 %v4326_v50 }
 0x443   :  { %1585 = vmatmul.f32.gmra.mxu3 %v4366_v56  ;;  %1623 = vmatmul.f32.vlgmr.msra.gmra.mxu2 %v4344_v18 }
 0x444   :  { %1680 = vmatpush.msrb.mxu2 %v1534_v24  ;;  %1649 = vmatpush.msra.mxu3 %v4334_v5 }
 0x446   :  { %1684 = vmatpush.msrb.mxu2 %v1540_v55  ;;  %1651 = vmatpush.msra.mxu3 %v4341_v15 }
 0x448   :  { %1688 = vmatpush.msrb.mxu2 %v1546_v52  ;;  %1653 = vmatpush.msra.mxu3 %v4355_v16 }
 0x44a   :  { %1692 = vmatpush.msrb.mxu2 %v1552_v46  ;;  %1655 = vmatpush.msra.mxu3 %v4363_v37 }
 0x44b   :  { %1628 = vmatmul.f32.gmra.mxu2 %v4391_v44  ;;  %1659 = vmatmul.f32.vlgmr.msra.gmra.mxu3 %v1509_v40 }
 0x44c   :  { %1696 = vmatpush.msrb.mxu2 %v1558_v45  ;;  %1727 = vmatpush.msrb.mxu3 %v4339_v30 }
 0x44e   :  { %1700 = vmatpush.msrb.mxu2 %v1564_v19  ;;  %1729 = vmatpush.msrb.mxu3 %v4316_v10 }
 0x450   :  { %1704 = vmatpush.msrb.mxu2 %v1570_v22  ;;  %1731 = vmatpush.msrb.mxu3 %v4321_v54 }
 0x452   :  { %1708 = vmatpush.msrb.mxu2 %v1576_v3  ;;  %1733 = vmatpush.msrb.mxu3 %v4326_v50 }
 0x453   :  { %1665 = vmatmul.f32.gmra.mxu3 %v1517_v27  ;;  %1710 = vmatmul.f32.vlgmr.msrb.gmra.mxu2 %v4324_v63 }
 0x454   :  { %1735 = vmatpush.msrb.mxu3 %v4334_v5 }
 0x456   :  { %1737 = vmatpush.msrb.mxu3 %v4341_v15 }
 0x458   :  { %1739 = vmatpush.msrb.mxu3 %v4355_v16 }
 0x45a   :  { %1741 = vmatpush.msrb.mxu3 %v4363_v37  ;;  %v5072_v37 = vld [vmem:[#allocation8_spill] sm:$0xff] }
 0x45b   :  { %1714 = vmatmul.f32.gmra.mxu2 %v4366_v56  ;;  %1743 = vmatmul.f32.vlgmr.msrb.gmra.mxu3 %v4324_v63 }
 0x463   :  { %1747 = vmatmul.f32.gmra.mxu3 %v4366_v56  ;;  %v5073_v56 = vld [vmem:[#allocation9_spill] sm:$0xff] }
 0x47a   :  { %v1792_v12 = vpop.permute.xlu2 %1791 }
 0x4b6   :  { %v1513_v10 = vpop.f32.mrf.mxu2 }
 0x4b7   :  { %v1514_v5 = vadd.f32 %v1513_v10, %v1470_v0 }
 0x4be   :  { %v1521_v6 = vpop.f32.mrf.mxu2  ;;  %v1582_v54 = vpop.f32.mrf.mxu3 }
 0x4bf   :  { %v1522_v8 = vadd.f32 %v1521_v6, %v1474_v9  ;;  %v1583_v30 = vadd.f32 %v1582_v54, %v1514_v5  ;;  %v1910_v6 = vsub.f32 %v1874_v11, %v4485_v31  ;;  %v3617_v54 = vld [vmem:[%s5045_s3 + $0x98] sm:$0xff]  ;;  %v1802_v5 = vpop.permute.xlu2 %1801 }
 0x4c0   :  { %1860 = vperm.xlu1 %3662, %v3617_v54   ;;  %v3619_v54 = vld [vmem:[%s5045_s3 + $0xa8] sm:$0xff] }
 0x4c1   :  { %v1911_v0 = vand.u32 4294901760, %v1910_v6  ;;  %1870 = vperm.xlu0 %3664, %v3619_v54  }
 0x4c6   :  { %v1586_v62 = vpop.f32.mrf.mxu3  ;;  %v1624_v38 = vpop.f32.mrf.mxu2 }
 0x4c7   :  { %v1587_v15 = vadd.f32 %v1586_v62, %v1522_v8  ;;  %v1625_v18 = vadd.f32 %v1624_v38, %v1583_v30  ;;  %v1877_v62 = vsel %vm113_vm0, %v3597_v51, 0  ;;  %v1798_v8 = vpop.permute.xlu0 %1797  ;;  %v3598_v30 = vld [vmem:[%s5043_s1 + $0x90] sm:$0xff] }
 0x4ce   :  { %v1629_v42 = vpop.f32.mrf.mxu2  ;;  %v1660_v50 = vpop.f32.mrf.mxu3 }
 0x4cf   :  { %v1630_v63 = vadd.f32 %v1629_v42, %v1587_v15  ;;  %v1661_v21 = vadd.f32 %v1660_v50, %v1625_v18  ;;  %v1788_v50 = vpop.permute.xlu1 %1787  ;;  %v1912_v18 = vsub.f32 %v1910_v6, %v1911_v0 }
 0x4d6   :  { %v1666_v4 = vpop.f32.mrf.mxu3  ;;  %v1711_v28 = vpop.f32.mrf.mxu2 }
 0x4d7   :  { %v1667_v55 = vadd.f32 %v1666_v4, %v1630_v63  ;;  %v1712_v34 = vadd.f32 %v1711_v28, %v1661_v21  ;;  %v4495_v4 = vand.u32 4294901760, %v1877_v62  ;;  %v4504_v21 = vld [vmem:[%s5045_s3 + $0x88] sm:$0xff] }
 0x4d8   :  { %1850 = vperm.xlu1 %3662, %v4504_v21  }
 0x4d9   :  { %v1918_v63 = vsub.f32 %v1877_v62, %v4495_v4 }
 0x4de   :  { %v1744_v13 = vpop.f32.mrf.mxu3  ;;  %v1715_v23 = vpop.f32.mrf.mxu2 }
 0x4df   :  { %v1716_v16 = vadd.f32 %v1715_v23, %v1667_v55  ;;  %v1745_v61 = vadd.f32 %v1744_v13, %v1712_v34  ;;  %v1880_v34 = vsel %vm113_vm0, %v3598_v30, 0 }
 0x4e1   :  { %v1751_v40 = vadd.f32 %v1745_v61, %v5072_v37  ;;  %v4514_v37 = vand.u32 4294901760, %v1880_v34 }
 0x4e6   :  { %v1748_v24 = vpop.f32.mrf.mxu3 }
 0x4e7   :  { %v1749_v52 = vadd.f32 %v1748_v24, %v1716_v16  ;;  %v1913_v24 = vand.u32 4294901760, %v1912_v18 }
 0x4e9   :  { %v1752_v29 = vadd.f32 %v1749_v52, %v5073_v56  ;;  %v1919_v52 = vand.u32 4294901760, %v1918_v63 }
 0x4eb   :  { %v1753_v48 = vadd.f32 %v1752_v29, %v1751_v40 }
 0x4ed   :  { %v1754_v59 = vrot.slane %v1753_v48, 4 }
 0x4ef   :  { %v1755_v46 = vadd.f32 %v1754_v59, %v1753_v48 }
 0x4f1   :  { %v1756_v58 = vrot.slane %v1755_v46, 2 }
 0x4f3   :  { %v1757_v26 = vadd.f32 %v1756_v58, %v1755_v46  ;;  %v1920_v46 = vsub.f32 %v1918_v63, %v1919_v52  ;;  %v1926_v58 = vsub.f32 %v1880_v34, %v4514_v37 }
 0x4f5   :  { %v1758_v7 = vrot.slane %v1757_v26, 1 }
 0x4f7   :  { %v1759_v45 = vadd.f32 %v1758_v7, %v1757_v26  ;;  %v3616_v26 = vld [vmem:[%s5045_s3 + $0x90] sm:$0xff] }
 0x4f8   :  { %1855 = vperm.xlu2 %3663, %v3616_v26  }
 0x4f9   :  { %v1760_v44 = vmul.f32 %v1759_v45, %v5074_v60 }
 0x4fb   :  { %v1761_v33 = vsub.f32 %v1751_v40, %v1760_v44  ;;  %v1762_v57 = vsub.f32 %v1752_v29, %v1760_v44  ;;  %v3599_v29 = vld [vmem:[%s5043_s1 + $0x98] sm:$0xff] }
 0x4fc   :  { %v1883_v44 = vsel %vm113_vm0, %v3599_v29, 0 }
 0x4fd   :  { %v1763_v1 = vmul.f32 %v1761_v33, %v1761_v33  ;;  %v1764_v19 = vmul.f32 %v1762_v57, %v1762_v57 }
 0x4ff   :  { %v1765_v39 = vadd.f32 %v1764_v19, %v1763_v1  ;;  %v1927_v1 = vand.u32 4294901760, %v1926_v58  ;;  %v1933_v19 = vand.u32 4294901760, %v1883_v44 }
 0x501   :  { %v1766_v2 = vrot.slane %v1765_v39, 4 }
 0x503   :  { %v1767_v22 = vadd.f32 %v1766_v2, %v1765_v39  ;;  %v3600_v2 = vld [vmem:[%s5043_s1 + $0xa0] sm:$0xff] }
 0x505   :  { %v1768_v14 = vrot.slane %v1767_v22, 2 }
 0x507   :  { %v1769_v27 = vadd.f32 %v1768_v14, %v1767_v22  ;;  %v1928_v22 = vsub.f32 %v1926_v58, %v1927_v1  ;;  %v1934_v14 = vsub.f32 %v1883_v44, %v1933_v19 }
 0x509   :  { %v1770_v17 = vrot.slane %v1769_v27, 1 }
 0x50b   :  { %v1771_v36 = vadd.f32 %v1770_v17, %v1769_v27  ;;  %v4533_v27 = vld [vmem:[%s5045_s3 + $0x80] sm:$0xff]  ;;  %v1886_v17 = vsel %vm113_vm0, %v3600_v2, 0 }
 0x50c   :  { %1845 = vperm.xlu2 %3663, %v4533_v27  }
 0x50d   :  { %v1772_v3 = vmul.f32 %v1771_v36, %v5074_v60  ;;  %v1929_v36 = vand.u32 4294901760, %v1928_v22 }
 0x50f   :  { %v1773_v41 = vadd.f32 1e-05, %v1772_v3  ;;  %v1935_v3 = vand.u32 4294901760, %v1934_v14 }
 0x511   :  { %3723 = vrsqrt.f32 %v1773_v41  ;;  %vm1780_vm15 = vweird.f32 %v1773_v41 }
 0x517   :  { %v3724_v32 = vpop.eup %3723 }
 0x518   :  { %v1775_v35 = vmul.f32 %v3724_v32, %v1773_v41  ;;  %vm1781_vm14 = vweird.f32 %v3724_v32  ;;  %v1941_v41 = vand.u32 4294901760, %v1886_v17 }
 0x519   :  { %vm1782_vm1 = vmor %vm1780_vm15, %vm1781_vm14 }
 0x51a   :  { %v1776_v43 = vmul.f32 %v3724_v32, %v1775_v35  ;;  %v1942_v11 = vsub.f32 %v1886_v17, %v1941_v41  ;;  %v3618_v35 = vld [vmem:[%s5045_s3 + $0xa0] sm:$0xff] }
 0x51b   :  { %1865 = vperm.xlu1 %3662, %v3618_v35  }
 0x51c   :  { %v1777_v25 = vmul.f32 0.5, %v1776_v43 }
 0x51e   :  { %v1778_v10 = vsub.f32 1.5, %v1777_v25  ;;  %v1943_v25 = vand.u32 4294901760, %v1942_v11 }
 0x520   :  { %v1779_v38 = vmul.f32 %v3724_v32, %v1778_v10  ;;  %v1944_v10 = vsub.f32 %v1942_v11, %v1943_v25 }
 0x522   :  { %v1783_v42 = vsel %vm1782_vm1, %v3724_v32, %v1779_v38  ;;  %v1936_v32 = vsub.f32 %v1934_v14, %v1935_v3  ;;  %v1945_v62 = vand.u32 4294901760, %v1944_v10 }
 0x523   :  { %v1785_v9 = vmul.f32 %v1783_v42, %v1762_v57  ;;  %v1784_v28 = vmul.f32 %v1783_v42, %v1761_v33  ;;  %v1921_v57 = vand.u32 4294901760, %v1920_v46 }
 0x524   :  { %v1937_v43 = vand.u32 4294901760, %v1936_v32 }
 0x525   :  { %v1795_v13 = vmul.f32 %v1792_v12, %v1785_v9  ;;  %v1794_v15 = vmul.f32 %v1788_v50, %v1784_v28  ;;  %v1889_v12 = vsel %vm113_vm0, %v3601_v20, 0  ;;  %v5075_v50 = vmov 2  }
 0x526   :  { %v1949_v51 = vand.u32 4294901760, %v1889_v12  ;;  %3665 = vset.pattern.permute.xlu0 %v5075_v50 }
 0x527   :  { %v4506_v23 = vadd.f32 %v1802_v5, %v1795_v13  ;;  %v4508_v55 = vadd.f32 %v1798_v8, %v1794_v15 }
 0x529   :  { %v1905_v16 = vand.u32 4294901760, %v4506_v23  ;;  %v1907_v61 = vand.u32 4294901760, %v4508_v55 }
 0x52b   :  { %v1973_v40 = vsub.f32 %v4506_v23, %v1905_v16  ;;  %1906 = vmatpush.msra.mxu2 %v1905_v16  ;;  %2075 = vmatpush.msra.mxu1 %v1905_v16  ;;  %v1979_v56 = vsub.f32 %v4508_v55, %v1907_v61 }
 0x52d   :  { %1908 = vmatpush.msra.mxu2 %v1907_v61  ;;  %2025 = vmatpush.msra.mxu0 %v1973_v40  ;;  %v1974_v48 = vand.u32 4294901760, %v1973_v40  ;;  %v1980_v59 = vand.u32 4294901760, %v1979_v56 }
 0x52e   :  { %2077 = vmatpush.msra.mxu1 %v1907_v61  ;;  %1914 = vmatmul.f32.vlgmr.msra.gmra.mxu2 %v1913_v24 }
 0x52f   :  { %2028 = vmatpush.msra.mxu0 %v1979_v56  ;;  %2132 = vmatpush.msrb.mxu2 %v1974_v48  ;;  %v1975_v7 = vsub.f32 %v1973_v40, %v1974_v48  ;;  %v1981_v45 = vsub.f32 %v1979_v56, %v1980_v59 }
 0x530   :  { %2031 = vmatmul.f32.vlgmr.msra.gmra.mxu0 %v1910_v6  ;;  %2081 = vmatmul.f32.vlgmr.msra.gmra.mxu1 %v1911_v0  ;;  %v1950_v6 = vsub.f32 %v1889_v12, %v1949_v51 }
 0x531   :  { %2136 = vmatpush.msrb.mxu2 %v1980_v59  ;;  %v1976_v33 = vand.u32 4294901760, %v1975_v7  ;;  %v1982_v39 = vand.u32 4294901760, %v1981_v45 }
 0x532   :  { %v1951_v38 = vand.u32 4294901760, %v1950_v6  ;;  %v1861_v18 = vpop.permute.xlu1 %1860 }
 0x533   :  { %1977 = vmatpush.msra.mxu3 %v1976_v33  ;;  %v1871_v56 = vpop.permute.xlu0 %1870 }
 0x534   :  { %v1952_v42 = vsub.f32 %v1950_v6, %v1951_v38 }
 0x535   :  { %1983 = vmatpush.msra.mxu3 %v1982_v39 }
 0x536   :  { %1922 = vmatmul.f32.gmra.mxu2 %v1921_v57  ;;  %1985 = vmatmul.f32.vlgmr.msra.gmra.mxu3 %v4485_v31  ;;  %v1953_v0 = vand.u32 4294901760, %v1952_v42 }
 0x537   :  { %2177 = vmatpush.msrb.mxu3 %v1905_v16 }
 0x538   :  { %2036 = vmatmul.f32.gmra.mxu0 %v1918_v63  ;;  %2087 = vmatmul.f32.gmra.mxu1 %v1919_v52 }
 0x539   :  { %2179 = vmatpush.msrb.mxu3 %v1907_v61 }
 0x53e   :  { %1930 = vmatmul.f32.gmra.mxu2 %v1929_v36  ;;  %1989 = vmatmul.f32.gmra.mxu3 %v4495_v4 }
 0x540   :  { %2041 = vmatmul.f32.gmra.mxu0 %v1926_v58  ;;  %2093 = vmatmul.f32.gmra.mxu1 %v1927_v1 }
 0x546   :  { %1938 = vmatmul.f32.gmra.mxu2 %v1937_v43  ;;  %1993 = vmatmul.f32.gmra.mxu3 %v4514_v37 }
 0x548   :  { %2046 = vmatmul.f32.gmra.mxu0 %v1934_v14  ;;  %2099 = vmatmul.f32.gmra.mxu1 %v1935_v3 }
 0x54a   :  { %v1851_v61 = vpop.permute.xlu1 %1850 }
 0x54e   :  { %1946 = vmatmul.f32.gmra.mxu2 %v1945_v62  ;;  %1997 = vmatmul.f32.gmra.mxu3 %v1933_v19 }
 0x550   :  { %2051 = vmatmul.f32.gmra.mxu0 %v1942_v11  ;;  %2105 = vmatmul.f32.gmra.mxu1 %v1943_v25 }
 0x556   :  { %1954 = vmatmul.f32.gmra.mxu2 %v1953_v0  ;;  %2001 = vmatmul.f32.gmra.mxu3 %v1941_v41 }
 0x558   :  { %2056 = vmatmul.f32.gmra.mxu0 %v1950_v6  ;;  %2111 = vmatmul.f32.gmra.mxu1 %v1951_v38 }
 0x55e   :  { %2005 = vmatmul.f32.gmra.mxu3 %v1949_v51  ;;  %2138 = vmatmul.f32.vlgmr.msrb.gmra.mxu2 %v4485_v31 }
 0x566   :  { %2142 = vmatmul.f32.gmra.mxu2 %v4495_v4  ;;  %2181 = vmatmul.f32.vlgmr.msrb.gmra.mxu3 %v4485_v31  ;;  %v1856_v31 = vpop.permute.xlu2 %1855 }
 0x56e   :  { %2146 = vmatmul.f32.gmra.mxu2 %v4514_v37  ;;  %2185 = vmatmul.f32.gmra.mxu3 %v4495_v4  ;;  %v1846_v16 = vpop.permute.xlu2 %1845 }
 0x576   :  { %2150 = vmatmul.f32.gmra.mxu2 %v1933_v19  ;;  %2189 = vmatmul.f32.gmra.mxu3 %v4514_v37 }
 0x57e   :  { %2154 = vmatmul.f32.gmra.mxu2 %v1941_v41  ;;  %2193 = vmatmul.f32.gmra.mxu3 %v1933_v19 }
 0x586   :  { %2158 = vmatmul.f32.gmra.mxu2 %v1949_v51  ;;  %2197 = vmatmul.f32.gmra.mxu3 %v1941_v41 }
 0x58e   :  { %2201 = vmatmul.f32.gmra.mxu3 %v1949_v51 }
 0x5ad   :  { %v2032_v4 = vpop.f32.mrf.mxu0  ;;  %v2082_v40 = vpop.f32.mrf.mxu1 }
 0x5b1   :  { %v1915_v9 = vpop.f32.mrf.mxu2 }
 0x5b2   :  { %v1916_v37 = vadd.f32 %v1915_v9, %v1846_v16 }
 0x5b5   :  { %v2037_v58 = vpop.f32.mrf.mxu0  ;;  %v2088_v57 = vpop.f32.mrf.mxu1 }
 0x5b9   :  { %v1923_v28 = vpop.f32.mrf.mxu2  ;;  %v1986_v5 = vpop.f32.mrf.mxu3 }
 0x5ba   :  { %v1924_v29 = vadd.f32 %v1923_v28, %v1851_v61  ;;  %v1987_v48 = vadd.f32 %v1986_v5, %v1916_v37 }
 0x5bc   :  { %v2033_v45 = vadd.f32 %v2032_v4, %v1987_v48 }
 0x5bd   :  { %v2042_v3 = vpop.f32.mrf.mxu0  ;;  %v2094_v20 = vpop.f32.mrf.mxu1 }
 0x5be   :  { %v2083_v1 = vadd.f32 %v2082_v40, %v2033_v45  ;;  %v3621_v45 = vld [vmem:[%s5045_s3 + $0xb8] sm:$0xff] }
 0x5c1   :  { %v1931_v8 = vpop.f32.mrf.mxu2  ;;  %v1990_v30 = vpop.f32.mrf.mxu3 }
 0x5c2   :  { %v1991_v46 = vadd.f32 %v1990_v30, %v1924_v29  ;;  %v1932_v14 = vadd.f32 %v1931_v8, %v1856_v31 }
 0x5c4   :  { %v2038_v33 = vadd.f32 %v2037_v58, %v1991_v46 }
 0x5c5   :  { %v2047_v10 = vpop.f32.mrf.mxu0  ;;  %v2100_v42 = vpop.f32.mrf.mxu1 }
 0x5c6   :  { %v2089_v19 = vadd.f32 %v2088_v57, %v2038_v33 }
 0x5c9   :  { %v1939_v13 = vpop.f32.mrf.mxu2  ;;  %v1994_v15 = vpop.f32.mrf.mxu3 }
 0x5ca   :  { %v1995_v41 = vadd.f32 %v1994_v15, %v1932_v14  ;;  %v1940_v11 = vadd.f32 %v1939_v13, %v1861_v18  ;;  %v1866_v15 = vpop.permute.xlu1 %1865 }
 0x5cc   :  { %v2043_v35 = vadd.f32 %v2042_v3, %v1995_v41 }
 0x5cd   :  { %v2106_v16 = vpop.f32.mrf.mxu1 }
 0x5ce   :  { %v2095_v25 = vadd.f32 %v2094_v20, %v2043_v35 }
 0x5d1   :  { %v1947_v63 = vpop.f32.mrf.mxu2  ;;  %v1998_v34 = vpop.f32.mrf.mxu3 }
 0x5d2   :  { %v1999_v51 = vadd.f32 %v1998_v34, %v1940_v11  ;;  %v1948_v31 = vadd.f32 %v1947_v63, %v1866_v15  ;;  %v2052_v34 = vpop.f32.mrf.mxu0 }
 0x5d4   :  { %v2048_v62 = vadd.f32 %v2047_v10, %v1999_v51 }
 0x5d5   :  { %v2112_v29 = vpop.f32.mrf.mxu1 }
 0x5d6   :  { %v2101_v28 = vadd.f32 %v2100_v42, %v2048_v62 }
 0x5d9   :  { %v1955_v24 = vpop.f32.mrf.mxu2  ;;  %v2002_v52 = vpop.f32.mrf.mxu3 }
 0x5da   :  { %v1956_v59 = vadd.f32 %v1955_v24, %v1871_v56  ;;  %v2003_v18 = vadd.f32 %v2002_v52, %v1948_v31  ;;  %v2057_v52 = vpop.f32.mrf.mxu0 }
 0x5dc   :  { %v2053_v4 = vadd.f32 %v2052_v34, %v2003_v18 }
 0x5de   :  { %v2107_v24 = vadd.f32 %v2106_v16, %v2053_v4 }
 0x5e1   :  { %v2006_v26 = vpop.f32.mrf.mxu3  ;;  %v2139_v7 = vpop.f32.mrf.mxu2 }
 0x5e2   :  { %v2007_v44 = vadd.f32 %v2006_v26, %v1956_v59  ;;  %v2140_v39 = vadd.f32 %v2139_v7, %v2083_v1  ;;  %v3620_v7 = vld [vmem:[%s5045_s3 + $0xb0] sm:$0xff] }
 0x5e4   :  { %v2058_v56 = vadd.f32 %v2057_v52, %v2007_v44  ;;  %v5076_v44 = vmov 3  }
 0x5e6   :  { %v2113_v59 = vadd.f32 %v2112_v29, %v2058_v56 }
 0x5e9   :  { %v2143_v2 = vpop.f32.mrf.mxu2  ;;  %v2182_v22 = vpop.f32.mrf.mxu3 }
 0x5ea   :  { %v2144_v17 = vadd.f32 %v2143_v2, %v2089_v19  ;;  %v4556_v36 = vadd.f32 %v2182_v22, %v2140_v39 }
 0x5f1   :  { %v2186_v32 = vpop.f32.mrf.mxu3  ;;  %v2147_v43 = vpop.f32.mrf.mxu2 }
 0x5f2   :  { %v4558_v12 = vadd.f32 %v2186_v32, %v2144_v17  ;;  %v2148_v6 = vadd.f32 %v2147_v43, %v2095_v25 }
 0x5f9   :  { %v2190_v54 = vpop.f32.mrf.mxu3  ;;  %v2151_v9 = vpop.f32.mrf.mxu2 }
 0x5fa   :  { %v2191_v38 = vadd.f32 %v2190_v54, %v2148_v6  ;;  %v2152_v5 = vadd.f32 %v2151_v9, %v2101_v28 }
 0x5fc   :  { %2291 = vrot.lane.b32.xlu0 %v2191_v38, %s3799_s22  ;;  %2255 = vrot.lane.b32.xlu2 %v2191_v38, %s3803_s26  ;;  %v4563_v0 = vmul.f32 %v2191_v38, %v4556_v36 }
 0x5fd   :  { %2219 = vrot.lane.b32.xlu1 %v2191_v38, %s3801_s24 }
 0x5fe   :  { %v2207_v19 = vrot.slane %v4563_v0, 4 }
 0x600   :  { %v2208_v39 = vadd.f32 %v2207_v19, %v4563_v0 }
 0x601   :  { %v2194_v8 = vpop.f32.mrf.mxu3  ;;  %v2155_v61 = vpop.f32.mrf.mxu2 }
 0x602   :  { %v2195_v30 = vadd.f32 %v2194_v8, %v2152_v5  ;;  %v2156_v63 = vadd.f32 %v2155_v61, %v2107_v24  ;;  %v2209_v41 = vrot.slane %v2208_v39, 2 }
 0x604   :  { %2221 = vrot.lane.b32.xlu0 %v2195_v30, %s3801_s24  ;;  %2239 = vrot.lane.b32.xlu2 %v2195_v30, %s3802_s25  ;;  %v4569_v13 = vmul.f32 %v2195_v30, %v4558_v12  ;;  %v2210_v25 = vadd.f32 %v2209_v41, %v2208_v39 }
 0x605   :  { %2237 = vrot.lane.b32.xlu1 %v2191_v38, %s3802_s25 }
 0x609   :  { %v2198_v37 = vpop.f32.mrf.mxu3  ;;  %v2159_v48 = vpop.f32.mrf.mxu2 }
 0x60a   :  { %v4578_v40 = vadd.f32 %v2198_v37, %v2156_v63  ;;  %v2160_v58 = vadd.f32 %v2159_v48, %v2113_v59 }
 0x60c   :  { %2275 = vrot.lane.b32.xlu0 %v2195_v30, %s3800_s23  ;;  %2257 = vrot.lane.b32.xlu2 %v2195_v30, %s3803_s26 }
 0x60d   :  { %2273 = vrot.lane.b32.xlu1 %v2191_v38, %s3800_s23 }
 0x611   :  { %v2202_v46 = vpop.f32.mrf.mxu3 }
 0x612   :  { %v4590_v26 = vadd.f32 %v2202_v46, %v2160_v58 }
 0x614   :  { %2329 = vrot.lane.b32.xlu0 %v2195_v30, %s3805_s28  ;;  %2293 = vrot.lane.b32.xlu2 %v2195_v30, %s3799_s22 }
 0x615   :  { %2311 = vrot.lane.b32.xlu1 %v2195_v30, %s3804_s27  ;;  %v2211_v30 = vrot.slane %v2210_v25, 1 }
 0x617   :  { %v4641_v29 = vadd.f32 %v2211_v30, %v2210_v25 }
 0x61c   :  { %2425 = vrot.lane.b32.xlu0 %v4578_v40, %s3801_s24  ;;  %2309 = vrot.lane.b32.xlu2 %v2191_v38, %s3804_s27 }
 0x61d   :  { %2327 = vrot.lane.b32.xlu1 %v2191_v38, %s3805_s28 }
 0x624   :  { %2449 = vrot.lane.b32.xlu0 %v4578_v40, %s3800_s23  ;;  %2433 = vrot.lane.b32.xlu2 %v4578_v40, %s3802_s25 }
 0x625   :  { %2441 = vrot.lane.b32.xlu1 %v4578_v40, %s3803_s26 }
 0x62c   :  { %2457 = vrot.lane.b32.xlu2 %v4578_v40, %s3799_s22  ;;  %2443 = vrot.lane.b32.xlu0 %v4590_v26, %s3803_s26  ;;  %s3587_s26 = sshll.u32 %s5047_s5, 4  ;;  %s3588_s26 = int_to_ptr.hbm [resolvable:$true] %s3587_s26 }
 0x62d   :  { %2435 = vrot.lane.b32.xlu1 %v4590_v26, %s3802_s25 }
 0x634   :  { %2467 = vrot.lane.b32.xlu0 %v4590_v26, %s3804_s27  ;;  %2427 = vrot.lane.b32.xlu2 %v4590_v26, %s3801_s24 }
 0x635   :  { %2459 = vrot.lane.b32.xlu1 %v4590_v26, %s3799_s22 }
 0x63c   :  { %2473 = vrot.lane.b32.xlu0 %v4578_v40, %s3805_s28  ;;  %2451 = vrot.lane.b32.xlu2 %v4590_v26, %s3800_s23 }
 0x63d   :  { %2465 = vrot.lane.b32.xlu1 %v4578_v40, %s3804_s27 }
 0x644   :  { %2475 = vrot.lane.b32.xlu2 %v4590_v26, %s3805_s28  ;;  %2757 = vperm.xlu0 %3665, %v4504_v21  }
 0x645   :  { %2513 = vperm.xlu1 %3662, %v3620_v7  }
 0x64c   :  { %2518 = vperm.xlu2 %3663, %v3621_v45   ;;  %3670 = vset.pattern.permute.xlu0 %v5071_v53 }
 0x64d   :  { %3666 = vset.pattern.permute.xlu1 %v5075_v50 }
 0x64e   :  { %2753 = vperm.xlu1 %3666, %v4533_v27  }
 0x654   :  { %3667 = vset.pattern.permute.xlu2 %v5076_v44 }
 0x655   :  { %2767 = vperm.xlu2 %3667, %v4504_v21  }
 0x656   :  { %v2256_v33 = vpop.permute.xlu2 %2255  ;;  %3668 = vset.pattern.permute.xlu1 %v5076_v44 }
 0x657   :  { %2763 = vperm.xlu1 %3668, %v4533_v27   ;;  %v2259_v22 = vmul.f32 %v2256_v33, %v4556_v36  ;;  %v2213_v27 = vrot.slane %v4569_v13, 4 }
 0x659   :  { %v2261_v32 = vrot.slane %v2259_v22, 4  ;;  %v2214_v43 = vadd.f32 %v2213_v27, %v4569_v13 }
 0x65b   :  { %v2262_v54 = vadd.f32 %v2261_v32, %v2259_v22  ;;  %v2215_v5 = vrot.slane %v2214_v43, 2 }
 0x65d   :  { %3669 = vset.pattern.permute.xlu2 %v5071_v53  ;;  %v2263_v16 = vrot.slane %v2262_v54, 2  ;;  %v2216_v52 = vadd.f32 %v2215_v5, %v2214_v43 }
 0x65e   :  { %v2240_v57 = vpop.permute.xlu2 %2239 }
 0x65f   :  { %3671 = vset.pattern.permute.xlu1 %v5071_v53  ;;  %v2242_v2 = vmul.f32 %v2240_v57, %v4558_v12  ;;  %v2264_v33 = vadd.f32 %v2263_v16, %v2262_v54  ;;  %v2217_v22 = vrot.slane %v2216_v52, 1 }
 0x661   :  { %v2249_v53 = vrot.slane %v2242_v2, 4 }
 0x663   :  { %v2250_v10 = vadd.f32 %v2249_v53, %v2242_v2 }
 0x665   :  { %v2251_v18 = vrot.slane %v2250_v10, 2 }
 0x666   :  { %v2258_v1 = vpop.permute.xlu2 %2257 }
 0x667   :  { %v2260_v17 = vmul.f32 %v2258_v1, %v4558_v12  ;;  %v2252_v58 = vadd.f32 %v2251_v18, %v2250_v10 }
 0x669   :  { %v2267_v35 = vrot.slane %v2260_v17, 4 }
 0x66b   :  { %v2268_v9 = vadd.f32 %v2267_v35, %v2260_v17  ;;  %v2265_v35 = vrot.slane %v2264_v33, 1 }
 0x66d   :  { %v2269_v63 = vrot.slane %v2268_v9, 2  ;;  %v4659_v30 = vadd.f32 %v2265_v35, %v2264_v33 }
 0x66e   :  { %v2294_v21 = vpop.permute.xlu2 %2293  ;;  %v2292_v14 = vpop.permute.xlu0 %2291 }
 0x66f   :  { %v2220_v3 = vpop.permute.xlu1 %2219  ;;  %v2296_v6 = vmul.f32 %v2294_v21, %v4558_v12  ;;  %v2295_v38 = vmul.f32 %v2292_v14, %v4556_v36  ;;  %v2270_v2 = vadd.f32 %v2269_v63, %v2268_v9 }
 0x670   :  { %v2223_v20 = vmul.f32 %v2220_v3, %v4556_v36 }
 0x671   :  { %v2303_v34 = vrot.slane %v2296_v6, 4  ;;  %v2297_v24 = vrot.slane %v2295_v38, 4  ;;  %v2271_v10 = vrot.slane %v2270_v2, 1 }
 0x672   :  { %v2225_v11 = vrot.slane %v2223_v20, 4 }
 0x673   :  { %v2304_v7 = vadd.f32 %v2303_v34, %v2296_v6  ;;  %v2298_v1 = vadd.f32 %v2297_v24, %v2295_v38  ;;  %v4649_v6 = vadd.f32 %v2217_v22, %v2216_v52  ;;  %v4662_v34 = vadd.f32 %v2271_v10, %v2270_v2 }
 0x674   :  { %v2226_v51 = vadd.f32 %v2225_v11, %v2223_v20  ;;  %v2253_v20 = vrot.slane %v2252_v58, 1 }
 0x675   :  { %v2305_v53 = vrot.slane %v2304_v7, 2  ;;  %v2299_v43 = vrot.slane %v2298_v1, 2 }
 0x676   :  { %v2227_v62 = vrot.slane %v2226_v51, 2  ;;  %v2310_v42 = vpop.permute.xlu2 %2309  ;;  %v2222_v0 = vpop.permute.xlu0 %2221  ;;  %v4655_v9 = vadd.f32 %v2253_v20, %v2252_v58 }
 0x677   :  { %v2238_v28 = vpop.permute.xlu1 %2237  ;;  %v2224_v8 = vmul.f32 %v2222_v0, %v4558_v12  ;;  %v2313_v13 = vmul.f32 %v2310_v42, %v4556_v36 }
 0x678   :  { %v2228_v15 = vadd.f32 %v2227_v62, %v2226_v51  ;;  %v2241_v31 = vmul.f32 %v2238_v28, %v4556_v36  ;;  %v2306_v28 = vadd.f32 %v2305_v53, %v2304_v7 }
 0x679   :  { %v2231_v4 = vrot.slane %v2224_v8, 4  ;;  %v2315_v59 = vrot.slane %v2313_v13, 4 }
 0x67a   :  { %v2229_v61 = vrot.slane %v2228_v15, 1  ;;  %v2243_v37 = vrot.slane %v2241_v31, 4 }
 0x67b   :  { %v2232_v56 = vadd.f32 %v2231_v4, %v2224_v8  ;;  %v2316_v3 = vadd.f32 %v2315_v59, %v2313_v13  ;;  %v2307_v59 = vrot.slane %v2306_v28, 1 }
 0x67c   :  { %v4643_v48 = vadd.f32 %v2229_v61, %v2228_v15  ;;  %v2244_v46 = vadd.f32 %v2243_v37, %v2241_v31  ;;  %v2300_v15 = vadd.f32 %v2299_v43, %v2298_v1 }
 0x67d   :  { %v2233_v45 = vrot.slane %v2232_v56, 2  ;;  %v2317_v38 = vrot.slane %v2316_v3, 2 }
 0x67e   :  { %v2345_v57 = vmax.f32 %v4641_v29, %v4643_v48  ;;  %v2245_v19 = vrot.slane %v2244_v46, 2  ;;  %v2276_v39 = vpop.permute.xlu0 %2275  ;;  %v4681_v35 = vpop.permute.xlu2 %2433 }
 0x67f   :  { %v2234_v21 = vadd.f32 %v2233_v45, %v2232_v56  ;;  %v2274_v14 = vpop.permute.xlu1 %2273  ;;  %v2278_v17 = vmul.f32 %v2276_v39, %v4558_v12  ;;  %v2318_v37 = vadd.f32 %v2317_v38, %v2316_v3  ;;  %v2301_v45 = vrot.slane %v2300_v15, 1 }
 0x680   :  { %v2246_v27 = vadd.f32 %v2245_v19, %v2244_v46  ;;  %v2277_v41 = vmul.f32 %v2274_v14, %v4556_v36 }
 0x681   :  { %v2235_v32 = vrot.slane %v2234_v21, 1  ;;  %v2285_v11 = vrot.slane %v2278_v17, 4  ;;  %v2319_v39 = vrot.slane %v2318_v37, 1  ;;  %v4673_v3 = vadd.f32 %v2301_v45, %v2300_v15 }
 0x682   :  { %v2247_v25 = vrot.slane %v2246_v27, 1  ;;  %v2279_v51 = vrot.slane %v2277_v41, 4 }
 0x683   :  { %v4651_v54 = vadd.f32 %v2235_v32, %v2234_v21  ;;  %v2286_v62 = vadd.f32 %v2285_v11, %v2278_v17  ;;  %v4671_v21 = vadd.f32 %v2307_v59, %v2306_v28  ;;  %v4679_v11 = vadd.f32 %v2319_v39, %v2318_v37 }
 0x684   :  { %v4653_v42 = vadd.f32 %v2247_v25, %v2246_v27  ;;  %v2280_v0 = vadd.f32 %v2279_v51, %v2277_v41 }
 0x685   :  { %v2352_v5 = vmax.f32 %v4649_v6, %v4651_v54  ;;  %v2287_v8 = vrot.slane %v2286_v62, 2 }
 0x686   :  { %v2346_v13 = vmax.f32 %v2345_v57, %v4653_v42  ;;  %v2281_v31 = vrot.slane %v2280_v0, 2  ;;  %v2330_v18 = vpop.permute.xlu0 %2329 }
 0x687   :  { %v2353_v4 = vmax.f32 %v2352_v5, %v4655_v9  ;;  %v2288_v16 = vadd.f32 %v2287_v8, %v2286_v62  ;;  %v2312_v61 = vpop.permute.xlu1 %2311  ;;  %v2332_v24 = vmul.f32 %v2330_v18, %v4558_v12 }
 0x688   :  { %v2282_v63 = vadd.f32 %v2281_v31, %v2280_v0  ;;  %v2347_v52 = vmax.f32 %v2346_v13, %v4659_v30  ;;  %v2314_v56 = vmul.f32 %v2312_v61, %v4558_v12 }
 0x689   :  { %v2354_v46 = vmax.f32 %v2353_v4, %v4662_v34  ;;  %v2289_v58 = vrot.slane %v2288_v16, 1  ;;  %v2339_v7 = vrot.slane %v2332_v24, 4 }
 0x68a   :  { %v2283_v33 = vrot.slane %v2282_v63, 1  ;;  %v2321_v57 = vrot.slane %v2314_v56, 4 }
 0x68b   :  { %v2290_v1 = vadd.f32 %v2289_v58, %v2288_v16  ;;  %v2340_v19 = vadd.f32 %v2339_v7, %v2332_v24  ;;  %v4698_v16 = vpop.permute.xlu2 %2457 }
 0x68c   :  { %v4669_v2 = vadd.f32 %v2283_v33, %v2282_v63  ;;  %v2322_v22 = vadd.f32 %v2321_v57, %v2314_v56 }
 0x68d   :  { %v2355_v14 = vmax.f32 %v2354_v46, %v2290_v1  ;;  %v2341_v17 = vrot.slane %v2340_v19, 2 }
 0x68e   :  { %v2348_v12 = vmax.f32 %v2347_v52, %v4669_v2  ;;  %v2323_v27 = vrot.slane %v2322_v22, 2  ;;  %v4677_v32 = vpop.permute.xlu0 %2425 }
 0x68f   :  { %v2356_v41 = vmax.f32 %v2355_v14, %v4671_v21  ;;  %v2342_v20 = vadd.f32 %v2341_v17, %v2340_v19  ;;  %v2328_v53 = vpop.permute.xlu1 %2327 }
 0x690   :  { %v2349_v43 = vmax.f32 %v2348_v12, %v4673_v3  ;;  %v2324_v25 = vadd.f32 %v2323_v27, %v2322_v22  ;;  %v2331_v51 = vmul.f32 %v2328_v53, %v4556_v36 }
 0x691   :  { %v2343_v62 = vrot.slane %v2342_v20, 1 }
 0x692   :  { %v2325_v10 = vrot.slane %v2324_v25, 1  ;;  %v2333_v38 = vrot.slane %v2331_v51, 4  ;;  %v2350_v0 = vmax.f32 %v2349_v43, %v4679_v11 }
 0x693   :  { %v4689_v15 = vadd.f32 %v2343_v62, %v2342_v20  ;;  %v2428_v53 = vpop.permute.xlu2 %2427 }
 0x694   :  { %v4686_v28 = vadd.f32 %v2325_v10, %v2324_v25  ;;  %v2334_v5 = vadd.f32 %v2333_v38, %v2331_v51 }
 0x696   :  { %v2357_v8 = vmax.f32 %v2356_v41, %v4686_v28  ;;  %v2335_v13 = vrot.slane %v2334_v5, 2  ;;  %v4696_v36 = vpop.permute.xlu0 %2449 }
 0x697   :  { %v4691_v31 = vpop.permute.xlu1 %2441 }
 0x698   :  { %v4694_v18 = vmax.f32 %v2357_v8, %v4689_v15  ;;  %v2336_v4 = vadd.f32 %v2335_v13, %v2334_v5 }
 0x69a   :  { %v2337_v61 = vrot.slane %v2336_v4, 1  ;;  %v2383_v24 = vsub.f32 %v4649_v6, %v4694_v18  ;;  %v2386_v37 = vsub.f32 %v4651_v54, %v4694_v18  ;;  %v2395_v63 = vsub.f32 %v2290_v1, %v4694_v18 }
 0x69b   :  { %v2389_v52 = vsub.f32 %v4655_v9, %v4694_v18  ;;  %v2404_v56 = vsub.f32 %v4689_v15, %v4694_v18  ;;  %v2392_v59 = vsub.f32 %v4662_v34, %v4694_v18  ;;  %v2398_v46 = vsub.f32 %v4671_v21, %v4694_v18 }
 0x69c   :  { %v2338_v58 = vadd.f32 %v2337_v61, %v2336_v4  ;;  %v2384_v7 = vmul.f32 1.442695, %v2383_v24  ;;  %v2387_v6 = vmul.f32 1.442695, %v2386_v37  ;;  %v2401_v54 = vsub.f32 %v4686_v28, %v4694_v18 }
 0x69d   :  { %v2390_v33 = vmul.f32 1.442695, %v2389_v52  ;;  %v2396_v9 = vmul.f32 1.442695, %v2395_v63  ;;  %v2405_v61 = vmul.f32 1.442695, %v2404_v56 }
 0x69e   :  { %v2351_v45 = vmax.f32 %v2350_v0, %v2338_v58  ;;  %3725 = vpow2.f32 %v2384_v7  ;;  %v2444_v20 = vpop.permute.xlu0 %2443  ;;  %v2402_v8 = vmul.f32 1.442695, %v2401_v54 }
 0x69f   :  { %3727 = vpow2.f32 %v2387_v6  ;;  %v2436_v57 = vpop.permute.xlu1 %2435 }
 0x6a0   :  { %v2359_v1 = vsub.f32 %v4641_v29, %v2351_v45  ;;  %v2362_v19 = vsub.f32 %v4643_v48, %v2351_v45  ;;  %v2365_v34 = vsub.f32 %v4653_v42, %v2351_v45  ;;  %v2368_v39 = vsub.f32 %v4659_v30, %v2351_v45 }
 0x6a1   :  { %v2371_v22 = vsub.f32 %v4669_v2, %v2351_v45  ;;  %v2374_v21 = vsub.f32 %v4673_v3, %v2351_v45  ;;  %v2377_v14 = vsub.f32 %v4679_v11, %v2351_v45  ;;  %3729 = vpow2.f32 %v2390_v33 }
 0x6a2   :  { %v2360_v17 = vmul.f32 1.442695, %v2359_v1  ;;  %v2363_v12 = vmul.f32 1.442695, %v2362_v19  ;;  %v2366_v27 = vmul.f32 1.442695, %v2365_v34  ;;  %3731 = vpow2.f32 %v2396_v9 }
 0x6a3   :  { %v2369_v41 = vmul.f32 1.442695, %v2368_v39  ;;  %v2372_v48 = vmul.f32 1.442695, %v2371_v22  ;;  %v2380_v42 = vsub.f32 %v2338_v58, %v2351_v45  ;;  %v2393_v2 = vmul.f32 1.442695, %v2392_v59  ;;  %v2452_v45 = vpop.permute.xlu2 %2451 }
 0x6a4   :  { %v3726_v29 = vpop.eup %3725  ;;  %3733 = vpow2.f32 %v2360_v17  ;;  %v2399_v11 = vmul.f32 1.442695, %v2398_v46  ;;  %v2375_v38 = vmul.f32 1.442695, %v2374_v21  ;;  %v2378_v13 = vmul.f32 1.442695, %v2377_v14 }
 0x6a5   :  { %v3728_v43 = vpop.eup %3727  ;;  %v2423_v30 = vmul.f32 %v3726_v29, %v4590_v26  ;;  %3735 = vpow2.f32 %v2363_v12  ;;  %v2381_v46 = vmul.f32 1.442695, %v2380_v42 }
 0x6a6   :  { %v2414_v3 = vadd.f32 %v3728_v43, %v3726_v29  ;;  %v2431_v25 = vmul.f32 %v3728_v43, %v2428_v53  ;;  %3737 = vpow2.f32 %v2366_v27  ;;  %v2468_v59 = vpop.permute.xlu0 %2467 }
 0x6a7   :  { %3739 = vpow2.f32 %v2369_v41  ;;  %v3730_v51 = vpop.eup %3729  ;;  %v2460_v62 = vpop.permute.xlu1 %2459 }
 0x6a8   :  { %v2432_v10 = vadd.f32 %v2431_v25, %v2423_v30  ;;  %3741 = vpow2.f32 %v2372_v48  ;;  %v3732_v0 = vpop.eup %3731  ;;  %v2415_v28 = vadd.f32 %v3730_v51, %v2414_v3  ;;  %v2439_v5 = vmul.f32 %v3730_v51, %v2436_v57 }
 0x6a9   :  { %3743 = vpow2.f32 %v2393_v2  ;;  %v2455_v19 = vmul.f32 %v3732_v0, %v2452_v45 }
 0x6aa   :  { %v3734_v15 = vpop.eup %3733  ;;  %v2440_v4 = vadd.f32 %v2439_v5, %v2432_v10  ;;  %3745 = vpow2.f32 %v2399_v11  ;;  %v3602_v11 = vld [vmem:[%s5043_s1 + $0xb0] sm:$0xff] }
 0x6ab   :  { %v3736_v26 = vpop.eup %3735  ;;  %v2421_v18 = vmul.f32 %v3734_v15, %v4578_v40  ;;  %3747 = vpow2.f32 %v2375_v38 }
 0x6ac   :  { %v3738_v24 = vpop.eup %3737  ;;  %v2407_v37 = vadd.f32 %v3736_v26, %v3734_v15  ;;  %v2429_v63 = vmul.f32 %v3736_v26, %v4677_v32  ;;  %3749 = vpow2.f32 %v2402_v8  ;;  %v2522_v8 = vsel %vm113_vm0, %v3602_v11, 0 }
 0x6ad   :  { %v3740_v52 = vpop.eup %3739  ;;  %v2437_v54 = vmul.f32 %v3738_v24, %v4681_v35  ;;  %3751 = vpow2.f32 %v2378_v13 }
 0x6ae   :  { %v3742_v58 = vpop.eup %3741  ;;  %v2430_v7 = vadd.f32 %v2429_v63, %v2421_v18  ;;  %v2408_v6 = vadd.f32 %v3738_v24, %v2407_v37  ;;  %v2445_v56 = vmul.f32 %v3740_v52, %v4691_v31  ;;  %3753 = vpow2.f32 %v2405_v61  ;;  %v2474_v10 = vpop.permute.xlu0 %2473  ;;  %v3603_v24 = vld [vmem:[%s5043_s1 + $0xb8] sm:$0xff] }
 0x6af   :  { %v3744_v40 = vpop.eup %3743  ;;  %v2453_v34 = vmul.f32 %v3742_v58, %v4696_v36  ;;  %3755 = vpow2.f32 %v2381_v46  ;;  %v2466_v17 = vpop.permute.xlu1 %2465  ;;  %v4733_v18 = vand.u32 4294901760, %v2522_v8  ;;  %v2525_v46 = vsel %vm113_vm0, %v3603_v24, 0 }
 0x6b0   :  { %v2409_v33 = vadd.f32 %v3740_v52, %v2408_v6  ;;  %v2438_v9 = vadd.f32 %v2437_v54, %v2430_v7  ;;  %v2416_v57 = vadd.f32 %v3744_v40, %v2415_v28  ;;  %v2447_v32 = vmul.f32 %v3744_v40, %v2444_v20  ;;  %v3746_v1 = vpop.eup %3745 }
 0x6b1   :  { %v3748_v39 = vpop.eup %3747  ;;  %v2463_v27 = vmul.f32 %v3746_v1, %v2460_v62  ;;  %v2476_v62 = vpop.permute.xlu2 %2475  ;;  %v4736_v61 = vsub.f32 %v2522_v8, %v4733_v18 }
 0x6b2   :  { %v2446_v22 = vadd.f32 %v2445_v56, %v2438_v9  ;;  %v2410_v21 = vadd.f32 %v3742_v58, %v2409_v33  ;;  %v2448_v14 = vadd.f32 %v2447_v32, %v2440_v4  ;;  %v2417_v35 = vadd.f32 %v3732_v0, %v2416_v57  ;;  %v3750_v12 = vpop.eup %3749 }
 0x6b3   :  { %v2461_v31 = vmul.f32 %v3748_v39, %v4698_v16  ;;  %v3752_v41 = vpop.eup %3751  ;;  %v2471_v43 = vmul.f32 %v3750_v12, %v2468_v59  ;;  %v2547_v6 = vand.u32 4294901760, %v4736_v61  ;;  %v2553_v9 = vand.u32 4294901760, %v2525_v46 }
 0x6b4   :  { %v2454_v29 = vadd.f32 %v2453_v34, %v2446_v22  ;;  %v2418_v53 = vadd.f32 %v3746_v1, %v2417_v35  ;;  %v2456_v48 = vadd.f32 %v2455_v19, %v2448_v14  ;;  %v2411_v20 = vadd.f32 %v3748_v39, %v2410_v21  ;;  %v3754_v42 = vpop.eup %3753 }
 0x6b5   :  { %v2469_v30 = vmul.f32 %v3752_v41, %v2466_v17  ;;  %v3756_v51 = vpop.eup %3755  ;;  %v2479_v5 = vmul.f32 %v3754_v42, %v2476_v62  ;;  %v2548_v39 = vsub.f32 %v4736_v61, %v2547_v6  ;;  %v2554_v14 = vsub.f32 %v2525_v46, %v2553_v9 }
 0x6b6   :  { %v2464_v36 = vadd.f32 %v2463_v27, %v2456_v48  ;;  %v2419_v2 = vadd.f32 %v3750_v12, %v2418_v53  ;;  %v2412_v3 = vadd.f32 %v3752_v41, %v2411_v20  ;;  %v2462_v25 = vadd.f32 %v2461_v31, %v2454_v29 }
 0x6b7   :  { %v2477_v15 = vmul.f32 %v3756_v51, %v2474_v10  ;;  %v2549_v41 = vand.u32 4294901760, %v2548_v39  ;;  %v2555_v29 = vand.u32 4294901760, %v2554_v14  ;;  %v2514_v8 = vpop.permute.xlu1 %2513 }
 0x6b8   :  { %v2420_v16 = vadd.f32 %v3754_v42, %v2419_v2  ;;  %v2472_v38 = vadd.f32 %v2471_v43, %v2464_v36  ;;  %v2470_v0 = vadd.f32 %v2469_v30, %v2462_v25  ;;  %v2413_v28 = vadd.f32 %v3756_v51, %v2412_v3 }
 0x6b9   :  { %v2556_v43 = vsub.f32 %v2554_v14, %v2555_v29 }
 0x6ba   :  { %3757 = vrcp.f32 %v2420_v16  ;;  %v2480_v13 = vadd.f32 %v2479_v5, %v2472_v38  ;;  %v2478_v26 = vadd.f32 %v2477_v15, %v2470_v0  ;;  %v2507_v58 = vand.u32 2147483648, %v2420_v16 }
 0x6bb   :  { %3759 = vrcp.f32 %v2413_v28  ;;  %v2505_v45 = vand.u32 2147483647, %v2420_v16  ;;  %v2492_v40 = vand.u32 2147483648, %v2413_v28  ;;  %v2490_v33 = vand.u32 2147483647, %v2413_v28 }
 0x6bc   :  { %vm2501_vm4 = vweird.f32 %v2420_v16  ;;  %v2508_v32 = vor.u32 1.1754944e-38, %v2507_v58  ;;  %vm2486_vm6 = vweird.f32 %v2413_v28  ;;  %v2557_v25 = vand.u32 4294901760, %v2556_v43 }
 0x6bd   :  { %vm2506_vm7 = vcmp.eq.f32.partialorder %v2505_v45, 8.507059e+37  ;;  %v2493_v34 = vor.u32 1.1754944e-38, %v2492_v40  ;;  %vm2491_vm9 = vcmp.eq.f32.partialorder %v2490_v33, 8.507059e+37 }
 0x6c0   :  { %v3758_v4 = vpop.eup %3757 }
 0x6c1   :  { %v3760_v37 = vpop.eup %3759  ;;  %v2497_v63 = vmul.f32 %v3758_v4, %v2420_v16  ;;  %vm2502_vm2 = vweird.f32 %v3758_v4 }
 0x6c2   :  { %v2482_v52 = vmul.f32 %v3760_v37, %v2413_v28  ;;  %vm2487_vm3 = vweird.f32 %v3760_v37  ;;  %vm2503_vm5 = vmor %vm2501_vm4, %vm2502_vm2 }
 0x6c3   :  { %v2498_v59 = vsub.f32 1.0, %v2497_v63  ;;  %vm2488_vm8 = vmor %vm2486_vm6, %vm2487_vm3 }
 0x6c4   :  { %v2483_v7 = vsub.f32 1.0, %v2482_v52 }
 0x6c5   :  { %v2499_v54 = vmul.f32 %v3758_v4, %v2498_v59 }
 0x6c6   :  { %v2484_v56 = vmul.f32 %v3760_v37, %v2483_v7 }
 0x6c7   :  { %v2500_v57 = vadd.f32 %v3758_v4, %v2499_v54 }
 0x6c8   :  { %v2485_v1 = vadd.f32 %v3760_v37, %v2484_v56 }
 0x6c9   :  { %v2504_v19 = vsel %vm2503_vm5, %v3758_v4, %v2500_v57 }
 0x6ca   :  { %v2509_v22 = vsel %vm2506_vm7, %v2508_v32, %v2504_v19  ;;  %v2489_v21 = vsel %vm2488_vm8, %v3760_v37, %v2485_v1 }
 0x6cb   :  { %v2510_v35 = vmul.f32 %v2509_v22, %v2480_v13  ;;  %v2494_v17 = vsel %vm2491_vm9, %v2493_v34, %v2489_v21  ;;  %v2519_v13 = vpop.permute.xlu2 %2518 }
 0x6cc   :  { %v2495_v12 = vmul.f32 %v2494_v17, %v2478_v26 }
 0x6cd   :  { %v2541_v27 = vand.u32 4294901760, %v2510_v35 }
 0x6ce   :  { %v2543_v31 = vand.u32 4294901760, %v2495_v12 }
 0x6cf   :  { %2542 = vmatpush.msrb.mxu0 %v2541_v27  ;;  %v2577_v53 = vsub.f32 %v2510_v35, %v2541_v27 }
 0x6d0   :  { %v2583_v48 = vsub.f32 %v2495_v12, %v2543_v31 }
 0x6d1   :  { %2544 = vmatpush.msrb.mxu0 %v2543_v31  ;;  %v2578_v20 = vand.u32 4294901760, %v2577_v53 }
 0x6d2   :  { %2550 = vmatmul.f32.vlgmr.msrb.gmra.mxu0 %v2549_v41  ;;  %v2584_v42 = vand.u32 4294901760, %v2583_v48 }
 0x6d3   :  { %2613 = vmatpush.msra.mxu0 %v2577_v53  ;;  %v2579_v30 = vsub.f32 %v2577_v53, %v2578_v20  ;;  %v3627_v53 = vld [vmem:[%s5045_s3 + $0xe8] sm:$0xff] }
 0x6d4   :  { %v2585_v36 = vsub.f32 %v2583_v48, %v2584_v42  ;;  %2799 = vperm.xlu1 %3671, %v3627_v53  }
 0x6d5   :  { %v2580_v2 = vand.u32 4294901760, %v2579_v30  ;;  %2616 = vmatpush.msra.mxu0 %v2583_v48  ;;  %v3604_v48 = vld [vmem:[%s5043_s1 + $0xc0] sm:$0xff]  ;;  %v3625_v30 = vld [vmem:[%s5045_s3 + $0xd8] sm:$0xff] }
 0x6d6   :  { %v2586_v3 = vand.u32 4294901760, %v2585_v36  ;;  %v2754_v36 = vpop.permute.xlu1 %2753 }
 0x6d7   :  { %2676 = vmatpush.msrb.mxu0 %v2578_v20  ;;  %2581 = vmatpush.msrb.mxu1 %v2580_v2 }
 0x6d9   :  { %2680 = vmatpush.msrb.mxu0 %v2584_v42  ;;  %2587 = vmatpush.msrb.mxu1 %v2586_v3  ;;  %v2813_v42 = vsel %vm113_vm0, %v3604_v48, 0  ;;  %v3629_v48 = vld [vmem:[%s5045_s3 + $0xf8] sm:$0xff] }
 0x6da   :  { %2558 = vmatmul.f32.gmra.mxu0 %v2557_v25  ;;  %2589 = vmatmul.f32.vlgmr.msrb.gmra.mxu1 %v4733_v18  ;;  %v4762_v3 = vand.u32 4294901760, %v2813_v42 }
 0x6db   :  { %2643 = vmatpush.msra.mxu1 %v2541_v27  ;;  %2809 = vperm.xlu2 %3669, %v3629_v48  }
 0x6dc   :  { %2789 = vperm.xlu1 %3671, %v3625_v30  }
 0x6dd   :  { %2645 = vmatpush.msra.mxu1 %v2543_v31 }
 0x6df   :  { %2705 = vmatpush.msrb.mxu1 %v2541_v27 }
 0x6e1   :  { %2707 = vmatpush.msrb.mxu1 %v2543_v31 }
 0x6e2   :  { %2593 = vmatmul.f32.gmra.mxu1 %v2553_v9  ;;  %2619 = vmatmul.f32.vlgmr.msra.gmra.mxu0 %v4736_v61 }
 0x6ea   :  { %2624 = vmatmul.f32.gmra.mxu0 %v2554_v14  ;;  %2649 = vmatmul.f32.vlgmr.msra.gmra.mxu1 %v2547_v6 }
 0x6f2   :  { %2655 = vmatmul.f32.gmra.mxu1 %v2555_v29  ;;  %2682 = vmatmul.f32.vlgmr.msrb.gmra.mxu0 %v4733_v18 }
 0x6fa   :  { %2686 = vmatmul.f32.gmra.mxu0 %v2553_v9  ;;  %2709 = vmatmul.f32.vlgmr.msrb.gmra.mxu1 %v4733_v18 }
 0x702   :  { %2713 = vmatmul.f32.gmra.mxu1 %v2553_v9 }
 0x74f   :  { %v2551_v11 = vpop.f32.mrf.mxu0 }
 0x750   :  { %v2552_v15 = vadd.f32 %v2551_v11, %v2514_v8  ;;  %v3605_v11 = vld [vmem:[%s5043_s1 + $0xc8] sm:$0xff] }
 0x757   :  { %v2559_v51 = vpop.f32.mrf.mxu0  ;;  %v2590_v10 = vpop.f32.mrf.mxu1 }
 0x758   :  { %v2560_v26 = vadd.f32 %v2559_v51, %v2519_v13  ;;  %v2591_v4 = vadd.f32 %v2590_v10, %v2552_v15  ;;  %v2855_v10 = vsub.f32 %v2813_v42, %v4762_v3 }
 0x75a   :  { %v2856_v8 = vand.u32 4294901760, %v2855_v10 }
 0x75f   :  { %v2594_v62 = vpop.f32.mrf.mxu1  ;;  %v2620_v16 = vpop.f32.mrf.mxu0 }
 0x760   :  { %v2595_v24 = vadd.f32 %v2594_v62, %v2560_v26  ;;  %v2621_v37 = vadd.f32 %v2620_v16, %v2591_v4  ;;  %v3628_v62 = vld [vmem:[%s5045_s3 + $0xf0] sm:$0xff]  ;;  %v2816_v16 = vsel %vm113_vm0, %v3605_v11, 0  ;;  %v2764_v4 = vpop.permute.xlu1 %2763 }
 0x761   :  { %2804 = vperm.xlu0 %3670, %v3628_v62   ;;  %v4775_v15 = vand.u32 4294901760, %v2816_v16 }
 0x767   :  { %v2625_v38 = vpop.f32.mrf.mxu0  ;;  %v2650_v0 = vpop.f32.mrf.mxu1 }
 0x768   :  { %v2626_v63 = vadd.f32 %v2625_v38, %v2595_v24  ;;  %v2651_v18 = vadd.f32 %v2650_v0, %v2621_v37  ;;  %v3622_v0 = vld [vmem:[%s5045_s3 + $0xc0] sm:$0xff]  ;;  %v3606_v24 = vld [vmem:[%s5043_s1 + $0xd0] sm:$0xff] }
 0x769   :  { %2774 = vperm.xlu1 %3671, %v3622_v0   ;;  %v3610_v0 = vld [vmem:[%s5043_s1 + $0xf0] sm:$0xff] }
 0x76f   :  { %v2656_v28 = vpop.f32.mrf.mxu1  ;;  %v2683_v5 = vpop.f32.mrf.mxu0 }
 0x770   :  { %v2657_v59 = vadd.f32 %v2656_v28, %v2626_v63  ;;  %v2684_v46 = vadd.f32 %v2683_v5, %v2651_v18  ;;  %v2758_v5 = vpop.permute.xlu0 %2757  ;;  %v2857_v18 = vsub.f32 %v2855_v10, %v2856_v8 }
 0x771   :  { %3674 = vset.pattern.permute.xlu1 %v3809_v47 }
 0x777   :  { %v2710_v61 = vpop.f32.mrf.mxu1  ;;  %v2687_v52 = vpop.f32.mrf.mxu0 }
 0x778   :  { %v2688_v58 = vadd.f32 %v2687_v52, %v2657_v59  ;;  %v2711_v7 = vadd.f32 %v2710_v61, %v2684_v46  ;;  %v2768_v61 = vpop.permute.xlu2 %2767  ;;  %v2863_v52 = vsub.f32 %v2816_v16, %v4775_v15  ;;  %v3623_v59 = vld [vmem:[%s5045_s3 + $0xc8] sm:$0xff] }
 0x779   :  { %2779 = vperm.xlu0 %3670, %v3623_v59  }
 0x77a   :  { %v2717_v45 = vadd.f32 %v2711_v7, %v4508_v55  ;;  %v2819_v7 = vsel %vm113_vm0, %v3606_v24, 0  ;;  %v3611_v24 = vld [vmem:[%s5043_s1 + $0xf8] sm:$0xff] }
 0x77f   :  { %v2714_v6 = vpop.f32.mrf.mxu1 }
 0x780   :  { %v2715_v54 = vadd.f32 %v2714_v6, %v2688_v58 }
 0x782   :  { %v2718_v40 = vadd.f32 %v2715_v54, %v4506_v23 }
 0x784   :  { %v2719_v56 = vadd.f32 %v2718_v40, %v2717_v45 }
 0x786   :  { %v2720_v33 = vrot.slane %v2719_v56, 4 }
 0x788   :  { %v2721_v9 = vadd.f32 %v2720_v33, %v2719_v56  ;;  %v4791_v56 = vand.u32 4294901760, %v2819_v7 }
 0x78a   :  { %v2722_v57 = vrot.slane %v2721_v9, 2 }
 0x78c   :  { %v2723_v32 = vadd.f32 %v2722_v57, %v2721_v9  ;;  %v3607_v57 = vld [vmem:[%s5043_s1 + $0xd8] sm:$0xff] }
 0x78e   :  { %v2724_v1 = vrot.slane %v2723_v32, 1 }
 0x790   :  { %v2725_v19 = vadd.f32 %v2724_v1, %v2723_v32 }
 0x792   :  { %v2726_v34 = vmul.f32 %v2725_v19, %v5074_v60 }
 0x794   :  { %v2728_v39 = vsub.f32 %v2718_v40, %v2726_v34  ;;  %v2727_v22 = vsub.f32 %v2717_v45, %v2726_v34  ;;  %v2858_v45 = vand.u32 4294901760, %v2857_v18  ;;  %v2864_v40 = vand.u32 4294901760, %v2863_v52 }
 0x795   :  { %v2871_v34 = vsub.f32 %v2819_v7, %v4791_v56  ;;  %v2834_v18 = vsel %vm113_vm0, %v3611_v24, 0 }
 0x796   :  { %v2730_v21 = vmul.f32 %v2728_v39, %v2728_v39  ;;  %v2729_v14 = vmul.f32 %v2727_v22, %v2727_v22  ;;  %v2865_v19 = vsub.f32 %v2863_v52, %v2864_v40  ;;  %v2910_v7 = vand.u32 4294901760, %v2834_v18 }
 0x798   :  { %v2731_v35 = vadd.f32 %v2730_v21, %v2729_v14  ;;  %v2822_v21 = vsel %vm113_vm0, %v3607_v57, 0 }
 0x79a   :  { %v2732_v17 = vrot.slane %v2731_v35, 4 }
 0x79c   :  { %v2733_v12 = vadd.f32 %v2732_v17, %v2731_v35  ;;  %v5077_v35 = vmov 1   ;;  %v2866_v17 = vand.u32 4294901760, %v2865_v19 }
 0x79d   :  { %3673 = vset.pattern.permute.xlu0 %v5077_v35 }
 0x79e   :  { %v2734_v27 = vrot.slane %v2733_v12, 2 }
 0x7a0   :  { %v2735_v55 = vadd.f32 %v2734_v27, %v2733_v12  ;;  %v2872_v12 = vand.u32 4294901760, %v2871_v34  ;;  %v4802_v27 = vand.u32 4294901760, %v2822_v21 }
 0x7a2   :  { %v2736_v31 = vrot.slane %v2735_v55, 1  ;;  %v2879_v53 = vsub.f32 %v2822_v21, %v4802_v27 }
 0x7a4   :  { %v2737_v23 = vadd.f32 %v2736_v31, %v2735_v55  ;;  %v4807_v55 = vld [vmem:[%s5045_s3 + $0x88] sm:$0xff]  ;;  %v4813_v31 = vld [vmem:[%s5045_s3 + $0x80] sm:$0xff] }
 0x7a5   :  { %3225 = vperm.xlu0 %3673, %v4807_v55   ;;  %3538 = vperm.xlu1 %3674, %v4813_v31  }
 0x7a6   :  { %v2738_v41 = vmul.f32 %v2737_v23, %v5074_v60 }
 0x7a8   :  { %v2739_v29 = vadd.f32 1e-05, %v2738_v41  ;;  %v3608_v41 = vld [vmem:[%s5043_s1 + $0xe0] sm:$0xff] }
 0x7aa   :  { %3761 = vrsqrt.f32 %v2739_v29  ;;  %vm2746_vm11 = vweird.f32 %v2739_v29 }
 0x7ad   :  { %3676 = vset.pattern.permute.xlu1 %v3810_v49  ;;  %3678 = vset.pattern.permute.xlu0 %v5075_v50 }
 0x7ae   :  { %3548 = vperm.xlu1 %3676, %v4813_v31  }
 0x7b0   :  { %v3762_v20 = vpop.eup %3761 }
 0x7b1   :  { %v2741_v43 = vmul.f32 %v3762_v20, %v2739_v29  ;;  %vm2747_vm10 = vweird.f32 %v3762_v20  ;;  %v2873_v29 = vsub.f32 %v2871_v34, %v2872_v12 }
 0x7b2   :  { %vm2748_vm12 = vmor %vm2746_vm11, %vm2747_vm10 }
 0x7b3   :  { %v2742_v2 = vmul.f32 %v3762_v20, %v2741_v43  ;;  %v2874_v42 = vand.u32 4294901760, %v2873_v29  ;;  %v2880_v43 = vand.u32 4294901760, %v2879_v53 }
 0x7b5   :  { %v2743_v25 = vmul.f32 0.5, %v2742_v2  ;;  %v3609_v2 = vld [vmem:[%s5043_s1 + $0xe8] sm:$0xff] }
 0x7b6   :  { %3679 = vset.pattern.permute.xlu1 %v5075_v50  ;;  %v3624_v50 = vld [vmem:[%s5045_s3 + $0xd0] sm:$0xff] }
 0x7b7   :  { %v2744_v51 = vsub.f32 1.5, %v2743_v25  ;;  %v2881_v25 = vsub.f32 %v2879_v53, %v2880_v43 }
 0x7b9   :  { %v2745_v38 = vmul.f32 %v3762_v20, %v2744_v51  ;;  %v3626_v51 = vld [vmem:[%s5045_s3 + $0xe0] sm:$0xff]  ;;  %v2882_v62 = vand.u32 4294901760, %v2881_v25 }
 0x7ba   :  { %2794 = vperm.xlu2 %3669, %v3626_v51  }
 0x7bb   :  { %v2749_v28 = vsel %vm2748_vm12, %v3762_v20, %v2745_v38  ;;  %v2825_v20 = vsel %vm113_vm0, %v3608_v41, 0 }
 0x7bc   :  { %v2750_v13 = vmul.f32 %v2749_v28, %v2727_v22  ;;  %v2751_v26 = vmul.f32 %v2749_v28, %v2728_v39  ;;  %v4825_v30 = vand.u32 4294901760, %v2825_v20  ;;  %v3770_v28 = vld [vmem:[%s5046_s4 + $0x8] sm:$0xff] }
 0x7bd   :  { %3562 = vperm.xlu1 %3679, %v3770_v28  }
 0x7be   :  { %v2760_v37 = vmul.f32 %v2754_v36, %v2750_v13  ;;  %v2761_v63 = vmul.f32 %v2758_v5, %v2751_v26  ;;  %v4833_v36 = vld [vmem:[%s5046_s4] sm:$0xff]  ;;  %v2887_v11 = vsub.f32 %v2825_v20, %v4825_v30  ;;  %v2831_v13 = vsel %vm113_vm0, %v3610_v0, 0 }
 0x7bf   :  { %3558 = vperm.xlu0 %3678, %v4833_v36  }
 0x7c0   :  { %v4784_v46 = vadd.f32 %v2764_v4, %v2760_v37  ;;  %v4786_v58 = vadd.f32 %v2768_v61, %v2761_v63  ;;  %v2888_v16 = vand.u32 4294901760, %v2887_v11  ;;  %v2902_v61 = vand.u32 4294901760, %v2831_v13 }
 0x7c2   :  { %v2852_v6 = vand.u32 4294901760, %v4784_v46  ;;  %v2850_v54 = vand.u32 4294901760, %v4786_v58  ;;  %v2889_v5 = vsub.f32 %v2887_v11, %v2888_v16  ;;  %2784 = vperm.xlu2 %3669, %v3624_v50   ;;  %v2903_v63 = vsub.f32 %v2831_v13, %v2902_v61 }
 0x7c4   :  { %v2934_v33 = vsub.f32 %v4786_v58, %v2850_v54  ;;  %2851 = vmatpush.msra.mxu2 %v2850_v54  ;;  %3054 = vmatpush.msra.mxu1 %v2850_v54  ;;  %v2940_v9 = vsub.f32 %v4784_v46, %v2852_v6  ;;  %v2890_v26 = vand.u32 4294901760, %v2889_v5  ;;  %v2904_v59 = vand.u32 4294901760, %v2903_v63 }
 0x7c6   :  { %2853 = vmatpush.msra.mxu2 %v2852_v6  ;;  %2994 = vmatpush.msra.mxu0 %v2934_v33  ;;  %v2935_v32 = vand.u32 4294901760, %v2934_v33  ;;  %v2941_v1 = vand.u32 4294901760, %v2940_v9 }
 0x7c7   :  { %3056 = vmatpush.msra.mxu1 %v2852_v6  ;;  %2859 = vmatmul.f32.vlgmr.msra.gmra.mxu2 %v2858_v45 }
 0x7c8   :  { %2997 = vmatpush.msra.mxu0 %v2940_v9  ;;  %3123 = vmatpush.msrb.mxu2 %v2935_v32  ;;  %v2936_v39 = vsub.f32 %v2934_v33, %v2935_v32  ;;  %v2942_v22 = vsub.f32 %v2940_v9, %v2941_v1 }
 0x7c9   :  { %3000 = vmatmul.f32.vlgmr.msra.gmra.mxu0 %v2855_v10  ;;  %3060 = vmatmul.f32.vlgmr.msra.gmra.mxu1 %v2856_v8  ;;  %v2828_v10 = vsel %vm113_vm0, %v3609_v2, 0 }
 0x7ca   :  { %3127 = vmatpush.msrb.mxu2 %v2941_v1  ;;  %v2937_v14 = vand.u32 4294901760, %v2936_v39  ;;  %v2943_v23 = vand.u32 4294901760, %v2942_v22  ;;  %v4845_v38 = vand.u32 4294901760, %v2828_v10  ;;  %3681 = vset.pattern.permute.xlu0 %v5076_v44 }
 0x7cb   :  { %3672 = vset.pattern.permute.xlu2 %v5077_v35 }
 0x7cc   :  { %2938 = vmatpush.msra.mxu3 %v2937_v14  ;;  %v2895_v8 = vsub.f32 %v2828_v10, %v4845_v38  ;;  %3221 = vperm.xlu2 %3672, %v4813_v31  }
 0x7ce   :  { %2944 = vmatpush.msra.mxu3 %v2943_v23  ;;  %v2896_v4 = vand.u32 4294901760, %v2895_v8 }
 0x7cf   :  { %2867 = vmatmul.f32.gmra.mxu2 %v2866_v17  ;;  %2946 = vmatmul.f32.vlgmr.msra.gmra.mxu3 %v4762_v3 }
 0x7d0   :  { %3176 = vmatpush.msrb.mxu3 %v2850_v54  ;;  %v2897_v37 = vsub.f32 %v2895_v8, %v2896_v4  ;;  %v2911_v54 = vsub.f32 %v2834_v18, %v2910_v7 }
 0x7d1   :  { %3005 = vmatmul.f32.gmra.mxu0 %v2863_v52  ;;  %3066 = vmatmul.f32.gmra.mxu1 %v2864_v40 }
 0x7d2   :  { %3178 = vmatpush.msrb.mxu3 %v2852_v6  ;;  %v2898_v52 = vand.u32 4294901760, %v2897_v37  ;;  %v2905_v6 = vsub.f32 %v2903_v63, %v2904_v59  ;;  %v2912_v40 = vand.u32 4294901760, %v2911_v54 }
 0x7d4   :  { %3675 = vset.pattern.permute.xlu2 %v3809_v47  ;;  %v2906_v45 = vand.u32 4294901760, %v2905_v6  ;;  %v2913_v33 = vsub.f32 %v2911_v54, %v2912_v40  ;;  %v2800_v47 = vpop.permute.xlu1 %2799 }
 0x7d5   :  { %3542 = vperm.xlu2 %3675, %v4807_v55  }
 0x7d6   :  { %v2914_v9 = vand.u32 4294901760, %v2913_v33 }
 0x7d7   :  { %2875 = vmatmul.f32.gmra.mxu2 %v2874_v42  ;;  %2950 = vmatmul.f32.gmra.mxu3 %v4775_v15 }
 0x7d9   :  { %3010 = vmatmul.f32.gmra.mxu0 %v2871_v34  ;;  %3072 = vmatmul.f32.gmra.mxu1 %v2872_v12 }
 0x7dd   :  { %3677 = vset.pattern.permute.xlu2 %v3810_v49  ;;  %v2790_v49 = vpop.permute.xlu1 %2789 }
 0x7de   :  { %3552 = vperm.xlu2 %3677, %v4807_v55  }
 0x7df   :  { %2883 = vmatmul.f32.gmra.mxu2 %v2882_v62  ;;  %2954 = vmatmul.f32.gmra.mxu3 %v4791_v56 }
 0x7e1   :  { %3015 = vmatmul.f32.gmra.mxu0 %v2879_v53  ;;  %3078 = vmatmul.f32.gmra.mxu1 %v2880_v43 }
 0x7e6   :  { %3680 = vset.pattern.permute.xlu2 %v5076_v44  ;;  %v4888_v44 = vpop.permute.xlu2 %2809 }
 0x7e7   :  { %2891 = vmatmul.f32.gmra.mxu2 %v2890_v26  ;;  %2958 = vmatmul.f32.gmra.mxu3 %v4802_v27 }
 0x7e8   :  { %3575 = vperm.xlu2 %3680, %v4833_v36  }
 0x7e9   :  { %3020 = vmatmul.f32.gmra.mxu0 %v2887_v11  ;;  %3084 = vmatmul.f32.gmra.mxu1 %v2888_v16 }
 0x7ef   :  { %2899 = vmatmul.f32.gmra.mxu2 %v2898_v52  ;;  %2962 = vmatmul.f32.gmra.mxu3 %v4825_v30 }
 0x7f1   :  { %3025 = vmatmul.f32.gmra.mxu0 %v2895_v8  ;;  %3090 = vmatmul.f32.gmra.mxu1 %v2896_v4 }
 0x7f7   :  { %2907 = vmatmul.f32.gmra.mxu2 %v2906_v45  ;;  %2966 = vmatmul.f32.gmra.mxu3 %v4845_v38 }
 0x7f9   :  { %3030 = vmatmul.f32.gmra.mxu0 %v2903_v63  ;;  %3096 = vmatmul.f32.gmra.mxu1 %v2904_v59 }
 0x7ff   :  { %2915 = vmatmul.f32.gmra.mxu2 %v2914_v9  ;;  %2970 = vmatmul.f32.gmra.mxu3 %v2902_v61 }
 0x801   :  { %3035 = vmatmul.f32.gmra.mxu0 %v2911_v54  ;;  %3102 = vmatmul.f32.gmra.mxu1 %v2912_v40 }
 0x807   :  { %2974 = vmatmul.f32.gmra.mxu3 %v2910_v7  ;;  %3129 = vmatmul.f32.vlgmr.msrb.gmra.mxu2 %v4762_v3 }
 0x80f   :  { %3133 = vmatmul.f32.gmra.mxu2 %v4775_v15  ;;  %3180 = vmatmul.f32.vlgmr.msrb.gmra.mxu3 %v4762_v3 }
 0x814   :  { %v2795_v1 = vpop.permute.xlu2 %2794 }
 0x817   :  { %3137 = vmatmul.f32.gmra.mxu2 %v4791_v56  ;;  %3184 = vmatmul.f32.gmra.mxu3 %v4775_v15  ;;  %v2805_v15 = vpop.permute.xlu0 %2804 }
 0x81c   :  { %v2785_v31 = vpop.permute.xlu2 %2784 }
 0x81f   :  { %3141 = vmatmul.f32.gmra.mxu2 %v4802_v27  ;;  %3188 = vmatmul.f32.gmra.mxu3 %v4791_v56  ;;  %v2775_v56 = vpop.permute.xlu1 %2774  ;;  %v2780_v21 = vpop.permute.xlu0 %2779 }
 0x827   :  { %3145 = vmatmul.f32.gmra.mxu2 %v4825_v30  ;;  %3192 = vmatmul.f32.gmra.mxu3 %v4802_v27 }
 0x82f   :  { %3149 = vmatmul.f32.gmra.mxu2 %v4845_v38  ;;  %3196 = vmatmul.f32.gmra.mxu3 %v4825_v30 }
 0x837   :  { %3153 = vmatmul.f32.gmra.mxu2 %v2902_v61  ;;  %3200 = vmatmul.f32.gmra.mxu3 %v4845_v38 }
 0x83f   :  { %3157 = vmatmul.f32.gmra.mxu2 %v2910_v7  ;;  %3204 = vmatmul.f32.gmra.mxu3 %v2902_v61 }
 0x846   :  { %v3001_v32 = vpop.f32.mrf.mxu0  ;;  %v3061_v22 = vpop.f32.mrf.mxu1 }
 0x847   :  { %3208 = vmatmul.f32.gmra.mxu3 %v2910_v7 }
 0x84a   :  { %v2860_v3 = vpop.f32.mrf.mxu2 }
 0x84b   :  { %v2861_v57 = vadd.f32 %v2860_v3, %v2775_v56 }
 0x84e   :  { %v3006_v28 = vpop.f32.mrf.mxu0  ;;  %v3067_v8 = vpop.f32.mrf.mxu1 }
 0x852   :  { %v2868_v19 = vpop.f32.mrf.mxu2  ;;  %v2947_v34 = vpop.f32.mrf.mxu3 }
 0x853   :  { %v2948_v39 = vadd.f32 %v2947_v34, %v2861_v57  ;;  %v2869_v17 = vadd.f32 %v2868_v19, %v2780_v21 }
 0x855   :  { %v3002_v14 = vadd.f32 %v3001_v32, %v2948_v39 }
 0x856   :  { %v3011_v4 = vpop.f32.mrf.mxu0  ;;  %v3073_v61 = vpop.f32.mrf.mxu1 }
 0x857   :  { %v3062_v35 = vadd.f32 %v3061_v22, %v3002_v14 }
 0x85a   :  { %v2876_v12 = vpop.f32.mrf.mxu2  ;;  %v2951_v27 = vpop.f32.mrf.mxu3 }
 0x85b   :  { %v4890_v55 = vadd.f32 %v2951_v27, %v2869_v17  ;;  %v2877_v23 = vadd.f32 %v2876_v12, %v2785_v31 }
 0x85e   :  { %v3016_v18 = vpop.f32.mrf.mxu0  ;;  %v3079_v7 = vpop.f32.mrf.mxu1 }
 0x862   :  { %v2884_v41 = vpop.f32.mrf.mxu2  ;;  %v2955_v29 = vpop.f32.mrf.mxu3 }
 0x863   :  { %v2956_v53 = vadd.f32 %v2955_v29, %v2877_v23  ;;  %v2885_v48 = vadd.f32 %v2884_v41, %v2790_v49  ;;  %v3007_v29 = vadd.f32 %v3006_v28, %v4890_v55  ;;  %v3612_v55 = vld [vmem:[%s5044_s2 + $0x10] sm:$0xff] }
 0x865   :  { %v3012_v12 = vadd.f32 %v3011_v4, %v2956_v53  ;;  %v3068_v53 = vadd.f32 %v3067_v8, %v3007_v29 }
 0x866   :  { %v3021_v6 = vpop.f32.mrf.mxu0  ;;  %v3085_v40 = vpop.f32.mrf.mxu1 }
 0x86a   :  { %v2892_v20 = vpop.f32.mrf.mxu2  ;;  %v2959_v42 = vpop.f32.mrf.mxu3 }
 0x86b   :  { %v2960_v43 = vadd.f32 %v2959_v42, %v2885_v48  ;;  %v2893_v30 = vadd.f32 %v2892_v20, %v2795_v1 }
 0x86d   :  { %v3017_v21 = vadd.f32 %v3016_v18, %v2960_v43 }
 0x86e   :  { %v3091_v49 = vpop.f32.mrf.mxu1 }
 0x86f   :  { %v3080_v42 = vadd.f32 %v3079_v7, %v3017_v21 }
 0x872   :  { %v2900_v36 = vpop.f32.mrf.mxu2  ;;  %v2963_v2 = vpop.f32.mrf.mxu3 }
 0x873   :  { %v2964_v25 = vadd.f32 %v2963_v2, %v2893_v30  ;;  %v2901_v11 = vadd.f32 %v2900_v36, %v2800_v47  ;;  %v3026_v47 = vpop.f32.mrf.mxu0  ;;  %v3074_v2 = vadd.f32 %v3073_v61, %v3012_v12  ;;  %v3229_v61 = vsel %vm1476_vm13, %v3612_v55, 0 }
 0x875   :  { %v3022_v39 = vadd.f32 %v3021_v6, %v2964_v25 }
 0x876   :  { %v3097_v57 = vpop.f32.mrf.mxu1 }
 0x877   :  { %v3086_v27 = vadd.f32 %v3085_v40, %v3022_v39  ;;  %v4909_v40 = vand.u32 4294901760, %v3229_v61 }
 0x87a   :  { %v2908_v51 = vpop.f32.mrf.mxu2  ;;  %v2967_v10 = vpop.f32.mrf.mxu3 }
 0x87b   :  { %v2968_v62 = vadd.f32 %v2967_v10, %v2901_v11  ;;  %v2909_v16 = vadd.f32 %v2908_v51, %v2805_v15  ;;  %v3031_v56 = vpop.f32.mrf.mxu0 }
 0x87d   :  { %v3027_v1 = vadd.f32 %v3026_v47, %v2968_v62  ;;  %v3613_v47 = vld [vmem:[%s5044_s2 + $0x18] sm:$0xff]  ;;  %s3811_s2 = smov [#allocation2]  }
 0x87e   :  { %v3103_v25 = vpop.f32.mrf.mxu1  ;;  %s3585_s15 = sshll.u32 %s3811_s2, 4  ;;  %s3586_s15 = int_to_ptr.vmem [resolvable:$true] %s3585_s15 }
 0x87f   :  { %v3092_v14 = vadd.f32 %v3091_v49, %v3027_v1  ;;  %v3232_v1 = vsel %vm1476_vm13, %v3613_v47, 0 }
 0x882   :  { %v2916_v38 = vpop.f32.mrf.mxu2  ;;  %v2971_v0 = vpop.f32.mrf.mxu3 }
 0x883   :  { %v2972_v5 = vadd.f32 %v2971_v0, %v2909_v16  ;;  %v2917_v19 = vadd.f32 %v2916_v38, %v4888_v44  ;;  %v3036_v31 = vpop.f32.mrf.mxu0 }
 0x885   :  { %v3032_v34 = vadd.f32 %v3031_v56, %v2972_v5 }
 0x88a   :  { %v2975_v50 = vpop.f32.mrf.mxu3  ;;  %v3130_v13 = vpop.f32.mrf.mxu2 }
 0x88b   :  { %v3131_v26 = vadd.f32 %v3130_v13, %v3062_v35  ;;  %v3098_v35 = vadd.f32 %v3097_v57, %v3032_v34  ;;  %v2976_v17 = vadd.f32 %v2975_v50, %v2917_v19 }
 0x88d   :  { %v3037_v30 = vadd.f32 %v3036_v31, %v2976_v17 }
 0x88f   :  { %v3104_v16 = vadd.f32 %v3103_v25, %v3037_v30 }
 0x892   :  { %v3134_v24 = vpop.f32.mrf.mxu2  ;;  %v3181_v37 = vpop.f32.mrf.mxu3 }
 0x893   :  { %v4892_v63 = vadd.f32 %v3181_v37, %v3131_v26  ;;  %v3135_v50 = vadd.f32 %v3134_v24, %v3068_v53 }
 0x895   :  { %v3212_v49 = vmax.f32 %v4892_v63, 0.0 }
 0x89a   :  { %v3138_v52 = vpop.f32.mrf.mxu2  ;;  %v3185_v59 = vpop.f32.mrf.mxu3 }
 0x89b   :  { %v3139_v10 = vadd.f32 %v3138_v52, %v3074_v2  ;;  %v3186_v37 = vadd.f32 %v3185_v59, %v3135_v50 }
 0x89d   :  { %v3213_v24 = vmax.f32 %v3186_v37, 0.0 }
 0x89f   :  { %v4936_v19 = vand.u32 4294901760, %v3213_v24 }
 0x8a1   :  { %v4961_v31 = vsub.f32 %v3213_v24, %v4936_v19 }
 0x8a2   :  { %v3142_v54 = vpop.f32.mrf.mxu2  ;;  %v3189_v45 = vpop.f32.mrf.mxu3 }
 0x8a3   :  { %v3143_v43 = vadd.f32 %v3142_v54, %v3080_v42  ;;  %v3190_v28 = vadd.f32 %v3189_v45, %v3139_v10 }
 0x8a5   :  { %v3214_v7 = vmax.f32 %v3190_v28, 0.0 }
 0x8aa   :  { %v3146_v33 = vpop.f32.mrf.mxu2  ;;  %v3193_v9 = vpop.f32.mrf.mxu3 }
 0x8ab   :  { %v3147_v48 = vadd.f32 %v3146_v33, %v3086_v27  ;;  %v3194_v38 = vadd.f32 %v3193_v9, %v3143_v43  ;;  %v4958_v27 = vand.u32 4294901760, %v3232_v1 }
 0x8ad   :  { %v3215_v18 = vmax.f32 %v3194_v38, 0.0 }
 0x8af   :  { %v4911_v33 = vand.u32 4294901760, %v3215_v18 }
 0x8b1   :  { %v4939_v63 = vsub.f32 %v3215_v18, %v4911_v33 }
 0x8b2   :  { %v3150_v3 = vpop.f32.mrf.mxu2  ;;  %v3197_v15 = vpop.f32.mrf.mxu3 }
 0x8b3   :  { %v3151_v23 = vadd.f32 %v3150_v3, %v3092_v14  ;;  %v3198_v11 = vadd.f32 %v3197_v15, %v3147_v48  ;;  %v4922_v3 = vand.u32 4294901760, %v3214_v7  ;;  %v3309_v29 = vand.u32 4294901760, %v4939_v63 }
 0x8b5   :  { %v3216_v5 = vmax.f32 %v3198_v11, 0.0  ;;  %v4947_v21 = vsub.f32 %v3214_v7, %v4922_v3  ;;  %v3310_v25 = vsub.f32 %v4939_v63, %v3309_v29  ;;  %v3321_v11 = vand.u32 4294901760, %v4961_v31  ;;  %v3222_v7 = vpop.permute.xlu2 %3221 }
 0x8b7   :  { %v4904_v6 = vand.u32 4294901760, %v3216_v5  ;;  %v3322_v38 = vsub.f32 %v4961_v31, %v3321_v11 }
 0x8b9   :  { %v4925_v15 = vsub.f32 %v3216_v5, %v4904_v6  ;;  %v3323_v5 = vand.u32 4294901760, %v3322_v38 }
 0x8ba   :  { %v3201_v32 = vpop.f32.mrf.mxu3  ;;  %v3154_v22 = vpop.f32.mrf.mxu2 }
 0x8bb   :  { %v3155_v41 = vadd.f32 %v3154_v22, %v3098_v35  ;;  %v3202_v36 = vadd.f32 %v3201_v32, %v3151_v23  ;;  %v4933_v32 = vsub.f32 %v3229_v61, %v4909_v40  ;;  %v4944_v22 = vand.u32 4294901760, %v3212_v49 }
 0x8bc   :  { %v3303_v14 = vand.u32 4294901760, %v4925_v15 }
 0x8bd   :  { %v3217_v0 = vmax.f32 %v3202_v36, 0.0  ;;  %v3260_v12 = vand.u32 4294901760, %v4933_v32  ;;  %v4969_v48 = vsub.f32 %v3212_v49, %v4944_v22 }
 0x8be   :  { %v3304_v30 = vsub.f32 %v4925_v15, %v3303_v14 }
 0x8bf   :  { %v4902_v52 = vand.u32 4294901760, %v3217_v0  ;;  %v3261_v36 = vsub.f32 %v4933_v32, %v3260_v12  ;;  %v3327_v43 = vand.u32 4294901760, %v4969_v48 }
 0x8c1   :  { %v4914_v9 = vsub.f32 %v3217_v0, %v4902_v52  ;;  %v3328_v55 = vsub.f32 %v4969_v48, %v3327_v43 }
 0x8c2   :  { %v3205_v20 = vpop.f32.mrf.mxu3  ;;  %v3158_v62 = vpop.f32.mrf.mxu2 }
 0x8c3   :  { %v3206_v44 = vadd.f32 %v3205_v20, %v3155_v41  ;;  %v3159_v13 = vadd.f32 %v3158_v62, %v3104_v16  ;;  %v3297_v39 = vand.u32 4294901760, %v4914_v9  ;;  %v3315_v20 = vand.u32 4294901760, %v4947_v21 }
 0x8c4   :  { %v3262_v62 = vand.u32 4294901760, %v3261_v36  ;;  %v3311_v16 = vand.u32 4294901760, %v3310_v25  ;;  %v3329_v50 = vand.u32 4294901760, %v3328_v55 }
 0x8c5   :  { %v3218_v51 = vmax.f32 %v3206_v44, 0.0  ;;  %v3298_v41 = vsub.f32 %v4914_v9, %v3297_v39  ;;  %v4980_v44 = vsub.f32 %v3232_v1, %v4958_v27  ;;  %v3316_v10 = vsub.f32 %v4947_v21, %v3315_v20 }
 0x8c7   :  { %v4899_v26 = vand.u32 4294901760, %v3218_v51  ;;  %v3299_v2 = vand.u32 4294901760, %v3298_v41  ;;  %v3268_v53 = vand.u32 4294901760, %v4980_v44  ;;  %v3317_v0 = vand.u32 4294901760, %v3316_v10 }
 0x8c9   :  { %v4907_v54 = vsub.f32 %v3218_v51, %v4899_v26  ;;  %v3305_v51 = vand.u32 4294901760, %v3304_v30  ;;  %v3269_v28 = vsub.f32 %v4980_v44, %v3268_v53 }
 0x8ca   :  { %v3209_v4 = vpop.f32.mrf.mxu3 }
 0x8cb   :  { %v3210_v8 = vadd.f32 %v3209_v4, %v3159_v13  ;;  %v3291_v57 = vand.u32 4294901760, %v4907_v54  ;;  %v3270_v13 = vand.u32 4294901760, %v3269_v28 }
 0x8cd   :  { %v3219_v45 = vmax.f32 %v3210_v8, 0.0  ;;  %v3292_v17 = vsub.f32 %v4907_v54, %v3291_v57 }
 0x8cf   :  { %v4916_v59 = vand.u32 4294901760, %v3219_v45  ;;  %v3293_v42 = vand.u32 4294901760, %v3292_v17 }
 0x8d1   :  { %v4928_v56 = vsub.f32 %v3219_v45, %v4916_v59  ;;  %3243 = vmatpush.msrb.mxu0 %v4916_v59  ;;  %v3226_v45 = vpop.permute.xlu0 %3225 }
 0x8d3   :  { %v3285_v34 = vand.u32 4294901760, %v4928_v56  ;;  %3245 = vmatpush.msrb.mxu0 %v4899_v26 }
 0x8d5   :  { %v3286_v35 = vsub.f32 %v4928_v56, %v3285_v34  ;;  %3247 = vmatpush.msrb.mxu0 %v4902_v52 }
 0x8d7   :  { %3249 = vmatpush.msrb.mxu0 %v4904_v6  ;;  %v3287_v23 = vand.u32 4294901760, %v3286_v35 }
 0x8d9   :  { %3251 = vmatpush.msrb.mxu0 %v4911_v33  ;;  %3288 = vmatpush.msrb.mxu1 %v3287_v23 }
 0x8db   :  { %3253 = vmatpush.msrb.mxu0 %v4922_v3  ;;  %3294 = vmatpush.msrb.mxu1 %v3293_v42 }
 0x8dd   :  { %3255 = vmatpush.msrb.mxu0 %v4936_v19  ;;  %3300 = vmatpush.msrb.mxu1 %v3299_v2 }
 0x8df   :  { %3257 = vmatpush.msrb.mxu0 %v4944_v22  ;;  %3306 = vmatpush.msrb.mxu1 %v3305_v51 }
 0x8e0   :  { %3263 = vmatmul.f32.vlgmr.msrb.gmra.mxu0 %v3262_v62  ;;  %v3543_v62 = vpop.permute.xlu2 %3542 }
 0x8e1   :  { %3350 = vmatpush.msra.mxu0 %v4928_v56  ;;  %3312 = vmatpush.msrb.mxu1 %v3311_v16 }
 0x8e3   :  { %3353 = vmatpush.msra.mxu0 %v4907_v54  ;;  %3318 = vmatpush.msrb.mxu1 %v3317_v0 }
 0x8e5   :  { %3356 = vmatpush.msra.mxu0 %v4914_v9  ;;  %3324 = vmatpush.msrb.mxu1 %v3323_v5 }
 0x8e7   :  { %3359 = vmatpush.msra.mxu0 %v4925_v15  ;;  %3330 = vmatpush.msrb.mxu1 %v3329_v50 }
 0x8e8   :  { %3332 = vmatmul.f32.vlgmr.msrb.gmra.mxu1 %v4909_v40  ;;  %3271 = vmatmul.f32.gmra.mxu0 %v3270_v13  ;;  %v3553_v50 = vpop.permute.xlu2 %3552 }
 0x8e9   :  { %3362 = vmatpush.msra.mxu0 %v4939_v63  ;;  %3392 = vmatpush.msra.mxu1 %v4916_v59 }
 0x8eb   :  { %3365 = vmatpush.msra.mxu0 %v4947_v21  ;;  %3394 = vmatpush.msra.mxu1 %v4899_v26 }
 0x8ed   :  { %3368 = vmatpush.msra.mxu0 %v4961_v31  ;;  %3396 = vmatpush.msra.mxu1 %v4902_v52 }
 0x8ef   :  { %3371 = vmatpush.msra.mxu0 %v4969_v48  ;;  %3398 = vmatpush.msra.mxu1 %v4904_v6 }
 0x8f0   :  { %3336 = vmatmul.f32.gmra.mxu1 %v4958_v27  ;;  %3374 = vmatmul.f32.vlgmr.msra.gmra.mxu0 %v4933_v32 }
 0x8f1   :  { %3431 = vmatpush.msrb.mxu0 %v3285_v34  ;;  %3400 = vmatpush.msra.mxu1 %v4911_v33 }
 0x8f3   :  { %3435 = vmatpush.msrb.mxu0 %v3291_v57  ;;  %3402 = vmatpush.msra.mxu1 %v4922_v3 }
 0x8f5   :  { %3439 = vmatpush.msrb.mxu0 %v3297_v39  ;;  %3404 = vmatpush.msra.mxu1 %v4936_v19 }
 0x8f7   :  { %3443 = vmatpush.msrb.mxu0 %v3303_v14  ;;  %3406 = vmatpush.msra.mxu1 %v4944_v22 }
 0x8f8   :  { %3410 = vmatmul.f32.vlgmr.msra.gmra.mxu1 %v3260_v12  ;;  %3379 = vmatmul.f32.gmra.mxu0 %v4980_v44 }
 0x8f9   :  { %3447 = vmatpush.msrb.mxu0 %v3309_v29  ;;  %3478 = vmatpush.msrb.mxu1 %v4916_v59 }
 0x8fb   :  { %3451 = vmatpush.msrb.mxu0 %v3315_v20  ;;  %3480 = vmatpush.msrb.mxu1 %v4899_v26 }
 0x8fd   :  { %3455 = vmatpush.msrb.mxu0 %v3321_v11  ;;  %3482 = vmatpush.msrb.mxu1 %v4902_v52  ;;  %v3539_v11 = vpop.permute.xlu1 %3538 }
 0x8ff   :  { %3459 = vmatpush.msrb.mxu0 %v3327_v43  ;;  %3484 = vmatpush.msrb.mxu1 %v4904_v6 }
 0x900   :  { %3416 = vmatmul.f32.gmra.mxu1 %v3268_v53  ;;  %3461 = vmatmul.f32.vlgmr.msrb.gmra.mxu0 %v4909_v40 }
 0x901   :  { %3486 = vmatpush.msrb.mxu1 %v4911_v33 }
 0x903   :  { %3488 = vmatpush.msrb.mxu1 %v4922_v3 }
 0x905   :  { %3490 = vmatpush.msrb.mxu1 %v4936_v19  ;;  %v3549_v16 = vpop.permute.xlu1 %3548 }
 0x907   :  { %3492 = vmatpush.msrb.mxu1 %v4944_v22 }
 0x908   :  { %3494 = vmatmul.f32.vlgmr.msrb.gmra.mxu1 %v4909_v40  ;;  %3465 = vmatmul.f32.gmra.mxu0 %v4958_v27 }
 0x910   :  { %3498 = vmatmul.f32.gmra.mxu1 %v4958_v27 }
 0x95d   :  { %v3264_v26 = vpop.f32.mrf.mxu0 }
 0x95e   :  { %v3265_v24 = vadd.f32 %v3264_v26, %v3222_v7  ;;  %v3563_v26 = vpop.permute.xlu1 %3562 }
 0x965   :  { %v3333_v4 = vpop.f32.mrf.mxu1  ;;  %v3272_v61 = vpop.f32.mrf.mxu0 }
 0x966   :  { %v3273_v33 = vadd.f32 %v3272_v61, %v3226_v45  ;;  %v3334_v9 = vadd.f32 %v3333_v4, %v3265_v24  ;;  %v3559_v4 = vpop.permute.xlu0 %3558 }
 0x96d   :  { %v3337_v37 = vpop.f32.mrf.mxu1  ;;  %v3375_v18 = vpop.f32.mrf.mxu0 }
 0x96e   :  { %v3376_v40 = vadd.f32 %v3375_v18, %v3334_v9  ;;  %v3338_v47 = vadd.f32 %v3337_v37, %v3273_v33  ;;  %v3576_v33 = vpop.permute.xlu2 %3575 }
 0x975   :  { %v3411_v52 = vpop.f32.mrf.mxu1  ;;  %v3380_v8 = vpop.f32.mrf.mxu0 }
 0x976   :  { %v3412_v49 = vadd.f32 %v3411_v52, %v3376_v40  ;;  %v3381_v3 = vadd.f32 %v3380_v8, %v3338_v47 }
 0x97d   :  { %v3417_v6 = vpop.f32.mrf.mxu1  ;;  %v3462_v54 = vpop.f32.mrf.mxu0 }
 0x97e   :  { %v3463_v56 = vadd.f32 %v3462_v54, %v3412_v49  ;;  %v3418_v57 = vadd.f32 %v3417_v6, %v3381_v3 }
 0x985   :  { %v3495_v59 = vpop.f32.mrf.mxu1  ;;  %v3466_v15 = vpop.f32.mrf.mxu0 }
 0x986   :  { %v3496_v32 = vadd.f32 %v3495_v59, %v3463_v56  ;;  %v3467_v1 = vadd.f32 %v3466_v15, %v3418_v57 }
 0x988   :  { %v3502_v34 = vadd.f32 %v3496_v32, %v4784_v46 }
 0x98d   :  { %v3499_v19 = vpop.f32.mrf.mxu1 }
 0x98e   :  { %v3500_v63 = vadd.f32 %v3499_v19, %v3467_v1 }
 0x990   :  { %v3503_v39 = vadd.f32 %v3500_v63, %v4786_v58 }
 0x992   :  { %v3504_v22 = vadd.f32 %v3503_v39, %v3502_v34 }
 0x994   :  { %v3505_v21 = vrot.slane %v3504_v22, 4 }
 0x996   :  { %v3506_v14 = vadd.f32 %v3505_v21, %v3504_v22 }
 0x998   :  { %v3507_v35 = vrot.slane %v3506_v14, 2 }
 0x99a   :  { %v3508_v17 = vadd.f32 %v3507_v35, %v3506_v14 }
 0x99c   :  { %v3509_v12 = vrot.slane %v3508_v17, 1 }
 0x99e   :  { %v3510_v27 = vadd.f32 %v3509_v12, %v3508_v17 }
 0x9a0   :  { %v3511_v31 = vmul.f32 %v3510_v27, %v5074_v60 }
 0x9a2   :  { %v3513_v23 = vsub.f32 %v3503_v39, %v3511_v31  ;;  %v3512_v41 = vsub.f32 %v3502_v34, %v3511_v31 }
 0x9a4   :  { %v3515_v29 = vmul.f32 %v3513_v23, %v3513_v23  ;;  %v3514_v48 = vmul.f32 %v3512_v41, %v3512_v41 }
 0x9a6   :  { %v3516_v20 = vadd.f32 %v3515_v29, %v3514_v48 }
 0x9a8   :  { %v3517_v42 = vrot.slane %v3516_v20, 4 }
 0x9aa   :  { %v3518_v30 = vadd.f32 %v3517_v42, %v3516_v20 }
 0x9ac   :  { %v3519_v36 = vrot.slane %v3518_v30, 2 }
 0x9ae   :  { %v3520_v46 = vadd.f32 %v3519_v36, %v3518_v30 }
 0x9b0   :  { %v3521_v44 = vrot.slane %v3520_v46, 1 }
 0x9b2   :  { %v3522_v58 = vadd.f32 %v3521_v44, %v3520_v46 }
 0x9b4   :  { %v3523_v2 = vmul.f32 %v3522_v58, %v5074_v60 }
 0x9b6   :  { %v3524_v25 = vadd.f32 1e-05, %v3523_v2 }
 0x9b8   :  { %3763 = vrsqrt.f32 %v3524_v25  ;;  %vm3531_vm13 = vweird.f32 %v3524_v25 }
 0x9be   :  { %v3764_v43 = vpop.eup %3763 }
 0x9bf   :  { %v3526_v51 = vmul.f32 %v3764_v43, %v3524_v25  ;;  %vm3532_vm0 = vweird.f32 %v3764_v43 }
 0x9c0   :  { %vm3533_vm14 = vmor %vm3531_vm13, %vm3532_vm0 }
 0x9c1   :  { %v3527_v10 = vmul.f32 %v3764_v43, %v3526_v51 }
 0x9c3   :  { %v3528_v53 = vmul.f32 0.5, %v3527_v10 }
 0x9c5   :  { %v3529_v38 = vsub.f32 1.5, %v3528_v53 }
 0x9c7   :  { %v3530_v0 = vmul.f32 %v3764_v43, %v3529_v38 }
 0x9c9   :  { %v3534_v55 = vsel %vm3533_vm14, %v3764_v43, %v3530_v0 }
 0x9ca   :  { %v3535_v28 = vmul.f32 %v3534_v55, %v3512_v41  ;;  %v3536_v5 = vmul.f32 %v3534_v55, %v3513_v23 }
 0x9cc   :  { %v3545_v13 = vmul.f32 %v3539_v11, %v3535_v28  ;;  %v3546_v60 = vmul.f32 %v3543_v62, %v3536_v5 }
 0x9ce   :  { %v3555_v61 = vadd.f32 %v3549_v16, %v3545_v13  ;;  %v3556_v37 = vadd.f32 %v3553_v50, %v3546_v60 }
 0x9d0   :  { %v3566_v18 = vmul.f32 %v3563_v26, %v3556_v37  ;;  %v3565_v52 = vmul.f32 %v3559_v4, %v3555_v61 }
 0x9d2   :  { %v3567_v8 = vadd.f32 %v3566_v18, %v3565_v52 }
 0x9d4   :  { %v3568_v7 = vrot.slane %v3567_v8, 4 }
 0x9d6   :  { %v3569_v6 = vadd.f32 %v3568_v7, %v3567_v8 }
 0x9d8   :  { %v3570_v54 = vrot.slane %v3569_v6, 2 }
 0x9da   :  { %v3571_v45 = vadd.f32 %v3570_v54, %v3569_v6 }
 0x9dc   :  { %v3572_v24 = vrot.slane %v3571_v45, 1 }
 0x9de   :  { %v3573_v9 = vadd.f32 %v3572_v24, %v3571_v45 }
 0x9e0   :  { %v3578_v59 = vadd.f32 %v3576_v33, %v3573_v9 }
 0x9e2   :  { %3579 = vst [vmem:[#allocation2] sm:$0x1] %v3578_v59 }
 0x9e3   :  { %3590 = dma.vmem_to_hbm [thread:$0]  %s3586_s15, 16, %s3588_s26, [#allocation3]  }
 0x9e4   :  { %3795 = dma.done.wait [#allocation3], 16  }
 0x9e5   :  { %3796 = vsyncadd [#allocation3], 4294967280 }
 0x9e6   :  { %3595 = vsyncpa [#allocation3], 1 }

</bundles_post_ra>
